<compile_context>
chip_gen: v6e
topology: v6e:2x2x1
jax: 0.10.0
libtpu: 0.0.40
codegen_flags: <defaults>
</compile_context>

<pallas_src>
import functools

import jax
import jax.numpy as jnp
from jax import lax
from jax.experimental import pallas as pl
from jax.experimental.pallas import tpu as pltpu

EPS = 1e-5
LANE = 128  # lane width: channel dims are padded to a multiple of this


def _round_up(x, m):
    return (x + m - 1) // m * m


def _pick_tm(M, target):
    """M tile: `target` for large M, else M rounded up to the sublane multiple."""
    return target if M >= target else _round_up(M, 8)


def _pick_tn(Nout, target):
    """Output-channel tile: whole Nout if it fits, else the largest multiple of
    128 that divides Nout (channel dims are always padded to 128)."""
    if Nout <= target:
        return Nout
    best = 128
    t = 256
    while t <= target:
        if Nout % t == 0:
            best = t
        t += 128
    return best


# ----------------------------------------------------------------------------
# Kernel 1: fused 1x1 conv  (matmul + folded-BN bias [+ ReLU]).
#   grid = (N_tiles, M_tiles) with M innermost -> weight block index constant
#   across M, so weights are DMA'd once per column tile (not once per M tile).
# ----------------------------------------------------------------------------
def _conv1x1_kernel(x_ref, w_ref, b_ref, o_ref, *, relu):
    acc = jnp.dot(x_ref[...], w_ref[...], preferred_element_type=jnp.float32)
    acc = acc + b_ref[...]
    if relu:
        acc = jnp.maximum(acc, 0.0)
    o_ref[...] = acc.astype(o_ref.dtype)


def fused_conv1x1(x2d, w, b, relu=True, tm_target=512, tn_target=512):
    """(M,K)bf16 @ (K,Nout)bf16 + bias(f32) [+ReLU] -> (M,Nout)bf16."""
    M, K = x2d.shape
    Kw, Nout = w.shape
    assert K == Kw
    tm = _pick_tm(M, tm_target)
    tn = _pick_tn(Nout, tn_target)
    grid = (Nout // tn, pl.cdiv(M, tm))  # M is the inner (fast) axis

    return pl.pallas_call(
        functools.partial(_conv1x1_kernel, relu=relu),
        out_shape=jax.ShapeDtypeStruct((M, Nout), jnp.bfloat16),
        grid=grid,
        in_specs=[
            pl.BlockSpec((tm, K), lambda j, i: (i, 0)),   # activations
            pl.BlockSpec((K, tn), lambda j, i: (0, j)),   # weights (BN scale folded)
            pl.BlockSpec((1, tn), lambda j, i: (0, j)),   # folded BN bias
        ],
        out_specs=pl.BlockSpec((tm, tn), lambda j, i: (i, j)),
        compiler_params=pltpu.CompilerParams(
            dimension_semantics=("parallel", "parallel")),
    )(x2d, w, b)


# ----------------------------------------------------------------------------
# Kernel 2: 3x3 conv (stride, pad=1) + bias + ReLU.
#   Taps are an innermost "arbitrary" grid axis accumulating into an f32 VMEM
#   scratch.  Each grid step DMAs one stride-phase image (taps ordered
#   phase-major so a phase is fetched only once per image) and one tap weight.
# ----------------------------------------------------------------------------
def _conv3x3_kernel(phase_ids_ref, x_ref, w_ref, b_ref, o_ref, acc_ref,
                    *, offsets, Ho, Wo):
    # x_ref : (Hph, Wph, Cin)   one stride-phase image (batch & phase squeezed)
    # w_ref : (Cin, Cout)       current tap weight (BN scale folded)
    # b_ref : (1, Cout) f32 ;   o_ref : (Ho*Wo, Cout) bf16
    # acc_ref: (Ho*Wo, Cout) f32 VMEM scratch, persists across the tap axis.
    del phase_ids_ref
    t = pl.program_id(1)
    cin = x_ref.shape[-1]

    @pl.when(t == 0)
    def _init():
        acc_ref[...] = jnp.zeros_like(acc_ref)

    # Exactly one branch is live per grid step; window offsets are static.
    for idx, (r0, c0) in enumerate(offsets):
        @pl.when(t == idx)
        def _tap(r0=r0, c0=c0):
            win = x_ref[r0:r0 + Ho, c0:c0 + Wo, :]
            acc_ref[...] += jnp.dot(win.reshape(Ho * Wo, cin), w_ref[...],
                                    preferred_element_type=jnp.float32)

    @pl.when(t == len(offsets) - 1)
    def _finalize():
        o_ref[...] = jnp.maximum(acc_ref[...] + b_ref[...], 0.0).astype(o_ref.dtype)


def conv3x3_bn_relu(x_nhwc, w_taps, b, stride):
    """3x3 conv, padding=1, given stride; returns (N, Ho*Wo, Cout) bf16."""
    N, H, W, C = x_nhwc.shape
    Cout = w_taps.shape[2]
    s = stride
    Ho = (H - 1) // s + 1
    Wo = (W - 1) // s + 1
    Hph = max(-(-(H + 2) // s), 2 // s + Ho)
    Wph = max(-(-(W + 2) // s), 2 // s + Wo)
    # TODO(synk): replace this one-time HBM rearrange with strided DMA windows
    # read directly from the NHWC tensor.
    xp = jnp.pad(x_nhwc,
                 ((0, 0), (1, s * Hph - H - 1), (1, s * Wph - W - 1), (0, 0)))
    phases = xp.reshape(N, Hph, s, Wph, s, C).transpose(0, 2, 4, 1, 3, 5)
    phases = phases.reshape(N, s * s, Hph, Wph, C)

    # Order the 9 taps phase-major: the phase block index (hence its DMA) only
    # changes s*s-1 times per image instead of up to 8 times.
    def tap_phase(t):
        dy, dx = t // 3, t % 3
        return (dy % s) * s + (dx % s)

    tap_order = sorted(range(9), key=tap_phase)
    phase_ids = jnp.array([tap_phase(t) for t in tap_order], dtype=jnp.int32)
    offsets = tuple(((t // 3) // s, (t % 3) // s) for t in tap_order)
    w_ord = w_taps[jnp.array(tap_order, dtype=jnp.int32)]

    return pl.pallas_call(
        functools.partial(_conv3x3_kernel, offsets=offsets, Ho=Ho, Wo=Wo),
        out_shape=jax.ShapeDtypeStruct((N, Ho * Wo, Cout), jnp.bfloat16),
        grid_spec=pltpu.PrefetchScalarGridSpec(
            num_scalar_prefetch=1,
            grid=(N, 9),
            in_specs=[
                pl.BlockSpec((None, None, Hph, Wph, C),
                             lambda n, t, ph: (n, ph[t], 0, 0, 0)),
                pl.BlockSpec((None, C, Cout), lambda n, t, ph: (t, 0, 0)),
                pl.BlockSpec((1, Cout), lambda n, t, ph: (0, 0)),
            ],
            out_specs=pl.BlockSpec((None, Ho * Wo, Cout),
                                   lambda n, t, ph: (n, 0, 0)),
            scratch_shapes=[pltpu.VMEM((Ho * Wo, Cout), jnp.float32)],
        ),
        compiler_params=pltpu.CompilerParams(
            dimension_semantics=("parallel", "arbitrary")),
    )(phase_ids, phases, w_ord, b)


# ----------------------------------------------------------------------------
# Kernel 3: conv3 (1x1) + projection shortcut (1x1) + combined bias + add +
#           ReLU fused into one kernel (two matmuls, one store).  Same
#           weight-resident / N-tiled layout as kernel 1.
# ----------------------------------------------------------------------------
def _conv1x1_add_kernel(a_ref, xs_ref, w3_ref, ws_ref, b_ref, o_ref):
    acc = jnp.dot(a_ref[...], w3_ref[...], preferred_element_type=jnp.float32)
    acc += jnp.dot(xs_ref[...], ws_ref[...], preferred_element_type=jnp.float32)
    o_ref[...] = jnp.maximum(acc + b_ref[...], 0.0).astype(o_ref.dtype)


def fused_conv1x1_add_shortcut(a2d, xs2d, w3, ws, b, tm_target=512, tn_target=512):
    M, K3 = a2d.shape
    Ms, Ks = xs2d.shape
    assert M == Ms
    Nout = w3.shape[1]
    tm = _pick_tm(M, tm_target)
    tn = _pick_tn(Nout, tn_target)
    grid = (Nout // tn, pl.cdiv(M, tm))

    return pl.pallas_call(
        _conv1x1_add_kernel,
        out_shape=jax.ShapeDtypeStruct((M, Nout), jnp.bfloat16),
        grid=grid,
        in_specs=[
            pl.BlockSpec((tm, K3), lambda j, i: (i, 0)),   # conv2 output rows
            pl.BlockSpec((tm, Ks), lambda j, i: (i, 0)),   # strided shortcut rows
            pl.BlockSpec((K3, tn), lambda j, i: (0, j)),   # w3 (scale folded)
            pl.BlockSpec((Ks, tn), lambda j, i: (0, j)),   # ws (scale folded)
            pl.BlockSpec((1, tn), lambda j, i: (0, j)),    # b3 + bs
        ],
        out_specs=pl.BlockSpec((tm, tn), lambda j, i: (i, j)),
        compiler_params=pltpu.CompilerParams(
            dimension_semantics=("parallel", "parallel")),
    )(a2d, xs2d, w3, ws, b)


# ----------------------------------------------------------------------------
# Bottleneck forward
# ----------------------------------------------------------------------------
def bottleneck_forward(x_nchw, p, *, stride, cout):
    N, Cin, H, W = x_nchw.shape
    Cin_p, Cmid_p = p["w1"].shape
    Cout_p = p["w3"].shape[1]

    # NCHW -> NHWC, channels zero-padded to a lane multiple, bf16 for the MXU.
    x = jnp.transpose(x_nchw, (0, 2, 3, 1))
    x = jnp.pad(x, ((0, 0), (0, 0), (0, 0), (0, Cin_p - Cin))).astype(jnp.bfloat16)

    # conv1 (1x1) + bn1 + relu
    a1 = fused_conv1x1(x.reshape(N * H * W, Cin_p), p["w1"], p["b1"], relu=True)
    a1 = a1.reshape(N, H, W, Cmid_p)

    # conv2 (3x3, stride, pad=1) + bn2 + relu (tap-axis reduction, VMEM scratch)
    a2 = conv3x3_bn_relu(a1, p["w2"], p["b2"], stride)
    Ho = (H - 1) // stride + 1
    Wo = (W - 1) // stride + 1
    a2 = a2.reshape(N * Ho * Wo, Cmid_p)

    # shortcut input: spatial subsampling.
    # TODO(synk): fold this strided gather into the fused kernel via strided DMA.
    xs = x[:, ::stride, ::stride, :].reshape(N * Ho * Wo, Cin_p)

    # conv3 (1x1) + bn3 + shortcut (1x1 conv + bn) + add + relu: one fused kernel
    out = fused_conv1x1_add_shortcut(a2, xs, p["w3"], p["ws"], p["b3s"])
    out = out.reshape(N, Ho, Wo, Cout_p)[..., :cout].astype(jnp.float32)
    return jnp.transpose(out, (0, 3, 1, 2))                       # back to NCHW


# ----------------------------------------------------------------------------
# Pure-JAX reference (lax.conv, f32) for correctness check
# ----------------------------------------------------------------------------
def ref_forward(x_nchw, raw, stride):
    x = jnp.transpose(x_nchw, (0, 2, 3, 1))

    def conv(x, w_oihw, s, pad):
        w = jnp.transpose(w_oihw, (2, 3, 1, 0))  # HWIO
        return lax.conv_general_dilated(
            x, w, (s, s), pad, dimension_numbers=("NHWC", "HWIO", "NHWC"))

    def bn(x, g, b, m, v):
        return (x - m) / jnp.sqrt(v + EPS) * g + b

    o = jax.nn.relu(bn(conv(x, raw["w1"], 1, "VALID"), *raw["bn1"]))
    o = jax.nn.relu(bn(conv(o, raw["w2"], stride, [(1, 1), (1, 1)]), *raw["bn2"]))
    o = bn(conv(o, raw["w3"], 1, "VALID"), *raw["bn3"])
    sc = bn(conv(x, raw["ws"], stride, "VALID"), *raw["bns"])
    return jnp.transpose(jax.nn.relu(o + sc), (0, 3, 1, 2))


# ----------------------------------------------------------------------------
# Parameter construction & preparation (BN fold, scale->weights, padding, bf16)
# ----------------------------------------------------------------------------
def make_raw_params(key, in_channels, out_channels, expansion=4):
    ks = jax.random.split(key, 8)
    Cin, Cmid, Cout = in_channels, out_channels, expansion * out_channels

    def bn_params(k, c):
        k1, k2, k3, k4 = jax.random.split(k, 4)
        g = 1.0 + 0.1 * jax.random.normal(k1, (c,), jnp.float32)
        b = 0.1 * jax.random.normal(k2, (c,), jnp.float32)
        m = 0.1 * jax.random.normal(k3, (c,), jnp.float32)
        v = jax.random.uniform(k4, (c,), jnp.float32, 0.5, 1.5)
        return (g, b, m, v)

    return {
        "w1": 0.2 * jax.random.normal(ks[0], (Cmid, Cin, 1, 1), jnp.float32),
        "bn1": bn_params(ks[1], Cmid),
        "w2": 0.2 * jax.random.normal(ks[2], (Cmid, Cmid, 3, 3), jnp.float32),
        "bn2": bn_params(ks[3], Cmid),
        "w3": 0.2 * jax.random.normal(ks[4], (Cout, Cmid, 1, 1), jnp.float32),
        "bn3": bn_params(ks[5], Cout),
        "ws": 0.2 * jax.random.normal(ks[6], (Cout, Cin, 1, 1), jnp.float32),
        "bns": bn_params(ks[7], Cout),
    }


def prepare_params(raw, Cin, Cmid, Cout):
    def fold(bn):
        g, b, m, v = bn
        s = g / jnp.sqrt(v + EPS)
        return s, b - m * s

    s1, b1 = fold(raw["bn1"])
    s2, b2 = fold(raw["bn2"])
    s3, b3 = fold(raw["bn3"])
    ss, bs = fold(raw["bns"])

    Cin_p, Cmid_p, Cout_p = (_round_up(c, LANE) for c in (Cin, Cmid, Cout))

    def pad_mat(w, Kp, Np):
        return jnp.pad(w, ((0, Kp - w.shape[0]), (0, Np - w.shape[1])))

    def pad_vec(b, Cp):
        return jnp.pad(b, (0, Cp - b.shape[0])).reshape(1, Cp).astype(jnp.float32)

    # BN scale folded into weight columns; weights stored bf16.
    w1 = pad_mat(raw["w1"][:, :, 0, 0].T * s1[None, :], Cin_p, Cmid_p).astype(jnp.bfloat16)
    w2_taps = []
    for dy in range(3):
        for dx in range(3):
            wt = raw["w2"][:, :, dy, dx].T * s2[None, :]
            w2_taps.append(pad_mat(wt, Cmid_p, Cmid_p))
    w2 = jnp.stack(w2_taps, axis=0).astype(jnp.bfloat16)          # (9, Cmid_p, Cmid_p)
    w3 = pad_mat(raw["w3"][:, :, 0, 0].T * s3[None, :], Cmid_p, Cout_p).astype(jnp.bfloat16)
    ws = pad_mat(raw["ws"][:, :, 0, 0].T * ss[None, :], Cin_p, Cout_p).astype(jnp.bfloat16)

    return {
        "w1": w1, "b1": pad_vec(b1, Cmid_p),
        "w2": w2, "b2": pad_vec(b2, Cmid_p),
        "w3": w3, "ws": ws, "b3s": pad_vec(b3 + bs, Cout_p),
    }


if __name__ == "__main__":
    key = jax.random.PRNGKey(0)
    kx, kp = jax.random.split(key)

    in_channels, out_channels = 4, 4
    Cout = 4 * out_channels
    N, H, W = 2, 16, 16
    x = jax.random.normal(kx, (N, in_channels, H, W), jnp.float32)

    raw = make_raw_params(kp, in_channels, out_channels)
    params = prepare_params(raw, in_channels, out_channels, Cout)

    for stride in (2, 1):
        fwd = jax.jit(functools.partial(bottleneck_forward, stride=stride, cout=Cout))
        out = jax.block_until_ready(fwd(x, params))
        ref = jax.block_until_ready(ref_forward(x, raw, stride))
        Ho = (H - 1) // stride + 1
        assert out.shape == ref.shape == (N, Cout, Ho, Ho)
        rel = float(jnp.max(jnp.abs(out - ref)) / (jnp.max(jnp.abs(ref)) + 1e-6))
        assert rel < 5e-2, f"stride={stride}: relative max error too large: {rel}"

    print("KERNEL_OK")
</pallas_src>

<mosaic_0001>
module attributes {stable_mosaic.version = 11 : i64} {
  func.func @_conv1x1_kernel(%arg0: i32, %arg1: i32, %arg2: memref<512x128xbf16, #tpu.memory_space<vmem>>, %arg3: memref<128x128xbf16, #tpu.memory_space<vmem>>, %arg4: memref<1x128xf32, #tpu.memory_space<vmem>>, %arg5: memref<512x128xbf16, #tpu.memory_space<vmem>>) attributes {dimension_semantics = [#tpu.dimension_semantics<parallel>, #tpu.dimension_semantics<parallel>], iteration_bounds = array<i64: 1, 1>, scalar_prefetch = 0 : i64, scratch_operands = 0 : i64, tpu.core_type = #tpu.core_type<tc>, window_params = [{transform_indices = @transform_0, window_bounds = array<i64: 512, 128>}, {transform_indices = @transform_1, window_bounds = array<i64: 128, 128>}, {transform_indices = @transform_2, window_bounds = array<i64: 1, 128>}, {transform_indices = @transform_3, window_bounds = array<i64: 512, 128>}]} {
    %c0 = arith.constant 0 : index
    %c0_0 = arith.constant 0 : index
    %0 = vector.load %arg2[%c0, %c0_0] : memref<512x128xbf16, #tpu.memory_space<vmem>>, vector<512x128xbf16>
    %c0_1 = arith.constant 0 : index
    %c0_2 = arith.constant 0 : index
    %1 = vector.load %arg3[%c0_1, %c0_2] : memref<128x128xbf16, #tpu.memory_space<vmem>>, vector<128x128xbf16>
    %cst = arith.constant dense<0.000000e+00> : vector<512x128xf32>
    %2 = tpu.matmul %0, %1, %cst {dimension_numbers = #tpu.dot_dimension_numbers<[1], [0], [0], [1], [0, 0, 1, 1], [], []>} : vector<512x128xbf16>, vector<128x128xbf16>, vector<512x128xf32> -> vector<512x128xf32>
    %c0_3 = arith.constant 0 : index
    %c0_4 = arith.constant 0 : index
    %3 = vector.load %arg4[%c0_3, %c0_4] : memref<1x128xf32, #tpu.memory_space<vmem>>, vector<1x128xf32>
    %4 = vector.broadcast %3 : vector<1x128xf32> to vector<512x128xf32>
    %5 = arith.addf %2, %4 : vector<512x128xf32>
    %cst_5 = arith.constant 0.000000e+00 : f32
    %6 = vector.broadcast %cst_5 : f32 to vector<512x128xf32>
    %7 = arith.maximumf %5, %6 : vector<512x128xf32>
    %8 = arith.truncf %7 : vector<512x128xf32> to vector<512x128xbf16>
    %c0_6 = arith.constant 0 : index
    %c0_7 = arith.constant 0 : index
    %9 = vector.load %arg5[%c0_6, %c0_7] : memref<512x128xbf16, #tpu.memory_space<vmem>>, vector<512x128xbf16>
    tpu.vector_store %arg5[%c0_6, %c0_7], %8 {strides = array<i32>} : memref<512x128xbf16, #tpu.memory_space<vmem>>, vector<512x128xbf16>,
    return
  }
  func.func @transform_0(%arg0: i32, %arg1: i32) -> (i32, i32) {
    %c0_i32 = arith.constant 0 : i32
    %c0_i32_0 = arith.constant 0 : i32
    return %arg1, %c0_i32 : i32, i32
  }
  func.func @transform_1(%arg0: i32, %arg1: i32) -> (i32, i32) {
    %c0_i32 = arith.constant 0 : i32
    %c0_i32_0 = arith.constant 0 : i32
    return %c0_i32, %arg0 : i32, i32
  }
  func.func @transform_2(%arg0: i32, %arg1: i32) -> (i32, i32) {
    %c0_i32 = arith.constant 0 : i32
    %c0_i32_0 = arith.constant 0 : i32
    return %c0_i32, %arg0 : i32, i32
  }
  func.func @transform_3(%arg0: i32, %arg1: i32) -> (i32, i32) {
    %c0_i32 = arith.constant 0 : i32
    return %arg1, %arg0 : i32, i32
  }
}

module attributes {stable_mosaic.version = 11 : i64} {
  func.func @_conv3x3_kernel(%arg0: i32, %arg1: i32, %arg2: memref<9xi32, #tpu.memory_space<smem>>, %arg3: memref<1x1x9x9x128xbf16, #tpu.memory_space<vmem>>, %arg4: memref<1x128x128xbf16, #tpu.memory_space<vmem>>, %arg5: memref<1x128xf32, #tpu.memory_space<vmem>>, %arg6: memref<1x64x128xbf16, #tpu.memory_space<vmem>>, %arg7: memref<64x128xf32, #tpu.memory_space<vmem>>) attributes {dimension_semantics = [#tpu.dimension_semantics<parallel>, #tpu.dimension_semantics<arbitrary>], iteration_bounds = array<i64: 2, 9>, scalar_prefetch = 1 : i64, scratch_operands = 1 : i64, tpu.core_type = #tpu.core_type<tc>, window_params = [{transform_indices = @transform_0, window_bounds = array<i64: 1, 1, 9, 9, 128>}, {transform_indices = @transform_1, window_bounds = array<i64: 1, 128, 128>}, {pipeline_mode = #tpu.pipeline_mode<synchronous>, transform_indices = @transform_2, window_bounds = array<i64: 1, 128>}, {transform_indices = @transform_3, window_bounds = array<i64: 1, 64, 128>}]} {
    %c0_i32 = arith.constant 0 : i32
    %0 = arith.cmpi eq, %arg1, %c0_i32 : i32
    %1 = arith.extui %0 : i1 to i32
    %c0_i32_0 = arith.constant 0 : i32
    %2 = arith.cmpi ne, %1, %c0_i32_0 : i32
    scf.if %2 {
      %cst = arith.constant 0.000000e+00 : f32
      %33 = vector.broadcast %cst : f32 to vector<64x128xf32>
      %c0 = arith.constant 0 : index
      %c0_13 = arith.constant 0 : index
      %34 = vector.load %arg7[%c0, %c0_13] : memref<64x128xf32, #tpu.memory_space<vmem>>, vector<64x128xf32>
      tpu.vector_store %arg7[%c0, %c0_13], %33 {strides = array<i32>} : memref<64x128xf32, #tpu.memory_space<vmem>>, vector<64x128xf32>,
    } else {
    }
    %c0_i32_1 = arith.constant 0 : i32
    %3 = arith.cmpi eq, %arg1, %c0_i32_1 : i32
    %4 = arith.extui %3 : i1 to i32
    %c0_i32_2 = arith.constant 0 : i32
    %5 = arith.cmpi ne, %4, %c0_i32_2 : i32
    scf.if %5 {
      %c0 = arith.constant 0 : index
      %c0_13 = arith.constant 0 : index
      %c0_14 = arith.constant 0 : index
      %c0_15 = arith.constant 0 : index
      %c0_16 = arith.constant 0 : index
      %33 = vector.load %arg3[%c0, %c0_13, %c0_14, %c0_15, %c0_16] : memref<1x1x9x9x128xbf16, #tpu.memory_space<vmem>>, vector<1x1x8x8x128xbf16>
      %34 = vector.shape_cast %33 : vector<1x1x8x8x128xbf16> to vector<8x8x128xbf16>
      %c0_17 = arith.constant 0 : index
      %c0_18 = arith.constant 0 : index
      %35 = vector.load %arg7[%c0_17, %c0_18] : memref<64x128xf32, #tpu.memory_space<vmem>>, vector<64x128xf32>
      %36 = vector.shape_cast %34 : vector<8x8x128xbf16> to vector<64x128xbf16>
      %c0_19 = arith.constant 0 : index
      %c0_20 = arith.constant 0 : index
      %c0_21 = arith.constant 0 : index
      %37 = vector.load %arg4[%c0_19, %c0_20, %c0_21] : memref<1x128x128xbf16, #tpu.memory_space<vmem>>, vector<1x128x128xbf16>
      %38 = vector.shape_cast %37 : vector<1x128x128xbf16> to vector<128x128xbf16>
      %cst = arith.constant dense<0.000000e+00> : vector<64x128xf32>
      %39 = tpu.matmul %36, %38, %cst {dimension_numbers = #tpu.dot_dimension_numbers<[1], [0], [0], [1], [0, 0, 1, 1], [], []>} : vector<64x128xbf16>, vector<128x128xbf16>, vector<64x128xf32> -> vector<64x128xf32>
      %40 = arith.addf %35, %39 : vector<64x128xf32>
      %c0_22 = arith.constant 0 : index
      %c0_23 = arith.constant 0 : index
      %41 = vector.load %arg7[%c0_22, %c0_23] : memref<64x128xf32, #tpu.memory_space<vmem>>, vector<64x128xf32>
      tpu.vector_store %arg7[%c0_22, %c0_23], %40 {strides = array<i32>} : memref<64x128xf32, #tpu.memory_space<vmem>>, vector<64x128xf32>,
    } else {
    }
    %c1_i32 = arith.constant 1 : i32
    %6 = arith.cmpi eq, %arg1, %c1_i32 : i32
    %7 = arith.extui %6 : i1 to i32
    %c0_i32_3 = arith.constant 0 : i32
    %8 = arith.cmpi ne, %7, %c0_i32_3 : i32
    scf.if %8 {
      %c0 = arith.constant 0 : index
      %c0_13 = arith.constant 0 : index
      %c0_14 = arith.constant 0 : index
      %c1 = arith.constant 1 : index
      %c0_15 = arith.constant 0 : index
      %33 = vector.load %arg3[%c0, %c0_13, %c0_14, %c1, %c0_15] : memref<1x1x9x9x128xbf16, #tpu.memory_space<vmem>>, vector<1x1x8x8x128xbf16>
      %34 = vector.shape_cast %33 : vector<1x1x8x8x128xbf16> to vector<8x8x128xbf16>
      %c0_16 = arith.constant 0 : index
      %c0_17 = arith.constant 0 : index
      %35 = vector.load %arg7[%c0_16, %c0_17] : memref<64x128xf32, #tpu.memory_space<vmem>>, vector<64x128xf32>
      %36 = vector.shape_cast %34 : vector<8x8x128xbf16> to vector<64x128xbf16>
      %c0_18 = arith.constant 0 : index
      %c0_19 = arith.constant 0 : index
      %c0_20 = arith.constant 0 : index
      %37 = vector.load %arg4[%c0_18, %c0_19, %c0_20] : memref<1x128x128xbf16, #tpu.memory_space<vmem>>, vector<1x128x128xbf16>
      %38 = vector.shape_cast %37 : vector<1x128x128xbf16> to vector<128x128xbf16>
      %cst = arith.constant dense<0.000000e+00> : vector<64x128xf32>
      %39 = tpu.matmul %36, %38, %cst {dimension_numbers = #tpu.dot_dimension_numbers<[1], [0], [0], [1], [0, 0, 1, 1], [], []>} : vector<64x128xbf16>, vector<128x128xbf16>, vector<64x128xf32> -> vector<64x128xf32>
      %40 = arith.addf %35, %39 : vector<64x128xf32>
      %c0_21 = arith.constant 0 : index
      %c0_22 = arith.constant 0 : index
      %41 = vector.load %arg7[%c0_21, %c0_22] : memref<64x128xf32, #tpu.memory_space<vmem>>, vector<64x128xf32>
      tpu.vector_store %arg7[%c0_21, %c0_22], %40 {strides = array<i32>} : memref<64x128xf32, #tpu.memory_space<vmem>>, vector<64x128xf32>,
    } else {
    }
    %c2_i32 = arith.constant 2 : i32
    %9 = arith.cmpi eq, %arg1, %c2_i32 : i32
    %10 = arith.extui %9 : i1 to i32
    %c0_i32_4 = arith.constant 0 : i32
    %11 = arith.cmpi ne, %10, %c0_i32_4 : i32
    scf.if %11 {
      %c0 = arith.constant 0 : index
      %c0_13 = arith.constant 0 : index
      %c1 = arith.constant 1 : index
      %c0_14 = arith.constant 0 : index
      %c0_15 = arith.constant 0 : index
      %33 = vector.load %arg3[%c0, %c0_13, %c1, %c0_14, %c0_15] : memref<1x1x9x9x128xbf16, #tpu.memory_space<vmem>>, vector<1x1x8x8x128xbf16>
      %34 = vector.shape_cast %33 : vector<1x1x8x8x128xbf16> to vector<8x8x128xbf16>
      %c0_16 = arith.constant 0 : index
      %c0_17 = arith.constant 0 : index
      %35 = vector.load %arg7[%c0_16, %c0_17] : memref<64x128xf32, #tpu.memory_space<vmem>>, vector<64x128xf32>
      %36 = vector.shape_cast %34 : vector<8x8x128xbf16> to vector<64x128xbf16>
      %c0_18 = arith.constant 0 : index
      %c0_19 = arith.constant 0 : index
      %c0_20 = arith.constant 0 : index
      %37 = vector.load %arg4[%c0_18, %c0_19, %c0_20] : memref<1x128x128xbf16, #tpu.memory_space<vmem>>, vector<1x128x128xbf16>
      %38 = vector.shape_cast %37 : vector<1x128x128xbf16> to vector<128x128xbf16>
      %cst = arith.constant dense<0.000000e+00> : vector<64x128xf32>
      %39 = tpu.matmul %36, %38, %cst {dimension_numbers = #tpu.dot_dimension_numbers<[1], [0], [0], [1], [0, 0, 1, 1], [], []>} : vector<64x128xbf16>, vector<128x128xbf16>, vector<64x128xf32> -> vector<64x128xf32>
      %40 = arith.addf %35, %39 : vector<64x128xf32>
      %c0_21 = arith.constant 0 : index
      %c0_22 = arith.constant 0 : index
      %41 = vector.load %arg7[%c0_21, %c0_22] : memref<64x128xf32, #tpu.memory_space<vmem>>, vector<64x128xf32>
      tpu.vector_store %arg7[%c0_21, %c0_22], %40 {strides = array<i32>} : memref<64x128xf32, #tpu.memory_space<vmem>>, vector<64x128xf32>,
    } else {
    }
    %c3_i32 = arith.constant 3 : i32
    %12 = arith.cmpi eq, %arg1, %c3_i32 : i32
    %13 = arith.extui %12 : i1 to i32
    %c0_i32_5 = arith.constant 0 : i32
    %14 = arith.cmpi ne, %13, %c0_i32_5 : i32
    scf.if %14 {
      %c0 = arith.constant 0 : index
      %c0_13 = arith.constant 0 : index
      %c1 = arith.constant 1 : index
      %c1_14 = arith.constant 1 : index
      %c0_15 = arith.constant 0 : index
      %33 = vector.load %arg3[%c0, %c0_13, %c1, %c1_14, %c0_15] : memref<1x1x9x9x128xbf16, #tpu.memory_space<vmem>>, vector<1x1x8x8x128xbf16>
      %34 = vector.shape_cast %33 : vector<1x1x8x8x128xbf16> to vector<8x8x128xbf16>
      %c0_16 = arith.constant 0 : index
      %c0_17 = arith.constant 0 : index
      %35 = vector.load %arg7[%c0_16, %c0_17] : memref<64x128xf32, #tpu.memory_space<vmem>>, vector<64x128xf32>
      %36 = vector.shape_cast %34 : vector<8x8x128xbf16> to vector<64x128xbf16>
      %c0_18 = arith.constant 0 : index
      %c0_19 = arith.constant 0 : index
      %c0_20 = arith.constant 0 : index
      %37 = vector.load %arg4[%c0_18, %c0_19, %c0_20] : memref<1x128x128xbf16, #tpu.memory_space<vmem>>, vector<1x128x128xbf16>
      %38 = vector.shape_cast %37 : vector<1x128x128xbf16> to vector<128x128xbf16>
      %cst = arith.constant dense<0.000000e+00> : vector<64x128xf32>
      %39 = tpu.matmul %36, %38, %cst {dimension_numbers = #tpu.dot_dimension_numbers<[1], [0], [0], [1], [0, 0, 1, 1], [], []>} : vector<64x128xbf16>, vector<128x128xbf16>, vector<64x128xf32> -> vector<64x128xf32>
      %40 = arith.addf %35, %39 : vector<64x128xf32>
      %c0_21 = arith.constant 0 : index
      %c0_22 = arith.constant 0 : index
      %41 = vector.load %arg7[%c0_21, %c0_22] : memref<64x128xf32, #tpu.memory_space<vmem>>, vector<64x128xf32>
      tpu.vector_store %arg7[%c0_21, %c0_22], %40 {strides = array<i32>} : memref<64x128xf32, #tpu.memory_space<vmem>>, vector<64x128xf32>,
    } else {
    }
    %c4_i32 = arith.constant 4 : i32
    %15 = arith.cmpi eq, %arg1, %c4_i32 : i32
    %16 = arith.extui %15 : i1 to i32
    %c0_i32_6 = arith.constant 0 : i32
    %17 = arith.cmpi ne, %16, %c0_i32_6 : i32
    scf.if %17 {
      %c0 = arith.constant 0 : index
      %c0_13 = arith.constant 0 : index
      %c0_14 = arith.constant 0 : index
      %c0_15 = arith.constant 0 : index
      %c0_16 = arith.constant 0 : index
      %33 = vector.load %arg3[%c0, %c0_13, %c0_14, %c0_15, %c0_16] : memref<1x1x9x9x128xbf16, #tpu.memory_space<vmem>>, vector<1x1x8x8x128xbf16>
      %34 = vector.shape_cast %33 : vector<1x1x8x8x128xbf16> to vector<8x8x128xbf16>
      %c0_17 = arith.constant 0 : index
      %c0_18 = arith.constant 0 : index
      %35 = vector.load %arg7[%c0_17, %c0_18] : memref<64x128xf32, #tpu.memory_space<vmem>>, vector<64x128xf32>
      %36 = vector.shape_cast %34 : vector<8x8x128xbf16> to vector<64x128xbf16>
      %c0_19 = arith.constant 0 : index
      %c0_20 = arith.constant 0 : index
      %c0_21 = arith.constant 0 : index
      %37 = vector.load %arg4[%c0_19, %c0_20, %c0_21] : memref<1x128x128xbf16, #tpu.memory_space<vmem>>, vector<1x128x128xbf16>
      %38 = vector.shape_cast %37 : vector<1x128x128xbf16> to vector<128x128xbf16>
      %cst = arith.constant dense<0.000000e+00> : vector<64x128xf32>
      %39 = tpu.matmul %36, %38, %cst {dimension_numbers = #tpu.dot_dimension_numbers<[1], [0], [0], [1], [0, 0, 1, 1], [], []>} : vector<64x128xbf16>, vector<128x128xbf16>, vector<64x128xf32> -> vector<64x128xf32>
      %40 = arith.addf %35, %39 : vector<64x128xf32>
      %c0_22 = arith.constant 0 : index
      %c0_23 = arith.constant 0 : index
      %41 = vector.load %arg7[%c0_22, %c0_23] : memref<64x128xf32, #tpu.memory_space<vmem>>, vector<64x128xf32>
      tpu.vector_store %arg7[%c0_22, %c0_23], %40 {strides = array<i32>} : memref<64x128xf32, #tpu.memory_space<vmem>>, vector<64x128xf32>,
    } else {
    }
    %c5_i32 = arith.constant 5 : i32
    %18 = arith.cmpi eq, %arg1, %c5_i32 : i32
    %19 = arith.extui %18 : i1 to i32
    %c0_i32_7 = arith.constant 0 : i32
    %20 = arith.cmpi ne, %19, %c0_i32_7 : i32
    scf.if %20 {
      %c0 = arith.constant 0 : index
      %c0_13 = arith.constant 0 : index
      %c1 = arith.constant 1 : index
      %c0_14 = arith.constant 0 : index
      %c0_15 = arith.constant 0 : index
      %33 = vector.load %arg3[%c0, %c0_13, %c1, %c0_14, %c0_15] : memref<1x1x9x9x128xbf16, #tpu.memory_space<vmem>>, vector<1x1x8x8x128xbf16>
      %34 = vector.shape_cast %33 : vector<1x1x8x8x128xbf16> to vector<8x8x128xbf16>
      %c0_16 = arith.constant 0 : index
      %c0_17 = arith.constant 0 : index
      %35 = vector.load %arg7[%c0_16, %c0_17] : memref<64x128xf32, #tpu.memory_space<vmem>>, vector<64x128xf32>
      %36 = vector.shape_cast %34 : vector<8x8x128xbf16> to vector<64x128xbf16>
      %c0_18 = arith.constant 0 : index
      %c0_19 = arith.constant 0 : index
      %c0_20 = arith.constant 0 : index
      %37 = vector.load %arg4[%c0_18, %c0_19, %c0_20] : memref<1x128x128xbf16, #tpu.memory_space<vmem>>, vector<1x128x128xbf16>
      %38 = vector.shape_cast %37 : vector<1x128x128xbf16> to vector<128x128xbf16>
      %cst = arith.constant dense<0.000000e+00> : vector<64x128xf32>
      %39 = tpu.matmul %36, %38, %cst {dimension_numbers = #tpu.dot_dimension_numbers<[1], [0], [0], [1], [0, 0, 1, 1], [], []>} : vector<64x128xbf16>, vector<128x128xbf16>, vector<64x128xf32> -> vector<64x128xf32>
      %40 = arith.addf %35, %39 : vector<64x128xf32>
      %c0_21 = arith.constant 0 : index
      %c0_22 = arith.constant 0 : index
      %41 = vector.load %arg7[%c0_21, %c0_22] : memref<64x128xf32, #tpu.memory_space<vmem>>, vector<64x128xf32>
      tpu.vector_store %arg7[%c0_21, %c0_22], %40 {strides = array<i32>} : memref<64x128xf32, #tpu.memory_space<vmem>>, vector<64x128xf32>,
    } else {
    }
    %c6_i32 = arith.constant 6 : i32
    %21 = arith.cmpi eq, %arg1, %c6_i32 : i32
    %22 = arith.extui %21 : i1 to i32
    %c0_i32_8 = arith.constant 0 : i32
    %23 = arith.cmpi ne, %22, %c0_i32_8 : i32
    scf.if %23 {
      %c0 = arith.constant 0 : index
      %c0_13 = arith.constant 0 : index
      %c0_14 = arith.constant 0 : index
      %c0_15 = arith.constant 0 : index
      %c0_16 = arith.constant 0 : index
      %33 = vector.load %arg3[%c0, %c0_13, %c0_14, %c0_15, %c0_16] : memref<1x1x9x9x128xbf16, #tpu.memory_space<vmem>>, vector<1x1x8x8x128xbf16>
      %34 = vector.shape_cast %33 : vector<1x1x8x8x128xbf16> to vector<8x8x128xbf16>
      %c0_17 = arith.constant 0 : index
      %c0_18 = arith.constant 0 : index
      %35 = vector.load %arg7[%c0_17, %c0_18] : memref<64x128xf32, #tpu.memory_space<vmem>>, vector<64x128xf32>
      %36 = vector.shape_cast %34 : vector<8x8x128xbf16> to vector<64x128xbf16>
      %c0_19 = arith.constant 0 : index
      %c0_20 = arith.constant 0 : index
      %c0_21 = arith.constant 0 : index
      %37 = vector.load %arg4[%c0_19, %c0_20, %c0_21] : memref<1x128x128xbf16, #tpu.memory_space<vmem>>, vector<1x128x128xbf16>
      %38 = vector.shape_cast %37 : vector<1x128x128xbf16> to vector<128x128xbf16>
      %cst = arith.constant dense<0.000000e+00> : vector<64x128xf32>
      %39 = tpu.matmul %36, %38, %cst {dimension_numbers = #tpu.dot_dimension_numbers<[1], [0], [0], [1], [0, 0, 1, 1], [], []>} : vector<64x128xbf16>, vector<128x128xbf16>, vector<64x128xf32> -> vector<64x128xf32>
      %40 = arith.addf %35, %39 : vector<64x128xf32>
      %c0_22 = arith.constant 0 : index
      %c0_23 = arith.constant 0 : index
      %41 = vector.load %arg7[%c0_22, %c0_23] : memref<64x128xf32, #tpu.memory_space<vmem>>, vector<64x128xf32>
      tpu.vector_store %arg7[%c0_22, %c0_23], %40 {strides = array<i32>} : memref<64x128xf32, #tpu.memory_space<vmem>>, vector<64x128xf32>,
    } else {
    }
    %c7_i32 = arith.constant 7 : i32
    %24 = arith.cmpi eq, %arg1, %c7_i32 : i32
    %25 = arith.extui %24 : i1 to i32
    %c0_i32_9 = arith.constant 0 : i32
    %26 = arith.cmpi ne, %25, %c0_i32_9 : i32
    scf.if %26 {
      %c0 = arith.constant 0 : index
      %c0_13 = arith.constant 0 : index
      %c0_14 = arith.constant 0 : index
      %c1 = arith.constant 1 : index
      %c0_15 = arith.constant 0 : index
      %33 = vector.load %arg3[%c0, %c0_13, %c0_14, %c1, %c0_15] : memref<1x1x9x9x128xbf16, #tpu.memory_space<vmem>>, vector<1x1x8x8x128xbf16>
      %34 = vector.shape_cast %33 : vector<1x1x8x8x128xbf16> to vector<8x8x128xbf16>
      %c0_16 = arith.constant 0 : index
      %c0_17 = arith.constant 0 : index
      %35 = vector.load %arg7[%c0_16, %c0_17] : memref<64x128xf32, #tpu.memory_space<vmem>>, vector<64x128xf32>
      %36 = vector.shape_cast %34 : vector<8x8x128xbf16> to vector<64x128xbf16>
      %c0_18 = arith.constant 0 : index
      %c0_19 = arith.constant 0 : index
      %c0_20 = arith.constant 0 : index
      %37 = vector.load %arg4[%c0_18, %c0_19, %c0_20] : memref<1x128x128xbf16, #tpu.memory_space<vmem>>, vector<1x128x128xbf16>
      %38 = vector.shape_cast %37 : vector<1x128x128xbf16> to vector<128x128xbf16>
      %cst = arith.constant dense<0.000000e+00> : vector<64x128xf32>
      %39 = tpu.matmul %36, %38, %cst {dimension_numbers = #tpu.dot_dimension_numbers<[1], [0], [0], [1], [0, 0, 1, 1], [], []>} : vector<64x128xbf16>, vector<128x128xbf16>, vector<64x128xf32> -> vector<64x128xf32>
      %40 = arith.addf %35, %39 : vector<64x128xf32>
      %c0_21 = arith.constant 0 : index
      %c0_22 = arith.constant 0 : index
      %41 = vector.load %arg7[%c0_21, %c0_22] : memref<64x128xf32, #tpu.memory_space<vmem>>, vector<64x128xf32>
      tpu.vector_store %arg7[%c0_21, %c0_22], %40 {strides = array<i32>} : memref<64x128xf32, #tpu.memory_space<vmem>>, vector<64x128xf32>,
    } else {
    }
    %c8_i32 = arith.constant 8 : i32
    %27 = arith.cmpi eq, %arg1, %c8_i32 : i32
    %28 = arith.extui %27 : i1 to i32
    %c0_i32_10 = arith.constant 0 : i32
    %29 = arith.cmpi ne, %28, %c0_i32_10 : i32
    scf.if %29 {
      %c0 = arith.constant 0 : index
      %c0_13 = arith.constant 0 : index
      %c0_14 = arith.constant 0 : index
      %c0_15 = arith.constant 0 : index
      %c0_16 = arith.constant 0 : index
      %33 = vector.load %arg3[%c0, %c0_13, %c0_14, %c0_15, %c0_16] : memref<1x1x9x9x128xbf16, #tpu.memory_space<vmem>>, vector<1x1x8x8x128xbf16>
      %34 = vector.shape_cast %33 : vector<1x1x8x8x128xbf16> to vector<8x8x128xbf16>
      %c0_17 = arith.constant 0 : index
      %c0_18 = arith.constant 0 : index
      %35 = vector.load %arg7[%c0_17, %c0_18] : memref<64x128xf32, #tpu.memory_space<vmem>>, vector<64x128xf32>
      %36 = vector.shape_cast %34 : vector<8x8x128xbf16> to vector<64x128xbf16>
      %c0_19 = arith.constant 0 : index
      %c0_20 = arith.constant 0 : index
      %c0_21 = arith.constant 0 : index
      %37 = vector.load %arg4[%c0_19, %c0_20, %c0_21] : memref<1x128x128xbf16, #tpu.memory_space<vmem>>, vector<1x128x128xbf16>
      %38 = vector.shape_cast %37 : vector<1x128x128xbf16> to vector<128x128xbf16>
      %cst = arith.constant dense<0.000000e+00> : vector<64x128xf32>
      %39 = tpu.matmul %36, %38, %cst {dimension_numbers = #tpu.dot_dimension_numbers<[1], [0], [0], [1], [0, 0, 1, 1], [], []>} : vector<64x128xbf16>, vector<128x128xbf16>, vector<64x128xf32> -> vector<64x128xf32>
      %40 = arith.addf %35, %39 : vector<64x128xf32>
      %c0_22 = arith.constant 0 : index
      %c0_23 = arith.constant 0 : index
      %41 = vector.load %arg7[%c0_22, %c0_23] : memref<64x128xf32, #tpu.memory_space<vmem>>, vector<64x128xf32>
      tpu.vector_store %arg7[%c0_22, %c0_23], %40 {strides = array<i32>} : memref<64x128xf32, #tpu.memory_space<vmem>>, vector<64x128xf32>,
    } else {
    }
    %c8_i32_11 = arith.constant 8 : i32
    %30 = arith.cmpi eq, %arg1, %c8_i32_11 : i32
    %31 = arith.extui %30 : i1 to i32
    %c0_i32_12 = arith.constant 0 : i32
    %32 = arith.cmpi ne, %31, %c0_i32_12 : i32
    scf.if %32 {
      %c0 = arith.constant 0 : index
      %c0_13 = arith.constant 0 : index
      %33 = vector.load %arg7[%c0, %c0_13] : memref<64x128xf32, #tpu.memory_space<vmem>>, vector<64x128xf32>
      %c0_14 = arith.constant 0 : index
      %c0_15 = arith.constant 0 : index
      %34 = vector.load %arg5[%c0_14, %c0_15] : memref<1x128xf32, #tpu.memory_space<vmem>>, vector<1x128xf32>
      %35 = vector.broadcast %34 : vector<1x128xf32> to vector<64x128xf32>
      %36 = arith.addf %33, %35 : vector<64x128xf32>
      %cst = arith.constant 0.000000e+00 : f32
      %37 = vector.broadcast %cst : f32 to vector<64x128xf32>
      %38 = arith.maximumf %36, %37 : vector<64x128xf32>
      %39 = arith.truncf %38 : vector<64x128xf32> to vector<64x128xbf16>
      %c0_16 = arith.constant 0 : index
      %c0_17 = arith.constant 0 : index
      %c0_18 = arith.constant 0 : index
      %40 = vector.load %arg6[%c0_16, %c0_17, %c0_18] : memref<1x64x128xbf16, #tpu.memory_space<vmem>>, vector<1x64x128xbf16>
      %41 = vector.shape_cast %40 : vector<1x64x128xbf16> to vector<64x128xbf16>
      %42 = vector.shape_cast %39 : vector<64x128xbf16> to vector<1x64x128xbf16>
      tpu.vector_store %arg6[%c0_16, %c0_17, %c0_18], %42 {strides = array<i32>} : memref<1x64x128xbf16, #tpu.memory_space<vmem>>, vector<1x64x128xbf16>,
    } else {
    }
    return
  }
  func.func @transform_0(%arg0: i32, %arg1: i32, %arg2: memref<9xi32, #tpu.memory_space<smem>>) -> (i32, i32, i32, i32, i32) {
    %0 = arith.index_cast %arg1 : i32 to index
    %1 = memref.load %arg2[%0] : memref<9xi32, #tpu.memory_space<smem>>
    %c0_i32 = arith.constant 0 : i32
    %c0_i32_0 = arith.constant 0 : i32
    %c0_i32_1 = arith.constant 0 : i32
    %c0_i32_2 = arith.constant 0 : i32
    return %arg0, %1, %c0_i32, %c0_i32_0, %c0_i32_1 : i32, i32, i32, i32, i32
  }
  func.func @transform_1(%arg0: i32, %arg1: i32, %arg2: memref<9xi32, #tpu.memory_space<smem>>) -> (i32, i32, i32) {
    %c0_i32 = arith.constant 0 : i32
    %c0_i32_0 = arith.constant 0 : i32
    %c0_i32_1 = arith.constant 0 : i32
    return %arg1, %c0_i32, %c0_i32_0 : i32, i32, i32
  }
  func.func @transform_2(%arg0: i32, %arg1: i32, %arg2: memref<9xi32, #tpu.memory_space<smem>>) -> (i32, i32) {
    %c0_i32 = arith.constant 0 : i32
    %c0_i32_0 = arith.constant 0 : i32
    %c0_i32_1 = arith.constant 0 : i32
    return %c0_i32, %c0_i32_0 : i32, i32
  }
  func.func @transform_3(%arg0: i32, %arg1: i32, %arg2: memref<9xi32, #tpu.memory_space<smem>>) -> (i32, i32, i32) {
    %c0_i32 = arith.constant 0 : i32
    %c0_i32_0 = arith.constant 0 : i32
    %c0_i32_1 = arith.constant 0 : i32
    return %arg0, %c0_i32, %c0_i32_0 : i32, i32, i32
  }
}

module attributes {stable_mosaic.version = 11 : i64} {
  func.func @_conv1x1_add_kernel(%arg0: i32, %arg1: i32, %arg2: memref<128x128xbf16, #tpu.memory_space<vmem>>, %arg3: memref<128x128xbf16, #tpu.memory_space<vmem>>, %arg4: memref<128x128xbf16, #tpu.memory_space<vmem>>, %arg5: memref<128x128xbf16, #tpu.memory_space<vmem>>, %arg6: memref<1x128xf32, #tpu.memory_space<vmem>>, %arg7: memref<128x128xbf16, #tpu.memory_space<vmem>>) attributes {dimension_semantics = [#tpu.dimension_semantics<parallel>, #tpu.dimension_semantics<parallel>], iteration_bounds = array<i64: 1, 1>, scalar_prefetch = 0 : i64, scratch_operands = 0 : i64, tpu.core_type = #tpu.core_type<tc>, window_params = [{transform_indices = @transform_0, window_bounds = array<i64: 128, 128>}, {transform_indices = @transform_1, window_bounds = array<i64: 128, 128>}, {transform_indices = @transform_2, window_bounds = array<i64: 128, 128>}, {transform_indices = @transform_3, window_bounds = array<i64: 128, 128>}, {transform_indices = @transform_4, window_bounds = array<i64: 1, 128>}, {transform_indices = @transform_5, window_bounds = array<i64: 128, 128>}]} {
    %c0 = arith.constant 0 : index
    %c0_0 = arith.constant 0 : index
    %0 = vector.load %arg2[%c0, %c0_0] : memref<128x128xbf16, #tpu.memory_space<vmem>>, vector<128x128xbf16>
    %c0_1 = arith.constant 0 : index
    %c0_2 = arith.constant 0 : index
    %1 = vector.load %arg4[%c0_1, %c0_2] : memref<128x128xbf16, #tpu.memory_space<vmem>>, vector<128x128xbf16>
    %cst = arith.constant dense<0.000000e+00> : vector<128x128xf32>
    %2 = tpu.matmul %0, %1, %cst {dimension_numbers = #tpu.dot_dimension_numbers<[1], [0], [0], [1], [0, 0, 1, 1], [], []>} : vector<128x128xbf16>, vector<128x128xbf16>, vector<128x128xf32> -> vector<128x128xf32>
    %c0_3 = arith.constant 0 : index
    %c0_4 = arith.constant 0 : index
    %3 = vector.load %arg3[%c0_3, %c0_4] : memref<128x128xbf16, #tpu.memory_space<vmem>>, vector<128x128xbf16>
    %c0_5 = arith.constant 0 : index
    %c0_6 = arith.constant 0 : index
    %4 = vector.load %arg5[%c0_5, %c0_6] : memref<128x128xbf16, #tpu.memory_space<vmem>>, vector<128x128xbf16>
    %cst_7 = arith.constant dense<0.000000e+00> : vector<128x128xf32>
    %5 = tpu.matmul %3, %4, %cst_7 {dimension_numbers = #tpu.dot_dimension_numbers<[1], [0], [0], [1], [0, 0, 1, 1], [], []>} : vector<128x128xbf16>, vector<128x128xbf16>, vector<128x128xf32> -> vector<128x128xf32>
    %6 = arith.addf %2, %5 : vector<128x128xf32>
    %c0_8 = arith.constant 0 : index
    %c0_9 = arith.constant 0 : index
    %7 = vector.load %arg6[%c0_8, %c0_9] : memref<1x128xf32, #tpu.memory_space<vmem>>, vector<1x128xf32>
    %8 = vector.broadcast %7 : vector<1x128xf32> to vector<128x128xf32>
    %9 = arith.addf %6, %8 : vector<128x128xf32>
    %cst_10 = arith.constant 0.000000e+00 : f32
    %10 = vector.broadcast %cst_10 : f32 to vector<128x128xf32>
    %11 = arith.maximumf %9, %10 : vector<128x128xf32>
    %12 = arith.truncf %11 : vector<128x128xf32> to vector<128x128xbf16>
    %c0_11 = arith.constant 0 : index
    %c0_12 = arith.constant 0 : index
    %13 = vector.load %arg7[%c0_11, %c0_12] : memref<128x128xbf16, #tpu.memory_space<vmem>>, vector<128x128xbf16>
    tpu.vector_store %arg7[%c0_11, %c0_12], %12 {strides = array<i32>} : memref<128x128xbf16, #tpu.memory_space<vmem>>, vector<128x128xbf16>,
    return
  }
  func.func @transform_0(%arg0: i32, %arg1: i32) -> (i32, i32) {
    %c0_i32 = arith.constant 0 : i32
    %c0_i32_0 = arith.constant 0 : i32
    return %arg1, %c0_i32 : i32, i32
  }
  func.func @transform_1(%arg0: i32, %arg1: i32) -> (i32, i32) {
    %c0_i32 = arith.constant 0 : i32
    %c0_i32_0 = arith.constant 0 : i32
    return %arg1, %c0_i32 : i32, i32
  }
  func.func @transform_2(%arg0: i32, %arg1: i32) -> (i32, i32) {
    %c0_i32 = arith.constant 0 : i32
    %c0_i32_0 = arith.constant 0 : i32
    return %c0_i32, %arg0 : i32, i32
  }
  func.func @transform_3(%arg0: i32, %arg1: i32) -> (i32, i32) {
    %c0_i32 = arith.constant 0 : i32
    %c0_i32_0 = arith.constant 0 : i32
    return %c0_i32, %arg0 : i32, i32
  }
  func.func @transform_4(%arg0: i32, %arg1: i32) -> (i32, i32) {
    %c0_i32 = arith.constant 0 : i32
    %c0_i32_0 = arith.constant 0 : i32
    return %c0_i32, %arg0 : i32, i32
  }
  func.func @transform_5(%arg0: i32, %arg1: i32) -> (i32, i32) {
    %c0_i32 = arith.constant 0 : i32
    return %arg1, %arg0 : i32, i32
  }
}

</mosaic_0001>

<bundles_post_ra>
// kernel: bottleneck_forward.3
= control target key start
LH: loop header
LB: loop body
LE: loop exit
PB: predicated region body
PF: predicated region fallthrough
CT: control target
= control target key end

     0   :  { %s1860_s1 = inlined_call_operand.vmem [shape: bf16[128,128], index: 1, kind: input, shape index: {}]   ;;  %s1861_s0 = inlined_call_operand.vmem [shape: bf16[512,128], index: 0, kind: input, shape index: {}]   ;;  %s1862_s2 = inlined_call_operand.vmem [shape: f32[1,128], index: 2, kind: input, shape index: {}]   ;;  %s1863_s3 = inlined_call_operand.vmem [shape: bf16[512,128], index: 3, kind: output, shape index: {}]  }
   0x1   :  { %v1515_v0 = vld [vmem:[%s1860_s1 + $0x38] sm:$0xff]   ;;  %v1516_v1 = vld [vmem:[%s1860_s1 + $0x30] sm:$0xff]   ;;  %v1517_v2 = vld [vmem:[%s1860_s1 + $0x28] sm:$0xff]  }
   0x2   :  { %1419 = vmatprep.subr.bf16.mxu0 %v1515_v0  ;;  %1499 = vmatprep.subr.bf16.mxu1 %v1515_v0  ;;  %v1518_v3 = vld [vmem:[%s1860_s1 + $0x20] sm:$0xff]   ;;  %v1519_v6 = vld [vmem:[%s1860_s1 + $0x18] sm:$0xff]   ;;  %v1520_v7 = vld [vmem:[%s1860_s1 + $0x10] sm:$0xff]  }
   0x3   :  { %1420 = vmatpush3.bf16.msra.mxu0 %v1515_v0  ;;  %1507 = vmatpush3.bf16.msra.mxu1 %v1515_v0  ;;  %v1523_v4 = vld [vmem:[%s1861_s0] sm:$0xff]   ;;  %v1521_v8 = vld [vmem:[%s1860_s1 + $0x8] sm:$0xff]   ;;  %v1527_v12 = vld [vmem:[%s1861_s0 + $0x10] sm:$0xff]  }
   0x4   :  { %1421 = vmatprep.subr.bf16.mxu0 %v1516_v1  ;;  %1500 = vmatprep.subr.bf16.mxu1 %v1516_v1  ;;  %v1524_v5 = vld [vmem:[%s1861_s0 + $0x80] sm:$0xff]   ;;  %v1525_v10 = vld [vmem:[%s1861_s0 + $0x8] sm:$0xff]   ;;  %v1528_v13 = vld [vmem:[%s1861_s0 + $0x90] sm:$0xff]  }
   0x5   :  { %1435 = vmatprep.mubr.bf16.mxu0 %v1523_v4  ;;  %1467 = vmatprep.mubr.bf16.mxu1 %v1524_v5  ;;  %v1522_v9 = vld [vmem:[%s1860_s1] sm:$0xff]   ;;  %v1526_v11 = vld [vmem:[%s1861_s0 + $0x88] sm:$0xff]   ;;  %v1529_v14 = vld [vmem:[%s1861_s0 + $0x18] sm:$0xff]  }
   0x6   :  { %v1530_v15 = vld [vmem:[%s1861_s0 + $0x98] sm:$0xff]   ;;  %v1531_v16 = vld [vmem:[%s1861_s0 + $0x20] sm:$0xff]   ;;  %v1533_v18 = vld [vmem:[%s1861_s0 + $0x28] sm:$0xff]  }
   0x7   :  { %1422 = vmatpush3.bf16.msra.mxu0 %v1516_v1  ;;  %1508 = vmatpush3.bf16.msra.mxu1 %v1516_v1  ;;  %v1532_v17 = vld [vmem:[%s1861_s0 + $0xa0] sm:$0xff]   ;;  %v1534_v19 = vld [vmem:[%s1861_s0 + $0xa8] sm:$0xff]   ;;  %v1535_v20 = vld [vmem:[%s1861_s0 + $0x30] sm:$0xff]  }
   0x8   :  { %1423 = vmatprep.subr.bf16.mxu0 %v1517_v2  ;;  %1501 = vmatprep.subr.bf16.mxu1 %v1517_v2  ;;  %v1536_v21 = vld [vmem:[%s1861_s0 + $0xb0] sm:$0xff]   ;;  %v1537_v22 = vld [vmem:[%s1861_s0 + $0x38] sm:$0xff]   ;;  %v1539_v24 = vld [vmem:[%s1861_s0 + $0x40] sm:$0xff]  }
   0x9   :  { %v1538_v23 = vld [vmem:[%s1861_s0 + $0xb8] sm:$0xff]   ;;  %v1540_v25 = vld [vmem:[%s1861_s0 + $0xc0] sm:$0xff]   ;;  %v1541_v26 = vld [vmem:[%s1861_s0 + $0x48] sm:$0xff]  }
   0xa   :  { %v1542_v27 = vld [vmem:[%s1861_s0 + $0xc8] sm:$0xff]   ;;  %v1543_v28 = vld [vmem:[%s1861_s0 + $0x50] sm:$0xff]   ;;  %v1545_v30 = vld [vmem:[%s1861_s0 + $0x58] sm:$0xff]  }
   0xb   :  { %1424 = vmatpush3.bf16.msra.mxu0 %v1517_v2  ;;  %1509 = vmatpush3.bf16.msra.mxu1 %v1517_v2  ;;  %v1544_v29 = vld [vmem:[%s1861_s0 + $0xd0] sm:$0xff]   ;;  %v1546_v31 = vld [vmem:[%s1861_s0 + $0xd8] sm:$0xff]   ;;  %v1547_v32 = vld [vmem:[%s1861_s0 + $0x60] sm:$0xff]  }
   0xc   :  { %1425 = vmatprep.subr.bf16.mxu0 %v1518_v3  ;;  %1502 = vmatprep.subr.bf16.mxu1 %v1518_v3  ;;  %v1548_v33 = vld [vmem:[%s1861_s0 + $0xe0] sm:$0xff]   ;;  %v1549_v34 = vld [vmem:[%s1861_s0 + $0x68] sm:$0xff]   ;;  %v1551_v36 = vld [vmem:[%s1861_s0 + $0x70] sm:$0xff]  }
   0xd   :  { %v1550_v35 = vld [vmem:[%s1861_s0 + $0xe8] sm:$0xff]   ;;  %v1552_v37 = vld [vmem:[%s1861_s0 + $0xf0] sm:$0xff]   ;;  %v1553_v38 = vld [vmem:[%s1861_s0 + $0x78] sm:$0xff]  }
   0xe   :  { %v1554_v39 = vld [vmem:[%s1861_s0 + $0xf8] sm:$0xff]   ;;  %v1698_v40 = vld [vmem:[%s1862_s2] ss:$0 sm:$0xff] }
   0xf   :  { %1426 = vmatpush3.bf16.msra.mxu0 %v1518_v3  ;;  %1510 = vmatpush3.bf16.msra.mxu1 %v1518_v3 }
  0x10   :  { %1427 = vmatprep.subr.bf16.mxu0 %v1519_v6  ;;  %1503 = vmatprep.subr.bf16.mxu1 %v1519_v6 }
  0x13   :  { %1428 = vmatpush3.bf16.msra.mxu0 %v1519_v6  ;;  %1511 = vmatpush3.bf16.msra.mxu1 %v1519_v6 }
  0x14   :  { %1429 = vmatprep.subr.bf16.mxu0 %v1520_v7  ;;  %1504 = vmatprep.subr.bf16.mxu1 %v1520_v7 }
  0x17   :  { %1430 = vmatpush3.bf16.msra.mxu0 %v1520_v7  ;;  %1512 = vmatpush3.bf16.msra.mxu1 %v1520_v7 }
  0x18   :  { %1431 = vmatprep.subr.bf16.mxu0 %v1521_v8  ;;  %1505 = vmatprep.subr.bf16.mxu1 %v1521_v8 }
  0x1b   :  { %1432 = vmatpush3.bf16.msra.mxu0 %v1521_v8  ;;  %1513 = vmatpush3.bf16.msra.mxu1 %v1521_v8 }
  0x1c   :  { %1433 = vmatprep.subr.bf16.mxu0 %v1522_v9  ;;  %1506 = vmatprep.subr.bf16.mxu1 %v1522_v9 }
  0x1f   :  { %1434 = vmatpush3.bf16.msra.mxu0 %v1522_v9  ;;  %1514 = vmatpush3.bf16.msra.mxu1 %v1522_v9 }
  0x22   :  { %1436 = vmatmul.mubr.bf16.vlgmr.msra.gmra.mxu0 %v1525_v10  ;;  %1468 = vmatmul.mubr.bf16.vlgmr.msra.gmra.mxu1 %v1526_v11 }
  0x23   :  { %1439 = vmatprep.mubr.bf16.mxu0 %v1527_v12  ;;  %1471 = vmatprep.mubr.bf16.mxu1 %v1528_v13 }
  0x2a   :  { %1440 = vmatmul.mubr.bf16.gmra.mxu0 %v1529_v14  ;;  %1472 = vmatmul.mubr.bf16.gmra.mxu1 %v1530_v15 }
  0x2b   :  { %1443 = vmatprep.mubr.bf16.mxu0 %v1531_v16  ;;  %1475 = vmatprep.mubr.bf16.mxu1 %v1532_v17 }
  0x32   :  { %1444 = vmatmul.mubr.bf16.gmra.mxu0 %v1533_v18  ;;  %1476 = vmatmul.mubr.bf16.gmra.mxu1 %v1534_v19 }
  0x33   :  { %1447 = vmatprep.mubr.bf16.mxu0 %v1535_v20  ;;  %1479 = vmatprep.mubr.bf16.mxu1 %v1536_v21 }
  0x3a   :  { %1448 = vmatmul.mubr.bf16.gmra.mxu0 %v1537_v22  ;;  %1480 = vmatmul.mubr.bf16.gmra.mxu1 %v1538_v23 }
  0x3b   :  { %1451 = vmatprep.mubr.bf16.mxu0 %v1539_v24  ;;  %1483 = vmatprep.mubr.bf16.mxu1 %v1540_v25 }
  0x42   :  { %1452 = vmatmul.mubr.bf16.gmra.mxu0 %v1541_v26  ;;  %1484 = vmatmul.mubr.bf16.gmra.mxu1 %v1542_v27 }
  0x43   :  { %1455 = vmatprep.mubr.bf16.mxu0 %v1543_v28  ;;  %1487 = vmatprep.mubr.bf16.mxu1 %v1544_v29 }
  0x4a   :  { %1456 = vmatmul.mubr.bf16.gmra.mxu0 %v1545_v30  ;;  %1488 = vmatmul.mubr.bf16.gmra.mxu1 %v1546_v31 }
  0x4b   :  { %1459 = vmatprep.mubr.bf16.mxu0 %v1547_v32  ;;  %1491 = vmatprep.mubr.bf16.mxu1 %v1548_v33 }
  0x52   :  { %1460 = vmatmul.mubr.bf16.gmra.mxu0 %v1549_v34  ;;  %1492 = vmatmul.mubr.bf16.gmra.mxu1 %v1550_v35 }
  0x53   :  { %1463 = vmatprep.mubr.bf16.mxu0 %v1551_v36  ;;  %1495 = vmatprep.mubr.bf16.mxu1 %v1552_v37 }
  0x5a   :  { %1464 = vmatmul.mubr.bf16.gmra.mxu0 %v1553_v38  ;;  %1496 = vmatmul.mubr.bf16.gmra.mxu1 %v1554_v39 }
  0xe2   :  { %v1437_v41 = vpop.f32.mrf.mxu0  ;;  %v1469_v42 = vpop.f32.mrf.mxu1 }
  0xe3   :  { %v385_v43 = vadd.f32 %v1437_v41, %v1698_v40  ;;  %v513_v44 = vadd.f32 %v1469_v42, %v1698_v40 }
  0xe4   :  { %v376_v45 = vpop.f32.mrf.mxu0  ;;  %v504_v46 = vpop.f32.mrf.mxu1 }
  0xe5   :  { %v377_v47 = vadd.f32 %v1698_v40, %v376_v45  ;;  %v505_v48 = vadd.f32 %v1698_v40, %v504_v46  ;;  %v633_v53 = vmax.f32 %v385_v43, 0.0  ;;  %v665_v54 = vmax.f32 %v513_v44, 0.0 }
  0xe6   :  { %v1438_v49 = vpop.f32.mrf.mxu0  ;;  %v1470_v50 = vpop.f32.mrf.mxu1 }
  0xe7   :  { %v388_v51 = vadd.f32 %v1438_v49, %v1698_v40  ;;  %v516_v52 = vadd.f32 %v1470_v50, %v1698_v40  ;;  %v631_v61 = vmax.f32 %v377_v47, 0.0  ;;  %v663_v62 = vmax.f32 %v505_v48, 0.0 }
  0xe8   :  { %v379_v55 = vpop.f32.mrf.mxu0  ;;  %v507_v56 = vpop.f32.mrf.mxu1 }
  0xe9   :  { %v634_v57 = vmax.f32 %v388_v51, 0.0  ;;  %v666_v58 = vmax.f32 %v516_v52, 0.0  ;;  %v380_v59 = vadd.f32 %v1698_v40, %v379_v55  ;;  %v508_v60 = vadd.f32 %v1698_v40, %v507_v56 }
  0xea   :  { %v1441_v63 = vpop.f32.mrf.mxu0  ;;  %v1473_v0 = vpop.f32.mrf.mxu1 }
  0xeb   :  { %v1196_v1 = vpack.c.bf16 %v634_v57, %v633_v53  ;;  %v1276_v2 = vpack.c.bf16 %v666_v58, %v665_v54  ;;  %v632_v3 = vmax.f32 %v380_v59, 0.0  ;;  %v664_v4 = vmax.f32 %v508_v60, 0.0 }
  0xec   :  { %v401_v5 = vadd.f32 %v1441_v63, %v1698_v40  ;;  %v529_v6 = vadd.f32 %v1473_v0, %v1698_v40  ;;  %v392_v7 = vpop.f32.mrf.mxu0  ;;  %v520_v8 = vpop.f32.mrf.mxu1 }
  0xed   :  { %1348 = vst [vmem:[%s1863_s3 + $0x8] sm:$0xff] %v1196_v1   ;;  %1364 = vst [vmem:[%s1863_s3 + $0x88] sm:$0xff] %v1276_v2   ;;  %v1191_v9 = vpack.c.bf16 %v632_v3, %v631_v61  ;;  %v1271_v10 = vpack.c.bf16 %v664_v4, %v663_v62  ;;  %v393_v11 = vadd.f32 %v1698_v40, %v392_v7 }
  0xee   :  { %v521_v12 = vadd.f32 %v1698_v40, %v520_v8  ;;  %v1442_v13 = vpop.f32.mrf.mxu0  ;;  %v1474_v14 = vpop.f32.mrf.mxu1  ;;  %v637_v17 = vmax.f32 %v401_v5, 0.0  ;;  %v669_v18 = vmax.f32 %v529_v6, 0.0 }
  0xef   :  { %1192 = vst [vmem:[%s1863_s3] sm:$0xff] %v1191_v9   ;;  %1363 = vst [vmem:[%s1863_s3 + $0x80] sm:$0xff] %v1271_v10   ;;  %v404_v15 = vadd.f32 %v1442_v13, %v1698_v40  ;;  %v532_v16 = vadd.f32 %v1474_v14, %v1698_v40  ;;  %v635_v25 = vmax.f32 %v393_v11, 0.0 }
  0xf0   :  { %v395_v19 = vpop.f32.mrf.mxu0  ;;  %v523_v20 = vpop.f32.mrf.mxu1  ;;  %v667_v26 = vmax.f32 %v521_v12, 0.0 }
  0xf1   :  { %v638_v21 = vmax.f32 %v404_v15, 0.0  ;;  %v670_v22 = vmax.f32 %v532_v16, 0.0  ;;  %v396_v23 = vadd.f32 %v1698_v40, %v395_v19  ;;  %v524_v24 = vadd.f32 %v1698_v40, %v523_v20 }
  0xf2   :  { %v1445_v27 = vpop.f32.mrf.mxu0  ;;  %v1477_v28 = vpop.f32.mrf.mxu1 }
  0xf3   :  { %v1206_v29 = vpack.c.bf16 %v638_v21, %v637_v17  ;;  %v1286_v30 = vpack.c.bf16 %v670_v22, %v669_v18  ;;  %v636_v31 = vmax.f32 %v396_v23, 0.0  ;;  %v668_v32 = vmax.f32 %v524_v24, 0.0 }
  0xf4   :  { %v417_v33 = vadd.f32 %v1445_v27, %v1698_v40  ;;  %v545_v34 = vadd.f32 %v1477_v28, %v1698_v40  ;;  %v408_v35 = vpop.f32.mrf.mxu0  ;;  %v536_v36 = vpop.f32.mrf.mxu1 }
  0xf5   :  { %1350 = vst [vmem:[%s1863_s3 + $0x18] sm:$0xff] %v1206_v29   ;;  %1366 = vst [vmem:[%s1863_s3 + $0x98] sm:$0xff] %v1286_v30   ;;  %v1201_v37 = vpack.c.bf16 %v636_v31, %v635_v25  ;;  %v1281_v38 = vpack.c.bf16 %v668_v32, %v667_v26  ;;  %v409_v39 = vadd.f32 %v1698_v40, %v408_v35 }
  0xf6   :  { %v537_v41 = vadd.f32 %v1698_v40, %v536_v36  ;;  %v1446_v42 = vpop.f32.mrf.mxu0  ;;  %v1478_v43 = vpop.f32.mrf.mxu1  ;;  %v641_v46 = vmax.f32 %v417_v33, 0.0  ;;  %v673_v47 = vmax.f32 %v545_v34, 0.0 }
  0xf7   :  { %1349 = vst [vmem:[%s1863_s3 + $0x10] sm:$0xff] %v1201_v37   ;;  %1365 = vst [vmem:[%s1863_s3 + $0x90] sm:$0xff] %v1281_v38   ;;  %v420_v44 = vadd.f32 %v1446_v42, %v1698_v40  ;;  %v548_v45 = vadd.f32 %v1478_v43, %v1698_v40  ;;  %v639_v54 = vmax.f32 %v409_v39, 0.0 }
  0xf8   :  { %v411_v48 = vpop.f32.mrf.mxu0  ;;  %v539_v49 = vpop.f32.mrf.mxu1  ;;  %v671_v55 = vmax.f32 %v537_v41, 0.0 }
  0xf9   :  { %v642_v50 = vmax.f32 %v420_v44, 0.0  ;;  %v674_v51 = vmax.f32 %v548_v45, 0.0  ;;  %v412_v52 = vadd.f32 %v1698_v40, %v411_v48  ;;  %v540_v53 = vadd.f32 %v1698_v40, %v539_v49 }
  0xfa   :  { %v1449_v56 = vpop.f32.mrf.mxu0  ;;  %v1481_v57 = vpop.f32.mrf.mxu1 }
  0xfb   :  { %v1216_v58 = vpack.c.bf16 %v642_v50, %v641_v46  ;;  %v1296_v59 = vpack.c.bf16 %v674_v51, %v673_v47  ;;  %v640_v60 = vmax.f32 %v412_v52, 0.0  ;;  %v672_v61 = vmax.f32 %v540_v53, 0.0 }
  0xfc   :  { %v433_v62 = vadd.f32 %v1449_v56, %v1698_v40  ;;  %v561_v63 = vadd.f32 %v1481_v57, %v1698_v40  ;;  %v424_v0 = vpop.f32.mrf.mxu0  ;;  %v552_v1 = vpop.f32.mrf.mxu1 }
  0xfd   :  { %1352 = vst [vmem:[%s1863_s3 + $0x28] sm:$0xff] %v1216_v58   ;;  %1368 = vst [vmem:[%s1863_s3 + $0xa8] sm:$0xff] %v1296_v59   ;;  %v1211_v2 = vpack.c.bf16 %v640_v60, %v639_v54  ;;  %v1291_v3 = vpack.c.bf16 %v672_v61, %v671_v55  ;;  %v425_v4 = vadd.f32 %v1698_v40, %v424_v0 }
  0xfe   :  { %v553_v5 = vadd.f32 %v1698_v40, %v552_v1  ;;  %v1450_v6 = vpop.f32.mrf.mxu0  ;;  %v1482_v7 = vpop.f32.mrf.mxu1  ;;  %v645_v10 = vmax.f32 %v433_v62, 0.0  ;;  %v677_v11 = vmax.f32 %v561_v63, 0.0 }
  0xff   :  { %1351 = vst [vmem:[%s1863_s3 + $0x20] sm:$0xff] %v1211_v2   ;;  %1367 = vst [vmem:[%s1863_s3 + $0xa0] sm:$0xff] %v1291_v3   ;;  %v436_v8 = vadd.f32 %v1450_v6, %v1698_v40  ;;  %v564_v9 = vadd.f32 %v1482_v7, %v1698_v40  ;;  %v643_v18 = vmax.f32 %v425_v4, 0.0 }
 0x100   :  { %v427_v12 = vpop.f32.mrf.mxu0  ;;  %v555_v13 = vpop.f32.mrf.mxu1  ;;  %v675_v19 = vmax.f32 %v553_v5, 0.0 }
 0x101   :  { %v646_v14 = vmax.f32 %v436_v8, 0.0  ;;  %v678_v15 = vmax.f32 %v564_v9, 0.0  ;;  %v428_v16 = vadd.f32 %v1698_v40, %v427_v12  ;;  %v556_v17 = vadd.f32 %v1698_v40, %v555_v13 }
 0x102   :  { %v1453_v20 = vpop.f32.mrf.mxu0  ;;  %v1485_v21 = vpop.f32.mrf.mxu1 }
 0x103   :  { %v1226_v22 = vpack.c.bf16 %v646_v14, %v645_v10  ;;  %v1306_v23 = vpack.c.bf16 %v678_v15, %v677_v11  ;;  %v644_v24 = vmax.f32 %v428_v16, 0.0  ;;  %v676_v25 = vmax.f32 %v556_v17, 0.0 }
 0x104   :  { %v449_v26 = vadd.f32 %v1453_v20, %v1698_v40  ;;  %v577_v27 = vadd.f32 %v1485_v21, %v1698_v40  ;;  %v440_v28 = vpop.f32.mrf.mxu0  ;;  %v568_v29 = vpop.f32.mrf.mxu1 }
 0x105   :  { %1354 = vst [vmem:[%s1863_s3 + $0x38] sm:$0xff] %v1226_v22   ;;  %1370 = vst [vmem:[%s1863_s3 + $0xb8] sm:$0xff] %v1306_v23   ;;  %v1221_v30 = vpack.c.bf16 %v644_v24, %v643_v18  ;;  %v1301_v31 = vpack.c.bf16 %v676_v25, %v675_v19  ;;  %v441_v32 = vadd.f32 %v1698_v40, %v440_v28 }
 0x106   :  { %v569_v33 = vadd.f32 %v1698_v40, %v568_v29  ;;  %v1454_v34 = vpop.f32.mrf.mxu0  ;;  %v1486_v35 = vpop.f32.mrf.mxu1  ;;  %v649_v38 = vmax.f32 %v449_v26, 0.0  ;;  %v681_v39 = vmax.f32 %v577_v27, 0.0 }
 0x107   :  { %1353 = vst [vmem:[%s1863_s3 + $0x30] sm:$0xff] %v1221_v30   ;;  %1369 = vst [vmem:[%s1863_s3 + $0xb0] sm:$0xff] %v1301_v31   ;;  %v452_v36 = vadd.f32 %v1454_v34, %v1698_v40  ;;  %v580_v37 = vadd.f32 %v1486_v35, %v1698_v40  ;;  %v647_v47 = vmax.f32 %v441_v32, 0.0 }
 0x108   :  { %v443_v41 = vpop.f32.mrf.mxu0  ;;  %v571_v42 = vpop.f32.mrf.mxu1  ;;  %v679_v48 = vmax.f32 %v569_v33, 0.0 }
 0x109   :  { %v650_v43 = vmax.f32 %v452_v36, 0.0  ;;  %v682_v44 = vmax.f32 %v580_v37, 0.0  ;;  %v444_v45 = vadd.f32 %v1698_v40, %v443_v41  ;;  %v572_v46 = vadd.f32 %v1698_v40, %v571_v42 }
 0x10a   :  { %v1457_v49 = vpop.f32.mrf.mxu0  ;;  %v1489_v50 = vpop.f32.mrf.mxu1 }
 0x10b   :  { %v1236_v51 = vpack.c.bf16 %v650_v43, %v649_v38  ;;  %v1316_v52 = vpack.c.bf16 %v682_v44, %v681_v39  ;;  %v648_v53 = vmax.f32 %v444_v45, 0.0  ;;  %v680_v54 = vmax.f32 %v572_v46, 0.0 }
 0x10c   :  { %v465_v55 = vadd.f32 %v1457_v49, %v1698_v40  ;;  %v593_v56 = vadd.f32 %v1489_v50, %v1698_v40  ;;  %v456_v57 = vpop.f32.mrf.mxu0  ;;  %v584_v58 = vpop.f32.mrf.mxu1 }
 0x10d   :  { %1356 = vst [vmem:[%s1863_s3 + $0x48] sm:$0xff] %v1236_v51   ;;  %1372 = vst [vmem:[%s1863_s3 + $0xc8] sm:$0xff] %v1316_v52   ;;  %v1231_v59 = vpack.c.bf16 %v648_v53, %v647_v47  ;;  %v1311_v60 = vpack.c.bf16 %v680_v54, %v679_v48  ;;  %v457_v61 = vadd.f32 %v1698_v40, %v456_v57 }
 0x10e   :  { %v585_v62 = vadd.f32 %v1698_v40, %v584_v58  ;;  %v1458_v63 = vpop.f32.mrf.mxu0  ;;  %v1490_v0 = vpop.f32.mrf.mxu1  ;;  %v653_v3 = vmax.f32 %v465_v55, 0.0  ;;  %v685_v4 = vmax.f32 %v593_v56, 0.0 }
 0x10f   :  { %1355 = vst [vmem:[%s1863_s3 + $0x40] sm:$0xff] %v1231_v59   ;;  %1371 = vst [vmem:[%s1863_s3 + $0xc0] sm:$0xff] %v1311_v60   ;;  %v468_v1 = vadd.f32 %v1458_v63, %v1698_v40  ;;  %v596_v2 = vadd.f32 %v1490_v0, %v1698_v40  ;;  %v651_v11 = vmax.f32 %v457_v61, 0.0 }
 0x110   :  { %v459_v5 = vpop.f32.mrf.mxu0  ;;  %v587_v6 = vpop.f32.mrf.mxu1  ;;  %v683_v12 = vmax.f32 %v585_v62, 0.0 }
 0x111   :  { %v654_v7 = vmax.f32 %v468_v1, 0.0  ;;  %v686_v8 = vmax.f32 %v596_v2, 0.0  ;;  %v460_v9 = vadd.f32 %v1698_v40, %v459_v5  ;;  %v588_v10 = vadd.f32 %v1698_v40, %v587_v6 }
 0x112   :  { %v1461_v13 = vpop.f32.mrf.mxu0  ;;  %v1493_v14 = vpop.f32.mrf.mxu1 }
 0x113   :  { %v1246_v15 = vpack.c.bf16 %v654_v7, %v653_v3  ;;  %v1326_v16 = vpack.c.bf16 %v686_v8, %v685_v4  ;;  %v652_v17 = vmax.f32 %v460_v9, 0.0  ;;  %v684_v18 = vmax.f32 %v588_v10, 0.0 }
 0x114   :  { %v481_v19 = vadd.f32 %v1461_v13, %v1698_v40  ;;  %v609_v20 = vadd.f32 %v1493_v14, %v1698_v40  ;;  %v472_v21 = vpop.f32.mrf.mxu0  ;;  %v600_v22 = vpop.f32.mrf.mxu1 }
 0x115   :  { %1358 = vst [vmem:[%s1863_s3 + $0x58] sm:$0xff] %v1246_v15   ;;  %1374 = vst [vmem:[%s1863_s3 + $0xd8] sm:$0xff] %v1326_v16   ;;  %v1241_v23 = vpack.c.bf16 %v652_v17, %v651_v11  ;;  %v1321_v24 = vpack.c.bf16 %v684_v18, %v683_v12  ;;  %v473_v25 = vadd.f32 %v1698_v40, %v472_v21 }
 0x116   :  { %v601_v26 = vadd.f32 %v1698_v40, %v600_v22  ;;  %v1462_v27 = vpop.f32.mrf.mxu0  ;;  %v1494_v28 = vpop.f32.mrf.mxu1  ;;  %v657_v31 = vmax.f32 %v481_v19, 0.0  ;;  %v689_v32 = vmax.f32 %v609_v20, 0.0 }
 0x117   :  { %1357 = vst [vmem:[%s1863_s3 + $0x50] sm:$0xff] %v1241_v23   ;;  %1373 = vst [vmem:[%s1863_s3 + $0xd0] sm:$0xff] %v1321_v24   ;;  %v484_v29 = vadd.f32 %v1462_v27, %v1698_v40  ;;  %v612_v30 = vadd.f32 %v1494_v28, %v1698_v40  ;;  %v655_v39 = vmax.f32 %v473_v25, 0.0 }
 0x118   :  { %v475_v33 = vpop.f32.mrf.mxu0  ;;  %v603_v34 = vpop.f32.mrf.mxu1  ;;  %v687_v41 = vmax.f32 %v601_v26, 0.0 }
 0x119   :  { %v658_v35 = vmax.f32 %v484_v29, 0.0  ;;  %v690_v36 = vmax.f32 %v612_v30, 0.0  ;;  %v476_v37 = vadd.f32 %v1698_v40, %v475_v33  ;;  %v604_v38 = vadd.f32 %v1698_v40, %v603_v34 }
 0x11a   :  { %v1465_v42 = vpop.f32.mrf.mxu0  ;;  %v1497_v43 = vpop.f32.mrf.mxu1 }
 0x11b   :  { %v1256_v44 = vpack.c.bf16 %v658_v35, %v657_v31  ;;  %v1336_v45 = vpack.c.bf16 %v690_v36, %v689_v32  ;;  %v656_v46 = vmax.f32 %v476_v37, 0.0  ;;  %v688_v47 = vmax.f32 %v604_v38, 0.0 }
 0x11c   :  { %v497_v48 = vadd.f32 %v1465_v42, %v1698_v40  ;;  %v625_v49 = vadd.f32 %v1497_v43, %v1698_v40  ;;  %v488_v50 = vpop.f32.mrf.mxu0  ;;  %v616_v51 = vpop.f32.mrf.mxu1 }
 0x11d   :  { %1360 = vst [vmem:[%s1863_s3 + $0x68] sm:$0xff] %v1256_v44   ;;  %1376 = vst [vmem:[%s1863_s3 + $0xe8] sm:$0xff] %v1336_v45   ;;  %v1251_v52 = vpack.c.bf16 %v656_v46, %v655_v39  ;;  %v1331_v53 = vpack.c.bf16 %v688_v47, %v687_v41  ;;  %v489_v54 = vadd.f32 %v1698_v40, %v488_v50 }
 0x11e   :  { %v617_v55 = vadd.f32 %v1698_v40, %v616_v51  ;;  %v1466_v56 = vpop.f32.mrf.mxu0  ;;  %v1498_v57 = vpop.f32.mrf.mxu1  ;;  %v661_v60 = vmax.f32 %v497_v48, 0.0  ;;  %v693_v61 = vmax.f32 %v625_v49, 0.0 }
 0x11f   :  { %1359 = vst [vmem:[%s1863_s3 + $0x60] sm:$0xff] %v1251_v52   ;;  %1375 = vst [vmem:[%s1863_s3 + $0xe0] sm:$0xff] %v1331_v53   ;;  %v500_v58 = vadd.f32 %v1466_v56, %v1698_v40  ;;  %v628_v59 = vadd.f32 %v1498_v57, %v1698_v40  ;;  %v659_v4 = vmax.f32 %v489_v54, 0.0 }
 0x120   :  { %v491_v62 = vpop.f32.mrf.mxu0  ;;  %v619_v63 = vpop.f32.mrf.mxu1  ;;  %v691_v5 = vmax.f32 %v617_v55, 0.0 }
 0x121   :  { %v662_v0 = vmax.f32 %v500_v58, 0.0  ;;  %v694_v1 = vmax.f32 %v628_v59, 0.0  ;;  %v492_v2 = vadd.f32 %v1698_v40, %v491_v62  ;;  %v620_v3 = vadd.f32 %v1698_v40, %v619_v63 }
 0x123   :  { %v1266_v6 = vpack.c.bf16 %v662_v0, %v661_v60  ;;  %v1346_v7 = vpack.c.bf16 %v694_v1, %v693_v61  ;;  %v660_v8 = vmax.f32 %v492_v2, 0.0  ;;  %v692_v9 = vmax.f32 %v620_v3, 0.0 }
 0x125   :  { %1362 = vst [vmem:[%s1863_s3 + $0x78] sm:$0xff] %v1266_v6   ;;  %1378 = vst [vmem:[%s1863_s3 + $0xf8] sm:$0xff] %v1346_v7   ;;  %v1261_v10 = vpack.c.bf16 %v660_v8, %v659_v4  ;;  %v1341_v11 = vpack.c.bf16 %v692_v9, %v691_v5 }
 0x127   :  { %1361 = vst [vmem:[%s1863_s3 + $0x70] sm:$0xff] %v1261_v10   ;;  %1377 = vst [vmem:[%s1863_s3 + $0xf0] sm:$0xff] %v1341_v11  }

// kernel: bottleneck_forward.4
= control target key start
LH: loop header
LB: loop body
LE: loop exit
PB: predicated region body
PF: predicated region fallthrough
CT: control target
= control target key end

     0   :  { %s3632_s0 = inlined_call_operand.vmem [shape: s32[9], index: 0, kind: input, shape index: {}]   ;;  %s3633_s1 = inlined_call_operand.vmem [shape: bf16[2,4,9,9,128], index: 1, kind: input, shape index: {}]   ;;  %s3634_s2 = inlined_call_operand.vmem [shape: bf16[9,128,128], index: 2, kind: input, shape index: {}]   ;;  %s3635_s3 = inlined_call_operand.vmem [shape: f32[1,128], index: 3, kind: input, shape index: {}]   ;;  %s3636_s4 = inlined_call_operand.vmem [shape: bf16[2,64,128], index: 4, kind: output, shape index: {}]  }
   0x1   :  { %s9_s17 = sshll.u32 %s3632_s0, 4  ;;  %s10_s17 = int_to_ptr.vmem [resolvable:$true] %s9_s17 }
   0x2   :  { %s3258_s18 = scalar_lea.vmem %s10_s17, 16  ;;  %p3263_p1 = scmp.lt.s32.totalorder %s10_s17, %s10_s17 }
   0x3   :  { %p3259_p0 = scmp.ne.s32.totalorder %s10_s17, %s3258_s18  ;;  %p3264_p2 = scmp.lt.s32.totalorder %s3258_s18, %s3258_s18 }
   0x5   :  { %p3265_p3 = por %p3264_p2, %p3263_p1 }
   0x7   :  { %p3266_p4 = pnand %p3265_p3, %p3259_p0 }
   0x9   :  { %3269 = shalt.err (!%p3266_p4)  }
   0xa   :  { %s3312_s19 = smov [#allocation4]  }
   0xb   :  { %12 = dma.vmem_to_smem %s10_s17, 16, %s3312_s19, [#allocation3] }
   0xc   :  { %3290 = dma.done.wait [#allocation3], 16 }
   0xd   :  { %3291 = vsyncadd [#allocation3], 4294967280 }
   0xe   :  { %14 = sfence }
   0xf   :  { %s3341_s20 = smov 0   ;;  %s3343_s21 = smov 0  }
  0x10   :  { %s3345_s22 = smov 0   ;;  %s3347_s0 = smov 0  }
  0x11   :  { %s3349_s23 = smov 0  }
  0x12 LB: > { %s29_s24 = sadd.s32 1, %s3302_s22  ;;  %s32_s25 = sadd.s32 1, %s3306_s0  ;;  %s3310_s23 = sphi %s3349_s23, %s20_s23   ;;  %s3306_s0 = sphi %s3347_s0, %s3646_s0   ;;  %s3302_s22 = sphi %s3345_s22, %s3645_s22   ;;  %s3298_s21 = sphi %s3343_s21, %s3644_s21   ;;  %s3294_s20 = sphi %s3341_s20, %s3643_s20  }
  0x13   : > { %p30_p5 = scmp.ge.s32.totalorder %s29_s24, 9  ;;  %p2451_p6 = scmp.ge.s32.totalorder %s3310_s23, 1 }
  0x14   : > { %p176_p7 = scmp.lt.s32.totalorder %s3310_s23, 19 }
  0x15   : > { %s3648_s24 = smov (%p30_p5, %s29_s24), 0  ;;  %s3650_s25 = smov (!%p30_p5, %s32_s25), %s3306_s0 }
  0x16   : > { %p177_p8 = pnand %p2451_p6, %p176_p7  ;;  %p34_p9 = scmp.ge.s32.totalorder %s3650_s25, 2 }
  0x17   : > { %s210_s26 = sld [smem:[#allocation4 + %s3294_s20]] (!%p177_p8)  ;;  %p211_p10 = scmp.lt.s32.totalorder (!%p177_p8), %s3298_s21, 1 }
  0x18   : > { %s3652_s25 = smov (%p34_p9, %s3650_s25), 0  ;;  %180 = sbr.rel (%p177_p8) target bundleno = 2215 (0x8a7), region = 32 }
  0x19   : > { %p221_p11 = scmp.lt.s32.totalorder (!%p177_p8), %s3294_s20, 8  ;;  %p2457_p13 = scmp.ne.s32.totalorder (!%p177_p8), %s3294_s20, 0 }
  0x1d   : > { %s3654_s21 = smov (!%p211_p10, %s3298_s21), 1  ;;  %p213_p12 = scmp.lt.s32.totalorder %s210_s26, 3 }
  0x1e   : > { %s222_s27 = scalar_select %p221_p11, %s3294_s20, 8 }
  0x1f   : > { %s2618_s28 = sshll.u32 %s3654_s21, 5  ;;  %s3119_s10 = smul.u32 72, %s3654_s21 }
  0x20   : > { %s2617_s29 = sshll.u32 %s222_s27, 6  ;;  %s3379_s6 = scalar_lea.vmem %s3636_s4, %s2618_s28 }
  0x21   : > { %s3384_s9 = scalar_lea.vmem %s3634_s2, %s2617_s29  ;;  %s3656_s26 = smov (!%p213_p12, %s210_s26), 3 }
  0x22   : > { %s3118_s11 = smul.u32 18, %s3656_s26 }
  0x23   : > { %235 = sbr.rel (%p2457_p13) target bundleno = 273 (0x111), region = 36 }
  0x24   : > { %s217_s12 = sadd.s32 %s3119_s10, %s3118_s11 }
  0x25   : > { %s2452_s13 = sshll.u32 %s217_s12, 2 }
  0x26   : > { %s3389_s16 = scalar_lea.vmem %s3633_s1, %s2452_s13 }
  0x28   : > { %v3162_v0 = vld [vmem:[%s3384_s9 + $0x38] sm:$0xff]   ;;  %v3163_v1 = vld [vmem:[%s3384_s9 + $0x30] sm:$0xff]   ;;  %v3164_v2 = vld [vmem:[%s3384_s9 + $0x28] sm:$0xff]  }
  0x29   : > { %2758 = vmatprep.subr.bf16.mxu0 %v3162_v0  ;;  %2974 = vmatprep.subr.bf16.mxu1 %v3162_v0  ;;  %v3165_v3 = vld [vmem:[%s3384_s9 + $0x20] sm:$0xff]   ;;  %v3166_v6 = vld [vmem:[%s3384_s9 + $0x18] sm:$0xff]   ;;  %v3167_v7 = vld [vmem:[%s3384_s9 + $0x10] sm:$0xff]  }
  0x2a   : > { %2759 = vmatpush3.bf16.msra.mxu0 %v3162_v0  ;;  %2982 = vmatpush3.bf16.msra.mxu1 %v3162_v0  ;;  %v3170_v4 = vld [vmem:[%s3389_s16] ss:$8 sps:$4 sm:$0xff]   ;;  %v3172_v10 = vld [vmem:[%s3389_s16 + $0x10] ss:$8 sps:$4 sm:$0xff]  }
  0x2b   : > { %2760 = vmatprep.subr.bf16.mxu0 %v3163_v1  ;;  %2975 = vmatprep.subr.bf16.mxu1 %v3163_v1  ;;  %v3171_v5 = vld [vmem:[%s3389_s16 + $0x20] ss:$8 sps:$4 sm:$0xff]   ;;  %v3173_v11 = vld [vmem:[%s3389_s16 + $0x30] ss:$8 sps:$4 sm:$0xff]  }
  0x2c   : > { %2774 = vmatprep.mubr.bf16.mxu0 %v3170_v4  ;;  %2778 = vmatprep.mubr.bf16.mxu1 %v3171_v5  ;;  %v3168_v8 = vld [vmem:[%s3384_s9 + $0x8] sm:$0xff]   ;;  %v3169_v9 = vld [vmem:[%s3384_s9] sm:$0xff]  }
  0x2e   : > { %2761 = vmatpush3.bf16.msra.mxu0 %v3163_v1  ;;  %2983 = vmatpush3.bf16.msra.mxu1 %v3163_v1 }
  0x2f   : > { %2762 = vmatprep.subr.bf16.mxu0 %v3164_v2  ;;  %2976 = vmatprep.subr.bf16.mxu1 %v3164_v2 }
  0x32   : > { %2763 = vmatpush3.bf16.msra.mxu0 %v3164_v2  ;;  %2984 = vmatpush3.bf16.msra.mxu1 %v3164_v2 }
  0x33   : > { %2764 = vmatprep.subr.bf16.mxu0 %v3165_v3  ;;  %2977 = vmatprep.subr.bf16.mxu1 %v3165_v3 }
  0x36   : > { %2765 = vmatpush3.bf16.msra.mxu0 %v3165_v3  ;;  %2985 = vmatpush3.bf16.msra.mxu1 %v3165_v3 }
  0x37   : > { %2766 = vmatprep.subr.bf16.mxu0 %v3166_v6  ;;  %2978 = vmatprep.subr.bf16.mxu1 %v3166_v6 }
  0x3a   : > { %2767 = vmatpush3.bf16.msra.mxu0 %v3166_v6  ;;  %2986 = vmatpush3.bf16.msra.mxu1 %v3166_v6 }
  0x3b   : > { %2768 = vmatprep.subr.bf16.mxu0 %v3167_v7  ;;  %2979 = vmatprep.subr.bf16.mxu1 %v3167_v7 }
  0x3e   : > { %2769 = vmatpush3.bf16.msra.mxu0 %v3167_v7  ;;  %2987 = vmatpush3.bf16.msra.mxu1 %v3167_v7 }
  0x3f   : > { %2770 = vmatprep.subr.bf16.mxu0 %v3168_v8  ;;  %2980 = vmatprep.subr.bf16.mxu1 %v3168_v8 }
  0x42   : > { %2771 = vmatpush3.bf16.msra.mxu0 %v3168_v8  ;;  %2988 = vmatpush3.bf16.msra.mxu1 %v3168_v8 }
  0x43   : > { %2772 = vmatprep.subr.bf16.mxu0 %v3169_v9  ;;  %2981 = vmatprep.subr.bf16.mxu1 %v3169_v9 }
  0x46   : > { %2773 = vmatpush3.bf16.msra.mxu0 %v3169_v9  ;;  %2989 = vmatpush3.bf16.msra.mxu1 %v3169_v9 }
  0x49   : > { %2775 = vmatmul.mubr.bf16.vlgmr.msra.gmra.mxu0 %v3172_v10  ;;  %2779 = vmatmul.mubr.bf16.vlgmr.msra.gmra.mxu1 %v3173_v11 }
 0x109   : > { %v2776_v12 = vpop.f32.mrf.mxu0  ;;  %v2780_v13 = vpop.f32.mrf.mxu1 }
 0x10a   : > { %423 = vst [vmem:[#allocation2 + $0x18] sm:$0xff] %v2776_v12  ;;  %427 = vst [vmem:[#allocation2 + $0x28] sm:$0xff] %v2780_v13 }
 0x10b   : > { %v382_v14 = vpop.f32.mrf.mxu0  ;;  %v398_v15 = vpop.f32.mrf.mxu1 }
 0x10c   : > { %421 = vst [vmem:[#allocation2 + $0x30] sm:$0xff] %v382_v14  ;;  %425 = vst [vmem:[#allocation2 + $0x8] sm:$0xff] %v398_v15 }
 0x10d   : > { %v2777_v16 = vpop.f32.mrf.mxu0  ;;  %v2781_v17 = vpop.f32.mrf.mxu1 }
 0x10e   : > { %424 = vst [vmem:[#allocation2 + $0x10] sm:$0xff] %v2777_v16  ;;  %428 = vst [vmem:[#allocation2 + $0x38] sm:$0xff] %v2781_v17 }
 0x10f   : > { %v385_v18 = vpop.f32.mrf.mxu0  ;;  %v401_v19 = vpop.f32.mrf.mxu1 }
 0x110   : > { %422 = vst [vmem:[#allocation2] sm:$0xff] %v385_v18  ;;  %426 = vst [vmem:[#allocation2 + $0x20] sm:$0xff] %v401_v19 }
 0x111 PF: > { %p2470_p0 = scmp.ne.s32.totalorder %s3294_s20, 1 }
 0x113   : > { %432 = sbr.rel (%p2470_p0) target bundleno = 515 (0x203), region = 40 }
 0x118   : > { %v3174_v20 = vld [vmem:[%s3384_s9 + $0x38] sm:$0xff]   ;;  %v3175_v21 = vld [vmem:[%s3384_s9 + $0x30] sm:$0xff]   ;;  %v3176_v22 = vld [vmem:[%s3384_s9 + $0x28] sm:$0xff]   ;;  %vm457_vm0 = vsmask.f32 3328 }
 0x119   : > { %2782 = vmatprep.subr.bf16.mxu0 %v3174_v20  ;;  %2990 = vmatprep.subr.bf16.mxu1 %v3174_v20  ;;  %v3177_v23 = vld [vmem:[%s3384_s9 + $0x20] sm:$0xff]   ;;  %v435_v26 = vld [vmem:[%s3389_s16 + $0x8] sm:$0xf]  ;;  %v436_v27 = vld [vmem:[%s3389_s16 + $0xc] sm:$0x1] }
 0x11a   : > { %2783 = vmatpush3.bf16.msra.mxu0 %v3174_v20  ;;  %2998 = vmatpush3.bf16.msra.mxu1 %v3174_v20  ;;  %v433_v24 = vld [vmem:[%s3389_s16] sm:$0xf]  ;;  %v434_v25 = vld [vmem:[%s3389_s16 + $0x4] sm:$0x1]  ;;  %vm458_vm1 = vsmask.f32 7440 }
 0x11b   : > { %2784 = vmatprep.subr.bf16.mxu0 %v3175_v21  ;;  %2991 = vmatprep.subr.bf16.mxu1 %v3175_v21  ;;  %v3178_v28 = vld [vmem:[%s3384_s9 + $0x18] sm:$0xff]   ;;  %v461_v29 = vshrl.u32 %v433_v24, 16  ;;  %v464_v30 = vshll.u32 %v433_v24, 16  ;;  %v470_v31 = vshll.u32 %v434_v25, 16  ;;  %v475_v32 = vshrl.u32 %v435_v26, 16  ;;  %v3179_v52 = vld [vmem:[%s3384_s9 + $0x10] sm:$0xff]   ;;  %vm3422_vm2 = vmor %vm457_vm0, %vm458_vm1 }
 0x11c   : > { %v441_v33 = vld [vmem:[%s3389_s16 + $0x20] sm:$0xf]  ;;  %v478_v34 = vshll.u32 %v435_v26, 16  ;;  %v484_v35 = vshll.u32 %v436_v27, 16  ;;  %v442_v36 = vld [vmem:[%s3389_s16 + $0x24] sm:$0x1] }
 0x11d   : > { %v443_v37 = vld [vmem:[%s3389_s16 + $0x28] sm:$0xf]  ;;  %v463_v38 = vrot.slane %v461_v29, 4  ;;  %v466_v39 = vrot.slane %v464_v30, 5  ;;  %v472_v40 = vrot.slane %v470_v31, 5  ;;  %v477_v41 = vrot.slane %v475_v32, 4 }
 0x11e   : > { %2785 = vmatpush3.bf16.msra.mxu0 %v3175_v21  ;;  %2999 = vmatpush3.bf16.msra.mxu1 %v3175_v21  ;;  %v444_v42 = vld [vmem:[%s3389_s16 + $0x2c] sm:$0x1]  ;;  %v480_v43 = vrot.slane %v478_v34, 5  ;;  %v486_v44 = vrot.slane %v484_v35, 5  ;;  %v517_v45 = vshrl.u32 %v441_v33, 16  ;;  %v520_v46 = vshll.u32 %v441_v33, 16 }
 0x11f   : > { %2786 = vmatprep.subr.bf16.mxu0 %v3176_v22  ;;  %2992 = vmatprep.subr.bf16.mxu1 %v3176_v22  ;;  %v467_v47 = vor.u32 %v466_v39, %v463_v38  ;;  %v526_v48 = vshll.u32 %v442_v36, 16  ;;  %v531_v49 = vshrl.u32 %v443_v37, 16  ;;  %v534_v50 = vshll.u32 %v443_v37, 16  ;;  %v437_v51 = vld [vmem:[%s3389_s16 + $0x10] sm:$0xf]  ;;  %v3180_v14 = vld [vmem:[%s3384_s9 + $0x8] sm:$0xff]  }
 0x120   : > { %v481_v54 = vor.u32 %v480_v43, %v477_v41  ;;  %v519_v55 = vrot.slane %v517_v45, 4  ;;  %v522_v56 = vrot.slane %v520_v46, 5  ;;  %v540_v57 = vshll.u32 %v444_v42, 16  ;;  %v438_v58 = vld [vmem:[%s3389_s16 + $0x14] sm:$0x1]  ;;  %v3181_v33 = vld [vmem:[%s3384_s9] sm:$0xff]  }
 0x121   : > { %v468_v59 = vrot.slane %v467_v47, 4  ;;  %v528_v60 = vrot.slane %v526_v48, 5  ;;  %v533_v61 = vrot.slane %v531_v49, 4  ;;  %v536_v62 = vrot.slane %v534_v50, 5  ;;  %v439_v63 = vld [vmem:[%s3389_s16 + $0x18] sm:$0xf] }
 0x122   : > { %2787 = vmatpush3.bf16.msra.mxu0 %v3176_v22  ;;  %3000 = vmatpush3.bf16.msra.mxu1 %v3176_v22  ;;  %v482_v0 = vrot.slane %v481_v54, 4  ;;  %v523_v1 = vor.u32 %v522_v56, %v519_v55  ;;  %v542_v2 = vrot.slane %v540_v57, 5  ;;  %v489_v3 = vshrl.u32 %v437_v51, 16  ;;  %v440_v6 = vld [vmem:[%s3389_s16 + $0x1c] sm:$0x1]  ;;  %v450_v53 = vld [vmem:[#allocation2] sm:$0xff] }
 0x123   : > { %2788 = vmatprep.subr.bf16.mxu0 %v3177_v23  ;;  %2993 = vmatprep.subr.bf16.mxu1 %v3177_v23  ;;  %v473_v4 = vsel %vm3422_vm2, %v468_v59, %v472_v40  ;;  %v537_v5 = vor.u32 %v536_v62, %v533_v61  ;;  %v492_v7 = vshll.u32 %v437_v51, 16  ;;  %v498_v8 = vshll.u32 %v438_v58, 16  ;;  %v445_v13 = vld [vmem:[%s3389_s16 + $0x30] sm:$0xf]  ;;  %v446_v18 = vld [vmem:[%s3389_s16 + $0x34] sm:$0x1] }
 0x124   : > { %v487_v9 = vsel %vm3422_vm2, %v482_v0, %v486_v44  ;;  %v524_v10 = vrot.slane %v523_v1, 4  ;;  %v491_v11 = vrot.slane %v489_v3, 4  ;;  %v503_v12 = vshrl.u32 %v439_v63, 16  ;;  %v448_v26 = vld [vmem:[%s3389_s16 + $0x3c] sm:$0x1]  ;;  %v449_v61 = vld [vmem:[#allocation2 + $0x30] sm:$0xff] }
 0x125   : > { %v2471_v15 = vcombine.low %v473_v4, %v487_v9  ;;  %v538_v16 = vrot.slane %v537_v5, 4  ;;  %v494_v17 = vrot.slane %v492_v7, 5  ;;  %v506_v21 = vshll.u32 %v439_v63, 16  ;;  %v451_v58 = vld [vmem:[#allocation2 + $0x18] sm:$0xff]  ;;  %v453_v1 = vld [vmem:[#allocation2 + $0x8] sm:$0xff] }
 0x126   : > { %2789 = vmatpush3.bf16.msra.mxu0 %v3177_v23  ;;  %3001 = vmatpush3.bf16.msra.mxu1 %v3177_v23  ;;  %v529_v19 = vsel %vm3422_vm2, %v524_v10, %v528_v60  ;;  %v505_v20 = vrot.slane %v503_v12, 4  ;;  %v512_v22 = vshll.u32 %v440_v6, 16  ;;  %v447_v23 = vld [vmem:[%s3389_s16 + $0x38] sm:$0xf]  ;;  %v545_v27 = vshrl.u32 %v445_v13, 16  ;;  %v455_v60 = vld [vmem:[#allocation2 + $0x28] sm:$0xff] }
 0x127   : > { %2790 = vmatprep.subr.bf16.mxu0 %v3178_v28  ;;  %2994 = vmatprep.subr.bf16.mxu1 %v3178_v28  ;;  %v543_v24 = vsel %vm3422_vm2, %v538_v16, %v542_v2  ;;  %v495_v25 = vor.u32 %v494_v17, %v491_v11  ;;  %v500_v30 = vrot.slane %v498_v8, 5  ;;  %v508_v31 = vrot.slane %v506_v21, 5  ;;  %v452_v2 = vld [vmem:[#allocation2 + $0x10] sm:$0xff]  ;;  %v456_v7 = vld [vmem:[#allocation2 + $0x38] sm:$0xff]  ;;  %v454_v12 = vld [vmem:[#allocation2 + $0x20] sm:$0xff] }
 0x128   : > { %2798 = vmatprep.mubr.bf16.mxu0 %v2471_v15  ;;  %v2473_v29 = vcombine.low %v529_v19, %v543_v24  ;;  %v554_v32 = vshll.u32 %v446_v18, 16  ;;  %v547_v35 = vrot.slane %v545_v27, 4  ;;  %v559_v37 = vshrl.u32 %v447_v23, 16 }
 0x129   : > { %v496_v34 = vrot.slane %v495_v25, 4  ;;  %v509_v38 = vor.u32 %v508_v31, %v505_v20  ;;  %v514_v39 = vrot.slane %v512_v22, 5  ;;  %v562_v40 = vshll.u32 %v447_v23, 16 }
 0x12a   : > { %2791 = vmatpush3.bf16.msra.mxu0 %v3178_v28  ;;  %3002 = vmatpush3.bf16.msra.mxu1 %v3178_v28  ;;  %v548_v28 = vshll.u32 %v445_v13, 16  ;;  %v568_v41 = vshll.u32 %v448_v26, 16  ;;  %v561_v43 = vrot.slane %v559_v37, 4  ;;  %v556_v46 = vrot.slane %v554_v32, 5 }
 0x12b   : > { %2792 = vmatprep.subr.bf16.mxu0 %v3179_v52  ;;  %2995 = vmatprep.subr.bf16.mxu1 %v3179_v52  ;;  %v501_v44 = vsel %vm3422_vm2, %v496_v34, %v500_v30  ;;  %v510_v45 = vrot.slane %v509_v38, 4  ;;  %v564_v47 = vrot.slane %v562_v40, 5 }
 0x12c   : > { %v550_v36 = vrot.slane %v548_v28, 5  ;;  %2802 = vmatprep.mubr.bf16.mxu1 %v2473_v29  ;;  %v570_v51 = vrot.slane %v568_v41, 5 }
 0x12d   : > { %v515_v49 = vsel %vm3422_vm2, %v510_v45, %v514_v39  ;;  %v565_v50 = vor.u32 %v564_v47, %v561_v43 }
 0x12e   : > { %2793 = vmatpush3.bf16.msra.mxu0 %v3179_v52  ;;  %3003 = vmatpush3.bf16.msra.mxu1 %v3179_v52  ;;  %v551_v42 = vor.u32 %v550_v36, %v547_v35  ;;  %v2472_v52 = vcombine.low %v501_v44, %v515_v49 }
 0x12f   : > { %2794 = vmatprep.subr.bf16.mxu0 %v3180_v14  ;;  %2996 = vmatprep.subr.bf16.mxu1 %v3180_v14  ;;  %v566_v55 = vrot.slane %v565_v50, 4 }
 0x130   : > { %v552_v48 = vrot.slane %v551_v42, 4 }
 0x131   : > { %v571_v56 = vsel %vm3422_vm2, %v566_v55, %v570_v51 }
 0x132   : > { %2795 = vmatpush3.bf16.msra.mxu0 %v3180_v14  ;;  %3004 = vmatpush3.bf16.msra.mxu1 %v3180_v14  ;;  %v557_v54 = vsel %vm3422_vm2, %v552_v48, %v556_v46 }
 0x133   : > { %2796 = vmatprep.subr.bf16.mxu0 %v3181_v33  ;;  %2997 = vmatprep.subr.bf16.mxu1 %v3181_v33  ;;  %v2474_v57 = vcombine.low %v557_v54, %v571_v56 }
 0x136   : > { %2797 = vmatpush3.bf16.msra.mxu0 %v3181_v33  ;;  %3005 = vmatpush3.bf16.msra.mxu1 %v3181_v33 }
 0x139   : > { %2799 = vmatmul.mubr.bf16.vlgmr.msra.gmra.mxu0 %v2472_v52  ;;  %2803 = vmatmul.mubr.bf16.vlgmr.msra.gmra.mxu1 %v2474_v57 }
 0x1f9   : > { %v2800_v59 = vpop.f32.mrf.mxu0  ;;  %v2804_v63 = vpop.f32.mrf.mxu1 }
 0x1fa   : > { %v719_v62 = vadd.f32 %v2800_v59, %v451_v58  ;;  %v723_v3 = vadd.f32 %v2804_v63, %v455_v60 }
 0x1fb   : > { %v686_v0 = vpop.f32.mrf.mxu0  ;;  %v702_v5 = vpop.f32.mrf.mxu1 }
 0x1fc   : > { %727 = vst [vmem:[#allocation2 + $0x18] sm:$0xff] %v719_v62  ;;  %v717_v4 = vadd.f32 %v686_v0, %v449_v61  ;;  %731 = vst [vmem:[#allocation2 + $0x28] sm:$0xff] %v723_v3  ;;  %v721_v8 = vadd.f32 %v702_v5, %v453_v1 }
 0x1fd   : > { %v2801_v6 = vpop.f32.mrf.mxu0  ;;  %v2805_v10 = vpop.f32.mrf.mxu1 }
 0x1fe   : > { %725 = vst [vmem:[#allocation2 + $0x30] sm:$0xff] %v717_v4  ;;  %v720_v9 = vadd.f32 %v2801_v6, %v452_v2  ;;  %729 = vst [vmem:[#allocation2 + $0x8] sm:$0xff] %v721_v8  ;;  %v724_v13 = vadd.f32 %v2805_v10, %v456_v7 }
 0x1ff   : > { %v689_v11 = vpop.f32.mrf.mxu0  ;;  %v705_v15 = vpop.f32.mrf.mxu1 }
 0x200   : > { %728 = vst [vmem:[#allocation2 + $0x10] sm:$0xff] %v720_v9  ;;  %v718_v14 = vadd.f32 %v689_v11, %v450_v53  ;;  %732 = vst [vmem:[#allocation2 + $0x38] sm:$0xff] %v724_v13  ;;  %v722_v16 = vadd.f32 %v705_v15, %v454_v12 }
 0x202   : > { %726 = vst [vmem:[#allocation2] sm:$0xff] %v718_v14  ;;  %730 = vst [vmem:[#allocation2 + $0x20] sm:$0xff] %v722_v16 }
 0x203 PF: > { %p2483_p1 = scmp.ne.s32.totalorder %s3294_s20, 2 }
 0x205   : > { %736 = sbr.rel (%p2483_p1) target bundleno = 757 (0x2f5), region = 44 }
 0x20a   : > { %v3182_v17 = vld [vmem:[%s3384_s9 + $0x38] sm:$0xff]   ;;  %v3183_v18 = vld [vmem:[%s3384_s9 + $0x30] sm:$0xff]   ;;  %v3184_v19 = vld [vmem:[%s3384_s9 + $0x28] sm:$0xff]  }
 0x20b   : > { %2806 = vmatprep.subr.bf16.mxu0 %v3182_v17  ;;  %3006 = vmatprep.subr.bf16.mxu1 %v3182_v17  ;;  %v3185_v20 = vld [vmem:[%s3384_s9 + $0x20] sm:$0xff]   ;;  %v3190_v21 = vld [vmem:[%s3389_s16 + $0x8] ss:$8 sps:$4 sm:$0xff]   ;;  %v3186_v23 = vld [vmem:[%s3384_s9 + $0x18] sm:$0xff]  }
 0x20c   : > { %2807 = vmatpush3.bf16.msra.mxu0 %v3182_v17  ;;  %3014 = vmatpush3.bf16.msra.mxu1 %v3182_v17  ;;  %v3191_v22 = vld [vmem:[%s3389_s16 + $0x28] ss:$8 sps:$4 sm:$0xff]   ;;  %v3189_v26 = vld [vmem:[%s3384_s9] sm:$0xff]   ;;  %v748_v29 = vld [vmem:[#allocation2 + $0x18] sm:$0xff] }
 0x20d   : > { %2808 = vmatprep.subr.bf16.mxu0 %v3183_v18  ;;  %3007 = vmatprep.subr.bf16.mxu1 %v3183_v18  ;;  %v3187_v24 = vld [vmem:[%s3384_s9 + $0x10] sm:$0xff]   ;;  %v3188_v25 = vld [vmem:[%s3384_s9 + $0x8] sm:$0xff]   ;;  %v3192_v27 = vld [vmem:[%s3389_s16 + $0x18] ss:$8 sps:$4 sm:$0xff]  }
 0x20e   : > { %2822 = vmatprep.mubr.bf16.mxu0 %v3190_v21  ;;  %2826 = vmatprep.mubr.bf16.mxu1 %v3191_v22  ;;  %v3193_v28 = vld [vmem:[%s3389_s16 + $0x38] ss:$8 sps:$4 sm:$0xff]   ;;  %v752_v30 = vld [vmem:[#allocation2 + $0x28] sm:$0xff]  ;;  %v746_v33 = vld [vmem:[#allocation2 + $0x30] sm:$0xff] }
 0x20f   : > { %v750_v34 = vld [vmem:[#allocation2 + $0x8] sm:$0xff]  ;;  %v749_v39 = vld [vmem:[#allocation2 + $0x10] sm:$0xff]  ;;  %v753_v40 = vld [vmem:[#allocation2 + $0x38] sm:$0xff] }
 0x210   : > { %2809 = vmatpush3.bf16.msra.mxu0 %v3183_v18  ;;  %3015 = vmatpush3.bf16.msra.mxu1 %v3183_v18  ;;  %v747_v45 = vld [vmem:[#allocation2] sm:$0xff] }
 0x211   : > { %2810 = vmatprep.subr.bf16.mxu0 %v3184_v19  ;;  %3008 = vmatprep.subr.bf16.mxu1 %v3184_v19  ;;  %v751_v46 = vld [vmem:[#allocation2 + $0x20] sm:$0xff] }
 0x214   : > { %2811 = vmatpush3.bf16.msra.mxu0 %v3184_v19  ;;  %3016 = vmatpush3.bf16.msra.mxu1 %v3184_v19 }
 0x215   : > { %2812 = vmatprep.subr.bf16.mxu0 %v3185_v20  ;;  %3009 = vmatprep.subr.bf16.mxu1 %v3185_v20 }
 0x218   : > { %2813 = vmatpush3.bf16.msra.mxu0 %v3185_v20  ;;  %3017 = vmatpush3.bf16.msra.mxu1 %v3185_v20 }
 0x219   : > { %2814 = vmatprep.subr.bf16.mxu0 %v3186_v23  ;;  %3010 = vmatprep.subr.bf16.mxu1 %v3186_v23 }
 0x21c   : > { %2815 = vmatpush3.bf16.msra.mxu0 %v3186_v23  ;;  %3018 = vmatpush3.bf16.msra.mxu1 %v3186_v23 }
 0x21d   : > { %2816 = vmatprep.subr.bf16.mxu0 %v3187_v24  ;;  %3011 = vmatprep.subr.bf16.mxu1 %v3187_v24 }
 0x220   : > { %2817 = vmatpush3.bf16.msra.mxu0 %v3187_v24  ;;  %3019 = vmatpush3.bf16.msra.mxu1 %v3187_v24 }
 0x221   : > { %2818 = vmatprep.subr.bf16.mxu0 %v3188_v25  ;;  %3012 = vmatprep.subr.bf16.mxu1 %v3188_v25 }
 0x224   : > { %2819 = vmatpush3.bf16.msra.mxu0 %v3188_v25  ;;  %3020 = vmatpush3.bf16.msra.mxu1 %v3188_v25 }
 0x225   : > { %2820 = vmatprep.subr.bf16.mxu0 %v3189_v26  ;;  %3013 = vmatprep.subr.bf16.mxu1 %v3189_v26 }
 0x228   : > { %2821 = vmatpush3.bf16.msra.mxu0 %v3189_v26  ;;  %3021 = vmatpush3.bf16.msra.mxu1 %v3189_v26 }
 0x22b   : > { %2823 = vmatmul.mubr.bf16.vlgmr.msra.gmra.mxu0 %v3192_v27  ;;  %2827 = vmatmul.mubr.bf16.vlgmr.msra.gmra.mxu1 %v3193_v28 }
 0x2eb   : > { %v2824_v31 = vpop.f32.mrf.mxu0  ;;  %v2828_v32 = vpop.f32.mrf.mxu1 }
 0x2ec   : > { %v909_v35 = vadd.f32 %v2824_v31, %v748_v29  ;;  %v913_v36 = vadd.f32 %v2828_v32, %v752_v30 }
 0x2ed   : > { %v876_v37 = vpop.f32.mrf.mxu0  ;;  %v892_v38 = vpop.f32.mrf.mxu1 }
 0x2ee   : > { %917 = vst [vmem:[#allocation2 + $0x18] sm:$0xff] %v909_v35  ;;  %921 = vst [vmem:[#allocation2 + $0x28] sm:$0xff] %v913_v36  ;;  %v907_v41 = vadd.f32 %v876_v37, %v746_v33  ;;  %v911_v42 = vadd.f32 %v892_v38, %v750_v34 }
 0x2ef   : > { %v2825_v43 = vpop.f32.mrf.mxu0  ;;  %v2829_v44 = vpop.f32.mrf.mxu1 }
 0x2f0   : > { %915 = vst [vmem:[#allocation2 + $0x30] sm:$0xff] %v907_v41  ;;  %919 = vst [vmem:[#allocation2 + $0x8] sm:$0xff] %v911_v42  ;;  %v910_v47 = vadd.f32 %v2825_v43, %v749_v39  ;;  %v914_v48 = vadd.f32 %v2829_v44, %v753_v40 }
 0x2f1   : > { %v879_v49 = vpop.f32.mrf.mxu0  ;;  %v895_v50 = vpop.f32.mrf.mxu1 }
 0x2f2   : > { %918 = vst [vmem:[#allocation2 + $0x10] sm:$0xff] %v910_v47  ;;  %922 = vst [vmem:[#allocation2 + $0x38] sm:$0xff] %v914_v48  ;;  %v908_v51 = vadd.f32 %v879_v49, %v747_v45  ;;  %v912_v52 = vadd.f32 %v895_v50, %v751_v46 }
 0x2f4   : > { %916 = vst [vmem:[#allocation2] sm:$0xff] %v908_v51  ;;  %920 = vst [vmem:[#allocation2 + $0x20] sm:$0xff] %v912_v52 }
 0x2f5 PF: > { %p2504_p2 = scmp.ne.s32.totalorder %s3294_s20, 3 }
 0x2f7   : > { %926 = sbr.rel (%p2504_p2) target bundleno = 999 (0x3e7), region = 48 }
 0x2fc   : > { %v3194_v54 = vld [vmem:[%s3384_s9 + $0x38] sm:$0xff]   ;;  %v3195_v55 = vld [vmem:[%s3384_s9 + $0x30] sm:$0xff]   ;;  %v3196_v56 = vld [vmem:[%s3384_s9 + $0x28] sm:$0xff]   ;;  %vm952_vm3 = vsmask.f32 3328 }
 0x2fd   : > { %2830 = vmatprep.subr.bf16.mxu0 %v3194_v54  ;;  %3022 = vmatprep.subr.bf16.mxu1 %v3194_v54  ;;  %v3197_v57 = vld [vmem:[%s3384_s9 + $0x20] sm:$0xff]   ;;  %v2505_v58 = vld [vmem:[%s3389_s16 + $0x8] sm:$0xf]  ;;  %v2506_v59 = vld [vmem:[%s3389_s16 + $0xc] sm:$0x1] }
 0x2fe   : > { %2831 = vmatpush3.bf16.msra.mxu0 %v3194_v54  ;;  %3030 = vmatpush3.bf16.msra.mxu1 %v3194_v54  ;;  %v2507_v60 = vld [vmem:[%s3389_s16 + $0x10] sm:$0xf]  ;;  %v2508_v61 = vld [vmem:[%s3389_s16 + $0x14] sm:$0x1]  ;;  %vm953_vm4 = vsmask.f32 7440 }
 0x2ff   : > { %2832 = vmatprep.subr.bf16.mxu0 %v3195_v55  ;;  %3023 = vmatprep.subr.bf16.mxu1 %v3195_v55  ;;  %v3198_v62 = vld [vmem:[%s3384_s9 + $0x18] sm:$0xff]   ;;  %v956_v63 = vshrl.u32 %v2505_v58, 16  ;;  %v959_v0 = vshll.u32 %v2505_v58, 16  ;;  %v965_v1 = vshll.u32 %v2506_v59, 16  ;;  %v970_v2 = vshrl.u32 %v2507_v60, 16  ;;  %v3199_v21 = vld [vmem:[%s3384_s9 + $0x10] sm:$0xff]   ;;  %vm3482_vm5 = vmor %vm952_vm3, %vm953_vm4 }
 0x300   : > { %v2513_v3 = vld [vmem:[%s3389_s16 + $0x28] sm:$0xf]  ;;  %v973_v4 = vshll.u32 %v2507_v60, 16  ;;  %v979_v5 = vshll.u32 %v2508_v61, 16  ;;  %v2514_v6 = vld [vmem:[%s3389_s16 + $0x2c] sm:$0x1] }
 0x301   : > { %v2515_v7 = vld [vmem:[%s3389_s16 + $0x30] sm:$0xf]  ;;  %v958_v53 = vrot.slane %v956_v63, 4  ;;  %v961_v8 = vrot.slane %v959_v0, 5  ;;  %v967_v9 = vrot.slane %v965_v1, 5  ;;  %v972_v10 = vrot.slane %v970_v2, 4 }
 0x302   : > { %2833 = vmatpush3.bf16.msra.mxu0 %v3195_v55  ;;  %3031 = vmatpush3.bf16.msra.mxu1 %v3195_v55  ;;  %v2516_v11 = vld [vmem:[%s3389_s16 + $0x34] sm:$0x1]  ;;  %v975_v12 = vrot.slane %v973_v4, 5  ;;  %v981_v13 = vrot.slane %v979_v5, 5  ;;  %v1012_v14 = vshrl.u32 %v2513_v3, 16  ;;  %v1015_v15 = vshll.u32 %v2513_v3, 16 }
 0x303   : > { %2834 = vmatprep.subr.bf16.mxu0 %v3196_v56  ;;  %3024 = vmatprep.subr.bf16.mxu1 %v3196_v56  ;;  %v962_v16 = vor.u32 %v961_v8, %v958_v53  ;;  %v1021_v17 = vshll.u32 %v2514_v6, 16  ;;  %v1026_v18 = vshrl.u32 %v2515_v7, 16  ;;  %v1029_v19 = vshll.u32 %v2515_v7, 16  ;;  %v2509_v20 = vld [vmem:[%s3389_s16 + $0x18] sm:$0xf]  ;;  %v3200_v47 = vld [vmem:[%s3384_s9 + $0x8] sm:$0xff]  }
 0x304   : > { %v976_v23 = vor.u32 %v975_v12, %v972_v10  ;;  %v1014_v24 = vrot.slane %v1012_v14, 4  ;;  %v1017_v25 = vrot.slane %v1015_v15, 5  ;;  %v1035_v26 = vshll.u32 %v2516_v11, 16  ;;  %v2510_v27 = vld [vmem:[%s3389_s16 + $0x1c] sm:$0x1]  ;;  %v3201_v3 = vld [vmem:[%s3384_s9] sm:$0xff]  }
 0x305   : > { %v963_v28 = vrot.slane %v962_v16, 4  ;;  %v1023_v29 = vrot.slane %v1021_v17, 5  ;;  %v1028_v30 = vrot.slane %v1026_v18, 4  ;;  %v1031_v31 = vrot.slane %v1029_v19, 5  ;;  %v2511_v32 = vld [vmem:[%s3389_s16 + $0x20] sm:$0xf] }
 0x306   : > { %2835 = vmatpush3.bf16.msra.mxu0 %v3196_v56  ;;  %3032 = vmatpush3.bf16.msra.mxu1 %v3196_v56  ;;  %v977_v33 = vrot.slane %v976_v23, 4  ;;  %v1018_v34 = vor.u32 %v1017_v25, %v1014_v24  ;;  %v1037_v35 = vrot.slane %v1035_v26, 5  ;;  %v984_v36 = vshrl.u32 %v2509_v20, 16  ;;  %v2512_v39 = vld [vmem:[%s3389_s16 + $0x24] sm:$0x1] }
 0x307   : > { %2836 = vmatprep.subr.bf16.mxu0 %v3197_v57  ;;  %3025 = vmatprep.subr.bf16.mxu1 %v3197_v57  ;;  %v968_v37 = vsel %vm3482_vm5, %v963_v28, %v967_v9  ;;  %v1032_v38 = vor.u32 %v1031_v31, %v1028_v30  ;;  %v987_v40 = vshll.u32 %v2509_v20, 16  ;;  %v993_v41 = vshll.u32 %v2510_v27, 16  ;;  %v2517_v46 = vld [vmem:[%s3389_s16 + $0x38] sm:$0xf]  ;;  %v2518_v51 = vld [vmem:[%s3389_s16 + $0x3c] sm:$0x1] }
 0x308   : > { %v982_v42 = vsel %vm3482_vm5, %v977_v33, %v981_v13  ;;  %v1019_v43 = vrot.slane %v1018_v34, 4  ;;  %v986_v44 = vrot.slane %v984_v36, 4  ;;  %v998_v45 = vshrl.u32 %v2511_v32, 16  ;;  %v2520_v60 = vld [vmem:[%s3389_s16 + $0x44] sm:$0x1]  ;;  %v946_v27 = vld [vmem:[#allocation2 + $0x18] sm:$0xff] }
 0x309   : > { %v2521_v48 = vcombine.low %v968_v37, %v982_v42  ;;  %v1033_v49 = vrot.slane %v1032_v38, 4  ;;  %v989_v50 = vrot.slane %v987_v40, 5  ;;  %v1001_v55 = vshll.u32 %v2511_v32, 16  ;;  %v944_v30 = vld [vmem:[#allocation2 + $0x30] sm:$0xff]  ;;  %v948_v34 = vld [vmem:[#allocation2 + $0x8] sm:$0xff]  ;;  %v951_v40 = vld [vmem:[#allocation2 + $0x38] sm:$0xff] }
 0x30a   : > { %2837 = vmatpush3.bf16.msra.mxu0 %v3197_v57  ;;  %3033 = vmatpush3.bf16.msra.mxu1 %v3197_v57  ;;  %v1024_v52 = vsel %vm3482_vm5, %v1019_v43, %v1023_v29  ;;  %v1000_v54 = vrot.slane %v998_v45, 4  ;;  %v1007_v56 = vshll.u32 %v2512_v39, 16  ;;  %v2519_v57 = vld [vmem:[%s3389_s16 + $0x40] sm:$0xf]  ;;  %v1040_v61 = vshrl.u32 %v2517_v46, 16  ;;  %v950_v29 = vld [vmem:[#allocation2 + $0x28] sm:$0xff] }
 0x30b   : > { %2838 = vmatprep.subr.bf16.mxu0 %v3198_v62  ;;  %3026 = vmatprep.subr.bf16.mxu1 %v3198_v62  ;;  %v1038_v58 = vsel %vm3482_vm5, %v1033_v49, %v1037_v35  ;;  %v990_v59 = vor.u32 %v989_v50, %v986_v44  ;;  %v995_v0 = vrot.slane %v993_v41, 5  ;;  %v1003_v1 = vrot.slane %v1001_v55, 5  ;;  %v947_v35 = vld [vmem:[#allocation2 + $0x10] sm:$0xff]  ;;  %v945_v22 = vld [vmem:[#allocation2] sm:$0xff] }
 0x30c   : > { %2846 = vmatprep.mubr.bf16.mxu0 %v2521_v48  ;;  %v2523_v63 = vcombine.low %v1024_v52, %v1038_v58  ;;  %v1049_v2 = vshll.u32 %v2518_v51, 16  ;;  %v1042_v5 = vrot.slane %v1040_v61, 4  ;;  %v1054_v7 = vshrl.u32 %v2519_v57, 16  ;;  %v949_v45 = vld [vmem:[#allocation2 + $0x20] sm:$0xff] }
 0x30d   : > { %v991_v4 = vrot.slane %v990_v59, 4  ;;  %v1004_v53 = vor.u32 %v1003_v1, %v1000_v54  ;;  %v1009_v8 = vrot.slane %v1007_v56, 5  ;;  %v1057_v9 = vshll.u32 %v2519_v57, 16 }
 0x30e   : > { %2839 = vmatpush3.bf16.msra.mxu0 %v3198_v62  ;;  %3034 = vmatpush3.bf16.msra.mxu1 %v3198_v62  ;;  %v1043_v62 = vshll.u32 %v2517_v46, 16  ;;  %v1063_v10 = vshll.u32 %v2520_v60, 16  ;;  %v1056_v12 = vrot.slane %v1054_v7, 4  ;;  %v1051_v15 = vrot.slane %v1049_v2, 5 }
 0x30f   : > { %2840 = vmatprep.subr.bf16.mxu0 %v3199_v21  ;;  %3027 = vmatprep.subr.bf16.mxu1 %v3199_v21  ;;  %v996_v13 = vsel %vm3482_vm5, %v991_v4, %v995_v0  ;;  %v1005_v14 = vrot.slane %v1004_v53, 4  ;;  %v1059_v16 = vrot.slane %v1057_v9, 5 }
 0x310   : > { %v1045_v6 = vrot.slane %v1043_v62, 5  ;;  %2850 = vmatprep.mubr.bf16.mxu1 %v2523_v63  ;;  %v1065_v20 = vrot.slane %v1063_v10, 5 }
 0x311   : > { %v1010_v18 = vsel %vm3482_vm5, %v1005_v14, %v1009_v8  ;;  %v1060_v19 = vor.u32 %v1059_v16, %v1056_v12 }
 0x312   : > { %2841 = vmatpush3.bf16.msra.mxu0 %v3199_v21  ;;  %3035 = vmatpush3.bf16.msra.mxu1 %v3199_v21  ;;  %v1046_v11 = vor.u32 %v1045_v6, %v1042_v5  ;;  %v2522_v21 = vcombine.low %v996_v13, %v1010_v18 }
 0x313   : > { %2842 = vmatprep.subr.bf16.mxu0 %v3200_v47  ;;  %3028 = vmatprep.subr.bf16.mxu1 %v3200_v47  ;;  %v1061_v24 = vrot.slane %v1060_v19, 4 }
 0x314   : > { %v1047_v17 = vrot.slane %v1046_v11, 4 }
 0x315   : > { %v1066_v25 = vsel %vm3482_vm5, %v1061_v24, %v1065_v20 }
 0x316   : > { %2843 = vmatpush3.bf16.msra.mxu0 %v3200_v47  ;;  %3036 = vmatpush3.bf16.msra.mxu1 %v3200_v47  ;;  %v1052_v23 = vsel %vm3482_vm5, %v1047_v17, %v1051_v15 }
 0x317   : > { %2844 = vmatprep.subr.bf16.mxu0 %v3201_v3  ;;  %3029 = vmatprep.subr.bf16.mxu1 %v3201_v3  ;;  %v2524_v26 = vcombine.low %v1052_v23, %v1066_v25 }
 0x31a   : > { %2845 = vmatpush3.bf16.msra.mxu0 %v3201_v3  ;;  %3037 = vmatpush3.bf16.msra.mxu1 %v3201_v3 }
 0x31d   : > { %2847 = vmatmul.mubr.bf16.vlgmr.msra.gmra.mxu0 %v2522_v21  ;;  %2851 = vmatmul.mubr.bf16.vlgmr.msra.gmra.mxu1 %v2524_v26 }
 0x3dd   : > { %v2848_v28 = vpop.f32.mrf.mxu0  ;;  %v2852_v32 = vpop.f32.mrf.mxu1 }
 0x3de   : > { %v1214_v31 = vadd.f32 %v2848_v28, %v946_v27  ;;  %v1218_v36 = vadd.f32 %v2852_v32, %v950_v29 }
 0x3df   : > { %v1181_v33 = vpop.f32.mrf.mxu0  ;;  %v1197_v38 = vpop.f32.mrf.mxu1 }
 0x3e0   : > { %1222 = vst [vmem:[#allocation2 + $0x18] sm:$0xff] %v1214_v31  ;;  %v1212_v37 = vadd.f32 %v1181_v33, %v944_v30  ;;  %1226 = vst [vmem:[#allocation2 + $0x28] sm:$0xff] %v1218_v36  ;;  %v1216_v41 = vadd.f32 %v1197_v38, %v948_v34 }
 0x3e1   : > { %v2849_v39 = vpop.f32.mrf.mxu0  ;;  %v2853_v43 = vpop.f32.mrf.mxu1 }
 0x3e2   : > { %1220 = vst [vmem:[#allocation2 + $0x30] sm:$0xff] %v1212_v37  ;;  %v1215_v42 = vadd.f32 %v2849_v39, %v947_v35  ;;  %1224 = vst [vmem:[#allocation2 + $0x8] sm:$0xff] %v1216_v41  ;;  %v1219_v46 = vadd.f32 %v2853_v43, %v951_v40 }
 0x3e3   : > { %v1184_v44 = vpop.f32.mrf.mxu0  ;;  %v1200_v48 = vpop.f32.mrf.mxu1 }
 0x3e4   : > { %1223 = vst [vmem:[#allocation2 + $0x10] sm:$0xff] %v1215_v42  ;;  %v1213_v47 = vadd.f32 %v1184_v44, %v945_v22  ;;  %1227 = vst [vmem:[#allocation2 + $0x38] sm:$0xff] %v1219_v46  ;;  %v1217_v49 = vadd.f32 %v1200_v48, %v949_v45 }
 0x3e6   : > { %1221 = vst [vmem:[#allocation2] sm:$0xff] %v1213_v47  ;;  %1225 = vst [vmem:[#allocation2 + $0x20] sm:$0xff] %v1217_v49 }
 0x3e7 PF: > { %p2533_p3 = scmp.ne.s32.totalorder %s3294_s20, 4 }
 0x3e9   : > { %1231 = sbr.rel (%p2533_p3) target bundleno = 1241 (0x4d9), region = 52 }
 0x3ee   : > { %v3202_v50 = vld [vmem:[%s3384_s9 + $0x38] sm:$0xff]   ;;  %v3203_v51 = vld [vmem:[%s3384_s9 + $0x30] sm:$0xff]   ;;  %v3204_v52 = vld [vmem:[%s3384_s9 + $0x28] sm:$0xff]  }
 0x3ef   : > { %2854 = vmatprep.subr.bf16.mxu0 %v3202_v50  ;;  %3038 = vmatprep.subr.bf16.mxu1 %v3202_v50  ;;  %v3205_v54 = vld [vmem:[%s3384_s9 + $0x20] sm:$0xff]   ;;  %v3206_v57 = vld [vmem:[%s3384_s9 + $0x18] sm:$0xff]   ;;  %v3207_v58 = vld [vmem:[%s3384_s9 + $0x10] sm:$0xff]  }
 0x3f0   : > { %2855 = vmatpush3.bf16.msra.mxu0 %v3202_v50  ;;  %3046 = vmatpush3.bf16.msra.mxu1 %v3202_v50  ;;  %v3210_v55 = vld [vmem:[%s3389_s16] ss:$8 sps:$4 sm:$0xff]   ;;  %v3212_v61 = vld [vmem:[%s3389_s16 + $0x10] ss:$8 sps:$4 sm:$0xff]  }
 0x3f1   : > { %2856 = vmatprep.subr.bf16.mxu0 %v3203_v51  ;;  %3039 = vmatprep.subr.bf16.mxu1 %v3203_v51  ;;  %v3211_v56 = vld [vmem:[%s3389_s16 + $0x20] ss:$8 sps:$4 sm:$0xff]   ;;  %v3213_v62 = vld [vmem:[%s3389_s16 + $0x30] ss:$8 sps:$4 sm:$0xff]  }
 0x3f2   : > { %2870 = vmatprep.mubr.bf16.mxu0 %v3210_v55  ;;  %2874 = vmatprep.mubr.bf16.mxu1 %v3211_v56  ;;  %v3208_v59 = vld [vmem:[%s3384_s9 + $0x8] sm:$0xff]   ;;  %v3209_v60 = vld [vmem:[%s3384_s9] sm:$0xff]   ;;  %v1242_v63 = vld [vmem:[#allocation2 + $0x18] sm:$0xff] }
 0x3f3   : > { %v1246_v0 = vld [vmem:[#allocation2 + $0x28] sm:$0xff]  ;;  %v1240_v3 = vld [vmem:[#allocation2 + $0x30] sm:$0xff]  ;;  %v1247_v9 = vld [vmem:[#allocation2 + $0x38] sm:$0xff] }
 0x3f4   : > { %2857 = vmatpush3.bf16.msra.mxu0 %v3203_v51  ;;  %3047 = vmatpush3.bf16.msra.mxu1 %v3203_v51  ;;  %v1244_v4 = vld [vmem:[#allocation2 + $0x8] sm:$0xff]  ;;  %v1243_v8 = vld [vmem:[#allocation2 + $0x10] sm:$0xff]  ;;  %v1241_v14 = vld [vmem:[#allocation2] sm:$0xff] }
 0x3f5   : > { %2858 = vmatprep.subr.bf16.mxu0 %v3204_v52  ;;  %3040 = vmatprep.subr.bf16.mxu1 %v3204_v52  ;;  %v1245_v15 = vld [vmem:[#allocation2 + $0x20] sm:$0xff] }
 0x3f8   : > { %2859 = vmatpush3.bf16.msra.mxu0 %v3204_v52  ;;  %3048 = vmatpush3.bf16.msra.mxu1 %v3204_v52 }
 0x3f9   : > { %2860 = vmatprep.subr.bf16.mxu0 %v3205_v54  ;;  %3041 = vmatprep.subr.bf16.mxu1 %v3205_v54 }
 0x3fc   : > { %2861 = vmatpush3.bf16.msra.mxu0 %v3205_v54  ;;  %3049 = vmatpush3.bf16.msra.mxu1 %v3205_v54 }
 0x3fd   : > { %2862 = vmatprep.subr.bf16.mxu0 %v3206_v57  ;;  %3042 = vmatprep.subr.bf16.mxu1 %v3206_v57 }
 0x400   : > { %2863 = vmatpush3.bf16.msra.mxu0 %v3206_v57  ;;  %3050 = vmatpush3.bf16.msra.mxu1 %v3206_v57 }
 0x401   : > { %2864 = vmatprep.subr.bf16.mxu0 %v3207_v58  ;;  %3043 = vmatprep.subr.bf16.mxu1 %v3207_v58 }
 0x404   : > { %2865 = vmatpush3.bf16.msra.mxu0 %v3207_v58  ;;  %3051 = vmatpush3.bf16.msra.mxu1 %v3207_v58 }
 0x405   : > { %2866 = vmatprep.subr.bf16.mxu0 %v3208_v59  ;;  %3044 = vmatprep.subr.bf16.mxu1 %v3208_v59 }
 0x408   : > { %2867 = vmatpush3.bf16.msra.mxu0 %v3208_v59  ;;  %3052 = vmatpush3.bf16.msra.mxu1 %v3208_v59 }
 0x409   : > { %2868 = vmatprep.subr.bf16.mxu0 %v3209_v60  ;;  %3045 = vmatprep.subr.bf16.mxu1 %v3209_v60 }
 0x40c   : > { %2869 = vmatpush3.bf16.msra.mxu0 %v3209_v60  ;;  %3053 = vmatpush3.bf16.msra.mxu1 %v3209_v60 }
 0x40f   : > { %2871 = vmatmul.mubr.bf16.vlgmr.msra.gmra.mxu0 %v3212_v61  ;;  %2875 = vmatmul.mubr.bf16.vlgmr.msra.gmra.mxu1 %v3213_v62 }
 0x4cf   : > { %v2872_v1 = vpop.f32.mrf.mxu0  ;;  %v2876_v2 = vpop.f32.mrf.mxu1 }
 0x4d0   : > { %v1403_v5 = vadd.f32 %v2872_v1, %v1242_v63  ;;  %v1407_v6 = vadd.f32 %v2876_v2, %v1246_v0 }
 0x4d1   : > { %v1370_v7 = vpop.f32.mrf.mxu0  ;;  %v1386_v53 = vpop.f32.mrf.mxu1 }
 0x4d2   : > { %1411 = vst [vmem:[#allocation2 + $0x18] sm:$0xff] %v1403_v5  ;;  %1415 = vst [vmem:[#allocation2 + $0x28] sm:$0xff] %v1407_v6  ;;  %v1401_v10 = vadd.f32 %v1370_v7, %v1240_v3  ;;  %v1405_v11 = vadd.f32 %v1386_v53, %v1244_v4 }
 0x4d3   : > { %v2873_v12 = vpop.f32.mrf.mxu0  ;;  %v2877_v13 = vpop.f32.mrf.mxu1 }
 0x4d4   : > { %1409 = vst [vmem:[#allocation2 + $0x30] sm:$0xff] %v1401_v10  ;;  %1413 = vst [vmem:[#allocation2 + $0x8] sm:$0xff] %v1405_v11  ;;  %v1404_v16 = vadd.f32 %v2873_v12, %v1243_v8  ;;  %v1408_v17 = vadd.f32 %v2877_v13, %v1247_v9 }
 0x4d5   : > { %v1373_v18 = vpop.f32.mrf.mxu0  ;;  %v1389_v19 = vpop.f32.mrf.mxu1 }
 0x4d6   : > { %1412 = vst [vmem:[#allocation2 + $0x10] sm:$0xff] %v1404_v16  ;;  %1416 = vst [vmem:[#allocation2 + $0x38] sm:$0xff] %v1408_v17  ;;  %v1402_v20 = vadd.f32 %v1373_v18, %v1241_v14  ;;  %v1406_v21 = vadd.f32 %v1389_v19, %v1245_v15 }
 0x4d8   : > { %1410 = vst [vmem:[#allocation2] sm:$0xff] %v1402_v20  ;;  %1414 = vst [vmem:[#allocation2 + $0x20] sm:$0xff] %v1406_v21 }
 0x4d9 PF: > { %p2546_p4 = scmp.ne.s32.totalorder %s3294_s20, 5 }
 0x4db   : > { %1420 = sbr.rel (%p2546_p4) target bundleno = 1483 (0x5cb), region = 56 }
 0x4e0   : > { %v3214_v23 = vld [vmem:[%s3384_s9 + $0x38] sm:$0xff]   ;;  %v3215_v24 = vld [vmem:[%s3384_s9 + $0x30] sm:$0xff]   ;;  %v3216_v25 = vld [vmem:[%s3384_s9 + $0x28] sm:$0xff]  }
 0x4e1   : > { %2878 = vmatprep.subr.bf16.mxu0 %v3214_v23  ;;  %3054 = vmatprep.subr.bf16.mxu1 %v3214_v23  ;;  %v3217_v26 = vld [vmem:[%s3384_s9 + $0x20] sm:$0xff]   ;;  %v3222_v27 = vld [vmem:[%s3389_s16 + $0x8] ss:$8 sps:$4 sm:$0xff]   ;;  %v3218_v29 = vld [vmem:[%s3384_s9 + $0x18] sm:$0xff]  }
 0x4e2   : > { %2879 = vmatpush3.bf16.msra.mxu0 %v3214_v23  ;;  %3062 = vmatpush3.bf16.msra.mxu1 %v3214_v23  ;;  %v3223_v28 = vld [vmem:[%s3389_s16 + $0x28] ss:$8 sps:$4 sm:$0xff]   ;;  %v3221_v32 = vld [vmem:[%s3384_s9] sm:$0xff]   ;;  %v1432_v35 = vld [vmem:[#allocation2 + $0x18] sm:$0xff] }
 0x4e3   : > { %2880 = vmatprep.subr.bf16.mxu0 %v3215_v24  ;;  %3055 = vmatprep.subr.bf16.mxu1 %v3215_v24  ;;  %v3219_v30 = vld [vmem:[%s3384_s9 + $0x10] sm:$0xff]   ;;  %v3220_v31 = vld [vmem:[%s3384_s9 + $0x8] sm:$0xff]   ;;  %v3224_v33 = vld [vmem:[%s3389_s16 + $0x18] ss:$8 sps:$4 sm:$0xff]  }
 0x4e4   : > { %2894 = vmatprep.mubr.bf16.mxu0 %v3222_v27  ;;  %2898 = vmatprep.mubr.bf16.mxu1 %v3223_v28  ;;  %v3225_v34 = vld [vmem:[%s3389_s16 + $0x38] ss:$8 sps:$4 sm:$0xff]   ;;  %v1436_v36 = vld [vmem:[#allocation2 + $0x28] sm:$0xff]  ;;  %v1430_v39 = vld [vmem:[#allocation2 + $0x30] sm:$0xff] }
 0x4e5   : > { %v1434_v40 = vld [vmem:[#allocation2 + $0x8] sm:$0xff]  ;;  %v1433_v44 = vld [vmem:[#allocation2 + $0x10] sm:$0xff]  ;;  %v1437_v45 = vld [vmem:[#allocation2 + $0x38] sm:$0xff] }
 0x4e6   : > { %2881 = vmatpush3.bf16.msra.mxu0 %v3215_v24  ;;  %3063 = vmatpush3.bf16.msra.mxu1 %v3215_v24  ;;  %v1431_v50 = vld [vmem:[#allocation2] sm:$0xff] }
 0x4e7   : > { %2882 = vmatprep.subr.bf16.mxu0 %v3216_v25  ;;  %3056 = vmatprep.subr.bf16.mxu1 %v3216_v25  ;;  %v1435_v51 = vld [vmem:[#allocation2 + $0x20] sm:$0xff] }
 0x4ea   : > { %2883 = vmatpush3.bf16.msra.mxu0 %v3216_v25  ;;  %3064 = vmatpush3.bf16.msra.mxu1 %v3216_v25 }
 0x4eb   : > { %2884 = vmatprep.subr.bf16.mxu0 %v3217_v26  ;;  %3057 = vmatprep.subr.bf16.mxu1 %v3217_v26 }
 0x4ee   : > { %2885 = vmatpush3.bf16.msra.mxu0 %v3217_v26  ;;  %3065 = vmatpush3.bf16.msra.mxu1 %v3217_v26 }
 0x4ef   : > { %2886 = vmatprep.subr.bf16.mxu0 %v3218_v29  ;;  %3058 = vmatprep.subr.bf16.mxu1 %v3218_v29 }
 0x4f2   : > { %2887 = vmatpush3.bf16.msra.mxu0 %v3218_v29  ;;  %3066 = vmatpush3.bf16.msra.mxu1 %v3218_v29 }
 0x4f3   : > { %2888 = vmatprep.subr.bf16.mxu0 %v3219_v30  ;;  %3059 = vmatprep.subr.bf16.mxu1 %v3219_v30 }
 0x4f6   : > { %2889 = vmatpush3.bf16.msra.mxu0 %v3219_v30  ;;  %3067 = vmatpush3.bf16.msra.mxu1 %v3219_v30 }
 0x4f7   : > { %2890 = vmatprep.subr.bf16.mxu0 %v3220_v31  ;;  %3060 = vmatprep.subr.bf16.mxu1 %v3220_v31 }
 0x4fa   : > { %2891 = vmatpush3.bf16.msra.mxu0 %v3220_v31  ;;  %3068 = vmatpush3.bf16.msra.mxu1 %v3220_v31 }
 0x4fb   : > { %2892 = vmatprep.subr.bf16.mxu0 %v3221_v32  ;;  %3061 = vmatprep.subr.bf16.mxu1 %v3221_v32 }
 0x4fe   : > { %2893 = vmatpush3.bf16.msra.mxu0 %v3221_v32  ;;  %3069 = vmatpush3.bf16.msra.mxu1 %v3221_v32 }
 0x501   : > { %2895 = vmatmul.mubr.bf16.vlgmr.msra.gmra.mxu0 %v3224_v33  ;;  %2899 = vmatmul.mubr.bf16.vlgmr.msra.gmra.mxu1 %v3225_v34 }
 0x5c1   : > { %v2896_v37 = vpop.f32.mrf.mxu0  ;;  %v2900_v38 = vpop.f32.mrf.mxu1 }
 0x5c2   : > { %v1593_v22 = vadd.f32 %v2896_v37, %v1432_v35  ;;  %v1597_v41 = vadd.f32 %v2900_v38, %v1436_v36 }
 0x5c3   : > { %v1560_v42 = vpop.f32.mrf.mxu0  ;;  %v1576_v43 = vpop.f32.mrf.mxu1 }
 0x5c4   : > { %1601 = vst [vmem:[#allocation2 + $0x18] sm:$0xff] %v1593_v22  ;;  %1605 = vst [vmem:[#allocation2 + $0x28] sm:$0xff] %v1597_v41  ;;  %v1591_v46 = vadd.f32 %v1560_v42, %v1430_v39  ;;  %v1595_v47 = vadd.f32 %v1576_v43, %v1434_v40 }
 0x5c5   : > { %v2897_v48 = vpop.f32.mrf.mxu0  ;;  %v2901_v49 = vpop.f32.mrf.mxu1 }
 0x5c6   : > { %1599 = vst [vmem:[#allocation2 + $0x30] sm:$0xff] %v1591_v46  ;;  %1603 = vst [vmem:[#allocation2 + $0x8] sm:$0xff] %v1595_v47  ;;  %v1594_v52 = vadd.f32 %v2897_v48, %v1433_v44  ;;  %v1598_v54 = vadd.f32 %v2901_v49, %v1437_v45 }
 0x5c7   : > { %v1563_v55 = vpop.f32.mrf.mxu0  ;;  %v1579_v56 = vpop.f32.mrf.mxu1 }
 0x5c8   : > { %1602 = vst [vmem:[#allocation2 + $0x10] sm:$0xff] %v1594_v52  ;;  %1606 = vst [vmem:[#allocation2 + $0x38] sm:$0xff] %v1598_v54  ;;  %v1592_v57 = vadd.f32 %v1563_v55, %v1431_v50  ;;  %v1596_v58 = vadd.f32 %v1579_v56, %v1435_v51 }
 0x5ca   : > { %1600 = vst [vmem:[#allocation2] sm:$0xff] %v1592_v57  ;;  %1604 = vst [vmem:[#allocation2 + $0x20] sm:$0xff] %v1596_v58 }
 0x5cb PF: > { %p2567_p5 = scmp.ne.s32.totalorder %s3294_s20, 6 }
 0x5cd   : > { %1610 = sbr.rel (%p2567_p5) target bundleno = 1725 (0x6bd), region = 60 }
 0x5d2   : > { %v3226_v59 = vld [vmem:[%s3384_s9 + $0x38] sm:$0xff]   ;;  %v3227_v60 = vld [vmem:[%s3384_s9 + $0x30] sm:$0xff]   ;;  %v3228_v61 = vld [vmem:[%s3384_s9 + $0x28] sm:$0xff]  }
 0x5d3   : > { %2902 = vmatprep.subr.bf16.mxu0 %v3226_v59  ;;  %3070 = vmatprep.subr.bf16.mxu1 %v3226_v59  ;;  %v3229_v62 = vld [vmem:[%s3384_s9 + $0x20] sm:$0xff]   ;;  %v3230_v1 = vld [vmem:[%s3384_s9 + $0x18] sm:$0xff]   ;;  %v3231_v2 = vld [vmem:[%s3384_s9 + $0x10] sm:$0xff]  }
 0x5d4   : > { %2903 = vmatpush3.bf16.msra.mxu0 %v3226_v59  ;;  %3078 = vmatpush3.bf16.msra.mxu1 %v3226_v59  ;;  %v3234_v63 = vld [vmem:[%s3389_s16] ss:$8 sps:$4 sm:$0xff]   ;;  %v3236_v5 = vld [vmem:[%s3389_s16 + $0x10] ss:$8 sps:$4 sm:$0xff]  }
 0x5d5   : > { %2904 = vmatprep.subr.bf16.mxu0 %v3227_v60  ;;  %3071 = vmatprep.subr.bf16.mxu1 %v3227_v60  ;;  %v3235_v0 = vld [vmem:[%s3389_s16 + $0x20] ss:$8 sps:$4 sm:$0xff]   ;;  %v3237_v6 = vld [vmem:[%s3389_s16 + $0x30] ss:$8 sps:$4 sm:$0xff]  }
 0x5d6   : > { %2918 = vmatprep.mubr.bf16.mxu0 %v3234_v63  ;;  %2922 = vmatprep.mubr.bf16.mxu1 %v3235_v0  ;;  %v3232_v3 = vld [vmem:[%s3384_s9 + $0x8] sm:$0xff]   ;;  %v3233_v4 = vld [vmem:[%s3384_s9] sm:$0xff]   ;;  %v1621_v7 = vld [vmem:[#allocation2 + $0x18] sm:$0xff] }
 0x5d7   : > { %v1625_v53 = vld [vmem:[#allocation2 + $0x28] sm:$0xff]  ;;  %v1619_v10 = vld [vmem:[#allocation2 + $0x30] sm:$0xff]  ;;  %v1626_v17 = vld [vmem:[#allocation2 + $0x38] sm:$0xff] }
 0x5d8   : > { %2905 = vmatpush3.bf16.msra.mxu0 %v3227_v60  ;;  %3079 = vmatpush3.bf16.msra.mxu1 %v3227_v60  ;;  %v1623_v11 = vld [vmem:[#allocation2 + $0x8] sm:$0xff]  ;;  %v1622_v16 = vld [vmem:[#allocation2 + $0x10] sm:$0xff]  ;;  %v1620_v23 = vld [vmem:[#allocation2] sm:$0xff] }
 0x5d9   : > { %2906 = vmatprep.subr.bf16.mxu0 %v3228_v61  ;;  %3072 = vmatprep.subr.bf16.mxu1 %v3228_v61  ;;  %v1624_v24 = vld [vmem:[#allocation2 + $0x20] sm:$0xff] }
 0x5dc   : > { %2907 = vmatpush3.bf16.msra.mxu0 %v3228_v61  ;;  %3080 = vmatpush3.bf16.msra.mxu1 %v3228_v61 }
 0x5dd   : > { %2908 = vmatprep.subr.bf16.mxu0 %v3229_v62  ;;  %3073 = vmatprep.subr.bf16.mxu1 %v3229_v62 }
 0x5e0   : > { %2909 = vmatpush3.bf16.msra.mxu0 %v3229_v62  ;;  %3081 = vmatpush3.bf16.msra.mxu1 %v3229_v62 }
 0x5e1   : > { %2910 = vmatprep.subr.bf16.mxu0 %v3230_v1  ;;  %3074 = vmatprep.subr.bf16.mxu1 %v3230_v1 }
 0x5e4   : > { %2911 = vmatpush3.bf16.msra.mxu0 %v3230_v1  ;;  %3082 = vmatpush3.bf16.msra.mxu1 %v3230_v1 }
 0x5e5   : > { %2912 = vmatprep.subr.bf16.mxu0 %v3231_v2  ;;  %3075 = vmatprep.subr.bf16.mxu1 %v3231_v2 }
 0x5e8   : > { %2913 = vmatpush3.bf16.msra.mxu0 %v3231_v2  ;;  %3083 = vmatpush3.bf16.msra.mxu1 %v3231_v2 }
 0x5e9   : > { %2914 = vmatprep.subr.bf16.mxu0 %v3232_v3  ;;  %3076 = vmatprep.subr.bf16.mxu1 %v3232_v3 }
 0x5ec   : > { %2915 = vmatpush3.bf16.msra.mxu0 %v3232_v3  ;;  %3084 = vmatpush3.bf16.msra.mxu1 %v3232_v3 }
 0x5ed   : > { %2916 = vmatprep.subr.bf16.mxu0 %v3233_v4  ;;  %3077 = vmatprep.subr.bf16.mxu1 %v3233_v4 }
 0x5f0   : > { %2917 = vmatpush3.bf16.msra.mxu0 %v3233_v4  ;;  %3085 = vmatpush3.bf16.msra.mxu1 %v3233_v4 }
 0x5f3   : > { %2919 = vmatmul.mubr.bf16.vlgmr.msra.gmra.mxu0 %v3236_v5  ;;  %2923 = vmatmul.mubr.bf16.vlgmr.msra.gmra.mxu1 %v3237_v6 }
 0x6b3   : > { %v2920_v8 = vpop.f32.mrf.mxu0  ;;  %v2924_v9 = vpop.f32.mrf.mxu1 }
 0x6b4   : > { %v1782_v12 = vadd.f32 %v2920_v8, %v1621_v7  ;;  %v1786_v13 = vadd.f32 %v2924_v9, %v1625_v53 }
 0x6b5   : > { %v1749_v14 = vpop.f32.mrf.mxu0  ;;  %v1765_v15 = vpop.f32.mrf.mxu1 }
 0x6b6   : > { %1790 = vst [vmem:[#allocation2 + $0x18] sm:$0xff] %v1782_v12  ;;  %1794 = vst [vmem:[#allocation2 + $0x28] sm:$0xff] %v1786_v13  ;;  %v1780_v18 = vadd.f32 %v1749_v14, %v1619_v10  ;;  %v1784_v19 = vadd.f32 %v1765_v15, %v1623_v11 }
 0x6b7   : > { %v2921_v20 = vpop.f32.mrf.mxu0  ;;  %v2925_v21 = vpop.f32.mrf.mxu1 }
 0x6b8   : > { %1788 = vst [vmem:[#allocation2 + $0x30] sm:$0xff] %v1780_v18  ;;  %1792 = vst [vmem:[#allocation2 + $0x8] sm:$0xff] %v1784_v19  ;;  %v1783_v25 = vadd.f32 %v2921_v20, %v1622_v16  ;;  %v1787_v26 = vadd.f32 %v2925_v21, %v1626_v17 }
 0x6b9   : > { %v1752_v27 = vpop.f32.mrf.mxu0  ;;  %v1768_v28 = vpop.f32.mrf.mxu1 }
 0x6ba   : > { %1791 = vst [vmem:[#allocation2 + $0x10] sm:$0xff] %v1783_v25  ;;  %1795 = vst [vmem:[#allocation2 + $0x38] sm:$0xff] %v1787_v26  ;;  %v1781_v29 = vadd.f32 %v1752_v27, %v1620_v23  ;;  %v1785_v30 = vadd.f32 %v1768_v28, %v1624_v24 }
 0x6bc   : > { %1789 = vst [vmem:[#allocation2] sm:$0xff] %v1781_v29  ;;  %1793 = vst [vmem:[#allocation2 + $0x20] sm:$0xff] %v1785_v30 }
 0x6bd PF: > { %p2580_p6 = scmp.ne.s32.totalorder %s3294_s20, 7 }
 0x6bf   : > { %1799 = sbr.rel (%p2580_p6) target bundleno = 1967 (0x7af), region = 64 }
 0x6c4   : > { %v3238_v31 = vld [vmem:[%s3384_s9 + $0x38] sm:$0xff]   ;;  %v3239_v32 = vld [vmem:[%s3384_s9 + $0x30] sm:$0xff]   ;;  %v3240_v33 = vld [vmem:[%s3384_s9 + $0x28] sm:$0xff]   ;;  %vm1824_vm6 = vsmask.f32 3328 }
 0x6c5   : > { %2926 = vmatprep.subr.bf16.mxu0 %v3238_v31  ;;  %3086 = vmatprep.subr.bf16.mxu1 %v3238_v31  ;;  %v3241_v34 = vld [vmem:[%s3384_s9 + $0x20] sm:$0xff]   ;;  %v1802_v37 = vld [vmem:[%s3389_s16 + $0x8] sm:$0xf]  ;;  %v1803_v38 = vld [vmem:[%s3389_s16 + $0xc] sm:$0x1] }
 0x6c6   : > { %2927 = vmatpush3.bf16.msra.mxu0 %v3238_v31  ;;  %3094 = vmatpush3.bf16.msra.mxu1 %v3238_v31  ;;  %v1800_v35 = vld [vmem:[%s3389_s16] sm:$0xf]  ;;  %v1801_v36 = vld [vmem:[%s3389_s16 + $0x4] sm:$0x1]  ;;  %vm1825_vm7 = vsmask.f32 7440 }
 0x6c7   : > { %2928 = vmatprep.subr.bf16.mxu0 %v3239_v32  ;;  %3087 = vmatprep.subr.bf16.mxu1 %v3239_v32  ;;  %v3242_v39 = vld [vmem:[%s3384_s9 + $0x18] sm:$0xff]   ;;  %v1828_v40 = vshrl.u32 %v1800_v35, 16  ;;  %v1831_v22 = vshll.u32 %v1800_v35, 16  ;;  %v1837_v41 = vshll.u32 %v1801_v36, 16  ;;  %v1842_v42 = vshrl.u32 %v1802_v37, 16  ;;  %v3243_v63 = vld [vmem:[%s3384_s9 + $0x10] sm:$0xff]   ;;  %vm3568_vm8 = vmor %vm1824_vm6, %vm1825_vm7 }
 0x6c8   : > { %v1808_v43 = vld [vmem:[%s3389_s16 + $0x20] sm:$0xf]  ;;  %v1845_v44 = vshll.u32 %v1802_v37, 16  ;;  %v1851_v45 = vshll.u32 %v1803_v38, 16  ;;  %v1809_v46 = vld [vmem:[%s3389_s16 + $0x24] sm:$0x1] }
 0x6c9   : > { %v1810_v47 = vld [vmem:[%s3389_s16 + $0x28] sm:$0xf]  ;;  %v1830_v48 = vrot.slane %v1828_v40, 4  ;;  %v1833_v49 = vrot.slane %v1831_v22, 5  ;;  %v1839_v50 = vrot.slane %v1837_v41, 5  ;;  %v1844_v51 = vrot.slane %v1842_v42, 4 }
 0x6ca   : > { %2929 = vmatpush3.bf16.msra.mxu0 %v3239_v32  ;;  %3095 = vmatpush3.bf16.msra.mxu1 %v3239_v32  ;;  %v1811_v52 = vld [vmem:[%s3389_s16 + $0x2c] sm:$0x1]  ;;  %v1847_v54 = vrot.slane %v1845_v44, 5  ;;  %v1853_v55 = vrot.slane %v1851_v45, 5  ;;  %v1884_v56 = vshrl.u32 %v1808_v43, 16  ;;  %v1887_v57 = vshll.u32 %v1808_v43, 16 }
 0x6cb   : > { %2930 = vmatprep.subr.bf16.mxu0 %v3240_v33  ;;  %3088 = vmatprep.subr.bf16.mxu1 %v3240_v33  ;;  %v1834_v58 = vor.u32 %v1833_v49, %v1830_v48  ;;  %v1893_v59 = vshll.u32 %v1809_v46, 16  ;;  %v1898_v60 = vshrl.u32 %v1810_v47, 16  ;;  %v1901_v61 = vshll.u32 %v1810_v47, 16  ;;  %v1804_v62 = vld [vmem:[%s3389_s16 + $0x10] sm:$0xf]  ;;  %v3244_v25 = vld [vmem:[%s3384_s9 + $0x8] sm:$0xff]  }
 0x6cc   : > { %v1848_v1 = vor.u32 %v1847_v54, %v1844_v51  ;;  %v1886_v2 = vrot.slane %v1884_v56, 4  ;;  %v1889_v3 = vrot.slane %v1887_v57, 5  ;;  %v1907_v4 = vshll.u32 %v1811_v52, 16  ;;  %v1805_v5 = vld [vmem:[%s3389_s16 + $0x14] sm:$0x1]  ;;  %v3245_v43 = vld [vmem:[%s3384_s9] sm:$0xff]  }
 0x6cd   : > { %v1835_v6 = vrot.slane %v1834_v58, 4  ;;  %v1895_v7 = vrot.slane %v1893_v59, 5  ;;  %v1900_v53 = vrot.slane %v1898_v60, 4  ;;  %v1903_v8 = vrot.slane %v1901_v61, 5  ;;  %v1806_v9 = vld [vmem:[%s3389_s16 + $0x18] sm:$0xf] }
 0x6ce   : > { %2931 = vmatpush3.bf16.msra.mxu0 %v3240_v33  ;;  %3096 = vmatpush3.bf16.msra.mxu1 %v3240_v33  ;;  %v1849_v10 = vrot.slane %v1848_v1, 4  ;;  %v1890_v11 = vor.u32 %v1889_v3, %v1886_v2  ;;  %v1909_v12 = vrot.slane %v1907_v4, 5  ;;  %v1856_v13 = vshrl.u32 %v1804_v62, 16  ;;  %v1807_v16 = vld [vmem:[%s3389_s16 + $0x1c] sm:$0x1]  ;;  %v1817_v0 = vld [vmem:[#allocation2] sm:$0xff] }
 0x6cf   : > { %2932 = vmatprep.subr.bf16.mxu0 %v3241_v34  ;;  %3089 = vmatprep.subr.bf16.mxu1 %v3241_v34  ;;  %v1840_v14 = vsel %vm3568_vm8, %v1835_v6, %v1839_v50  ;;  %v1904_v15 = vor.u32 %v1903_v8, %v1900_v53  ;;  %v1859_v17 = vshll.u32 %v1804_v62, 16  ;;  %v1865_v18 = vshll.u32 %v1805_v5, 16  ;;  %v1812_v24 = vld [vmem:[%s3389_s16 + $0x30] sm:$0xf]  ;;  %v1813_v29 = vld [vmem:[%s3389_s16 + $0x34] sm:$0x1] }
 0x6d0   : > { %v1854_v19 = vsel %vm3568_vm8, %v1849_v10, %v1853_v55  ;;  %v1891_v20 = vrot.slane %v1890_v11, 4  ;;  %v1858_v21 = vrot.slane %v1856_v13, 4  ;;  %v1870_v23 = vshrl.u32 %v1806_v9, 16  ;;  %v1815_v37 = vld [vmem:[%s3389_s16 + $0x3c] sm:$0x1]  ;;  %v1816_v53 = vld [vmem:[#allocation2 + $0x30] sm:$0xff] }
 0x6d1   : > { %v2581_v26 = vcombine.low %v1840_v14, %v1854_v19  ;;  %v1905_v27 = vrot.slane %v1904_v15, 4  ;;  %v1861_v28 = vrot.slane %v1859_v17, 5  ;;  %v1873_v32 = vshll.u32 %v1806_v9, 16  ;;  %v1818_v5 = vld [vmem:[#allocation2 + $0x18] sm:$0xff]  ;;  %v1820_v11 = vld [vmem:[#allocation2 + $0x8] sm:$0xff] }
 0x6d2   : > { %2933 = vmatpush3.bf16.msra.mxu0 %v3241_v34  ;;  %3097 = vmatpush3.bf16.msra.mxu1 %v3241_v34  ;;  %v1896_v30 = vsel %vm3568_vm8, %v1891_v20, %v1895_v7  ;;  %v1872_v31 = vrot.slane %v1870_v23, 4  ;;  %v1879_v33 = vshll.u32 %v1807_v16, 16  ;;  %v1814_v34 = vld [vmem:[%s3389_s16 + $0x38] sm:$0xf]  ;;  %v1912_v38 = vshrl.u32 %v1812_v24, 16  ;;  %v1822_v7 = vld [vmem:[#allocation2 + $0x28] sm:$0xff] }
 0x6d3   : > { %2934 = vmatprep.subr.bf16.mxu0 %v3242_v39  ;;  %3090 = vmatprep.subr.bf16.mxu1 %v3242_v39  ;;  %v1910_v35 = vsel %vm3568_vm8, %v1905_v27, %v1909_v12  ;;  %v1862_v36 = vor.u32 %v1861_v28, %v1858_v21  ;;  %v1867_v22 = vrot.slane %v1865_v18, 5  ;;  %v1875_v41 = vrot.slane %v1873_v32, 5  ;;  %v1819_v12 = vld [vmem:[#allocation2 + $0x10] sm:$0xff]  ;;  %v1823_v17 = vld [vmem:[#allocation2 + $0x38] sm:$0xff]  ;;  %v1821_v23 = vld [vmem:[#allocation2 + $0x20] sm:$0xff] }
 0x6d4   : > { %2942 = vmatprep.mubr.bf16.mxu0 %v2581_v26  ;;  %v2583_v40 = vcombine.low %v1896_v30, %v1910_v35  ;;  %v1921_v42 = vshll.u32 %v1813_v29, 16  ;;  %v1914_v45 = vrot.slane %v1912_v38, 4  ;;  %v1926_v47 = vshrl.u32 %v1814_v34, 16 }
 0x6d5   : > { %v1863_v44 = vrot.slane %v1862_v36, 4  ;;  %v1876_v48 = vor.u32 %v1875_v41, %v1872_v31  ;;  %v1881_v49 = vrot.slane %v1879_v33, 5  ;;  %v1929_v50 = vshll.u32 %v1814_v34, 16 }
 0x6d6   : > { %2935 = vmatpush3.bf16.msra.mxu0 %v3242_v39  ;;  %3098 = vmatpush3.bf16.msra.mxu1 %v3242_v39  ;;  %v1915_v39 = vshll.u32 %v1812_v24, 16  ;;  %v1935_v51 = vshll.u32 %v1815_v37, 16  ;;  %v1928_v54 = vrot.slane %v1926_v47, 4  ;;  %v1923_v57 = vrot.slane %v1921_v42, 5 }
 0x6d7   : > { %2936 = vmatprep.subr.bf16.mxu0 %v3243_v63  ;;  %3091 = vmatprep.subr.bf16.mxu1 %v3243_v63  ;;  %v1868_v55 = vsel %vm3568_vm8, %v1863_v44, %v1867_v22  ;;  %v1877_v56 = vrot.slane %v1876_v48, 4  ;;  %v1931_v58 = vrot.slane %v1929_v50, 5 }
 0x6d8   : > { %v1917_v46 = vrot.slane %v1915_v39, 5  ;;  %2946 = vmatprep.mubr.bf16.mxu1 %v2583_v40  ;;  %v1937_v62 = vrot.slane %v1935_v51, 5 }
 0x6d9   : > { %v1882_v60 = vsel %vm3568_vm8, %v1877_v56, %v1881_v49  ;;  %v1932_v61 = vor.u32 %v1931_v58, %v1928_v54 }
 0x6da   : > { %2937 = vmatpush3.bf16.msra.mxu0 %v3243_v63  ;;  %3099 = vmatpush3.bf16.msra.mxu1 %v3243_v63  ;;  %v1918_v52 = vor.u32 %v1917_v46, %v1914_v45  ;;  %v2582_v63 = vcombine.low %v1868_v55, %v1882_v60 }
 0x6db   : > { %2938 = vmatprep.subr.bf16.mxu0 %v3244_v25  ;;  %3092 = vmatprep.subr.bf16.mxu1 %v3244_v25  ;;  %v1933_v2 = vrot.slane %v1932_v61, 4 }
 0x6dc   : > { %v1919_v59 = vrot.slane %v1918_v52, 4 }
 0x6dd   : > { %v1938_v3 = vsel %vm3568_vm8, %v1933_v2, %v1937_v62 }
 0x6de   : > { %2939 = vmatpush3.bf16.msra.mxu0 %v3244_v25  ;;  %3100 = vmatpush3.bf16.msra.mxu1 %v3244_v25  ;;  %v1924_v1 = vsel %vm3568_vm8, %v1919_v59, %v1923_v57 }
 0x6df   : > { %2940 = vmatprep.subr.bf16.mxu0 %v3245_v43  ;;  %3093 = vmatprep.subr.bf16.mxu1 %v3245_v43  ;;  %v2584_v4 = vcombine.low %v1924_v1, %v1938_v3 }
 0x6e2   : > { %2941 = vmatpush3.bf16.msra.mxu0 %v3245_v43  ;;  %3101 = vmatpush3.bf16.msra.mxu1 %v3245_v43 }
 0x6e5   : > { %2943 = vmatmul.mubr.bf16.vlgmr.msra.gmra.mxu0 %v2582_v63  ;;  %2947 = vmatmul.mubr.bf16.vlgmr.msra.gmra.mxu1 %v2584_v4 }
 0x7a5   : > { %v2944_v6 = vpop.f32.mrf.mxu0  ;;  %v2948_v9 = vpop.f32.mrf.mxu1 }
 0x7a6   : > { %v2086_v8 = vadd.f32 %v2944_v6, %v1818_v5  ;;  %v2090_v13 = vadd.f32 %v2948_v9, %v1822_v7 }
 0x7a7   : > { %v2053_v10 = vpop.f32.mrf.mxu0  ;;  %v2069_v15 = vpop.f32.mrf.mxu1 }
 0x7a8   : > { %2094 = vst [vmem:[#allocation2 + $0x18] sm:$0xff] %v2086_v8  ;;  %v2084_v14 = vadd.f32 %v2053_v10, %v1816_v53  ;;  %2098 = vst [vmem:[#allocation2 + $0x28] sm:$0xff] %v2090_v13  ;;  %v2088_v18 = vadd.f32 %v2069_v15, %v1820_v11 }
 0x7a9   : > { %v2945_v16 = vpop.f32.mrf.mxu0  ;;  %v2949_v20 = vpop.f32.mrf.mxu1 }
 0x7aa   : > { %2092 = vst [vmem:[#allocation2 + $0x30] sm:$0xff] %v2084_v14  ;;  %v2087_v19 = vadd.f32 %v2945_v16, %v1819_v12  ;;  %2096 = vst [vmem:[#allocation2 + $0x8] sm:$0xff] %v2088_v18  ;;  %v2091_v24 = vadd.f32 %v2949_v20, %v1823_v17 }
 0x7ab   : > { %v2056_v21 = vpop.f32.mrf.mxu0  ;;  %v2072_v26 = vpop.f32.mrf.mxu1 }
 0x7ac   : > { %2095 = vst [vmem:[#allocation2 + $0x10] sm:$0xff] %v2087_v19  ;;  %v2085_v25 = vadd.f32 %v2056_v21, %v1817_v0  ;;  %2099 = vst [vmem:[#allocation2 + $0x38] sm:$0xff] %v2091_v24  ;;  %v2089_v27 = vadd.f32 %v2072_v26, %v1821_v23 }
 0x7ae   : > { %2093 = vst [vmem:[#allocation2] sm:$0xff] %v2085_v25  ;;  %2097 = vst [vmem:[#allocation2 + $0x20] sm:$0xff] %v2089_v27 }
 0x7af PF: > { %p2593_p7 = scmp.ne.s32.totalorder %s3294_s20, 8 }
 0x7b1   : > { %2103 = sbr.rel (%p2593_p7) target bundleno = 2215 (0x8a7), region = 68 }
 0x7b6   : > { %v3246_v28 = vld [vmem:[%s3384_s9 + $0x38] sm:$0xff]   ;;  %v3247_v29 = vld [vmem:[%s3384_s9 + $0x30] sm:$0xff]   ;;  %v3248_v30 = vld [vmem:[%s3384_s9 + $0x28] sm:$0xff]  }
 0x7b7   : > { %2950 = vmatprep.subr.bf16.mxu0 %v3246_v28  ;;  %3102 = vmatprep.subr.bf16.mxu1 %v3246_v28  ;;  %v3249_v31 = vld [vmem:[%s3384_s9 + $0x20] sm:$0xff]   ;;  %v3250_v34 = vld [vmem:[%s3384_s9 + $0x18] sm:$0xff]   ;;  %v3251_v35 = vld [vmem:[%s3384_s9 + $0x10] sm:$0xff]  }
 0x7b8   : > { %2951 = vmatpush3.bf16.msra.mxu0 %v3246_v28  ;;  %3110 = vmatpush3.bf16.msra.mxu1 %v3246_v28  ;;  %v3254_v32 = vld [vmem:[%s3389_s16] ss:$8 sps:$4 sm:$0xff]   ;;  %v3256_v38 = vld [vmem:[%s3389_s16 + $0x10] ss:$8 sps:$4 sm:$0xff]  }
 0x7b9   : > { %2952 = vmatprep.subr.bf16.mxu0 %v3247_v29  ;;  %3103 = vmatprep.subr.bf16.mxu1 %v3247_v29  ;;  %v3255_v33 = vld [vmem:[%s3389_s16 + $0x20] ss:$8 sps:$4 sm:$0xff]   ;;  %v3257_v39 = vld [vmem:[%s3389_s16 + $0x30] ss:$8 sps:$4 sm:$0xff]  }
 0x7ba   : > { %2966 = vmatprep.mubr.bf16.mxu0 %v3254_v32  ;;  %2970 = vmatprep.mubr.bf16.mxu1 %v3255_v33  ;;  %v3252_v36 = vld [vmem:[%s3384_s9 + $0x8] sm:$0xff]   ;;  %v3253_v37 = vld [vmem:[%s3384_s9] sm:$0xff]   ;;  %v2114_v40 = vld [vmem:[#allocation2 + $0x18] sm:$0xff] }
 0x7bb   : > { %v2118_v22 = vld [vmem:[#allocation2 + $0x28] sm:$0xff]  ;;  %v2112_v43 = vld [vmem:[#allocation2 + $0x30] sm:$0xff]  ;;  %v2606_v49 = vld [vmem:[%s3635_s3] ss:$0 sm:$0xff] }
 0x7bc   : > { %2953 = vmatpush3.bf16.msra.mxu0 %v3247_v29  ;;  %3111 = vmatpush3.bf16.msra.mxu1 %v3247_v29  ;;  %v2116_v44 = vld [vmem:[#allocation2 + $0x8] sm:$0xff]  ;;  %v2115_v52 = vld [vmem:[#allocation2 + $0x10] sm:$0xff]  ;;  %v2119_v54 = vld [vmem:[#allocation2 + $0x38] sm:$0xff] }
 0x7bd   : > { %2954 = vmatprep.subr.bf16.mxu0 %v3248_v30  ;;  %3104 = vmatprep.subr.bf16.mxu1 %v3248_v30  ;;  %v2113_v57 = vld [vmem:[#allocation2] sm:$0xff] }
 0x7be   : > { %v2117_v58 = vld [vmem:[#allocation2 + $0x20] sm:$0xff] }
 0x7c0   : > { %2955 = vmatpush3.bf16.msra.mxu0 %v3248_v30  ;;  %3112 = vmatpush3.bf16.msra.mxu1 %v3248_v30 }
 0x7c1   : > { %2956 = vmatprep.subr.bf16.mxu0 %v3249_v31  ;;  %3105 = vmatprep.subr.bf16.mxu1 %v3249_v31 }
 0x7c4   : > { %2957 = vmatpush3.bf16.msra.mxu0 %v3249_v31  ;;  %3113 = vmatpush3.bf16.msra.mxu1 %v3249_v31 }
 0x7c5   : > { %2958 = vmatprep.subr.bf16.mxu0 %v3250_v34  ;;  %3106 = vmatprep.subr.bf16.mxu1 %v3250_v34 }
 0x7c8   : > { %2959 = vmatpush3.bf16.msra.mxu0 %v3250_v34  ;;  %3114 = vmatpush3.bf16.msra.mxu1 %v3250_v34 }
 0x7c9   : > { %2960 = vmatprep.subr.bf16.mxu0 %v3251_v35  ;;  %3107 = vmatprep.subr.bf16.mxu1 %v3251_v35 }
 0x7cc   : > { %2961 = vmatpush3.bf16.msra.mxu0 %v3251_v35  ;;  %3115 = vmatpush3.bf16.msra.mxu1 %v3251_v35 }
 0x7cd   : > { %2962 = vmatprep.subr.bf16.mxu0 %v3252_v36  ;;  %3108 = vmatprep.subr.bf16.mxu1 %v3252_v36 }
 0x7d0   : > { %2963 = vmatpush3.bf16.msra.mxu0 %v3252_v36  ;;  %3116 = vmatpush3.bf16.msra.mxu1 %v3252_v36 }
 0x7d1   : > { %2964 = vmatprep.subr.bf16.mxu0 %v3253_v37  ;;  %3109 = vmatprep.subr.bf16.mxu1 %v3253_v37 }
 0x7d4   : > { %2965 = vmatpush3.bf16.msra.mxu0 %v3253_v37  ;;  %3117 = vmatpush3.bf16.msra.mxu1 %v3253_v37 }
 0x7d7   : > { %2967 = vmatmul.mubr.bf16.vlgmr.msra.gmra.mxu0 %v3256_v38  ;;  %2971 = vmatmul.mubr.bf16.vlgmr.msra.gmra.mxu1 %v3257_v39 }
 0x897   : > { %v2968_v41 = vpop.f32.mrf.mxu0  ;;  %v2972_v42 = vpop.f32.mrf.mxu1 }
 0x898   : > { %v2275_v45 = vadd.f32 %v2968_v41, %v2114_v40  ;;  %v2279_v46 = vadd.f32 %v2972_v42, %v2118_v22 }
 0x899   : > { %v2242_v47 = vpop.f32.mrf.mxu0  ;;  %v2258_v48 = vpop.f32.mrf.mxu1 }
 0x89a   : > { %2283 = vst [vmem:[#allocation2 + $0x18] sm:$0xff] %v2275_v45  ;;  %2287 = vst [vmem:[#allocation2 + $0x28] sm:$0xff] %v2279_v46  ;;  %v2273_v50 = vadd.f32 %v2242_v47, %v2112_v43  ;;  %v2277_v51 = vadd.f32 %v2258_v48, %v2116_v44  ;;  %v2306_v59 = vadd.f32 %v2606_v49, %v2275_v45 }
 0x89b   : > { %v2969_v55 = vpop.f32.mrf.mxu0  ;;  %v2973_v56 = vpop.f32.mrf.mxu1  ;;  %v2310_v60 = vadd.f32 %v2606_v49, %v2279_v46 }
 0x89c   : > { %2281 = vst [vmem:[#allocation2 + $0x30] sm:$0xff] %v2273_v50  ;;  %2285 = vst [vmem:[#allocation2 + $0x8] sm:$0xff] %v2277_v51  ;;  %v2276_v61 = vadd.f32 %v2969_v55, %v2115_v52  ;;  %v2280_v62 = vadd.f32 %v2973_v56, %v2119_v54  ;;  %v2304_v2 = vadd.f32 %v2606_v49, %v2273_v50  ;;  %v2314_v9 = vmax.f32 %v2306_v59, 0.0 }
 0x89d   : > { %v2245_v63 = vpop.f32.mrf.mxu0  ;;  %v2261_v1 = vpop.f32.mrf.mxu1  ;;  %v2308_v3 = vadd.f32 %v2606_v49, %v2277_v51  ;;  %v2318_v10 = vmax.f32 %v2310_v60, 0.0 }
 0x89e   : > { %v2274_v4 = vadd.f32 %v2245_v63, %v2113_v57  ;;  %v2278_v5 = vadd.f32 %v2261_v1, %v2117_v58  ;;  %2284 = vst [vmem:[#allocation2 + $0x10] sm:$0xff] %v2276_v61  ;;  %v2307_v6 = vadd.f32 %v2606_v49, %v2276_v61  ;;  %2288 = vst [vmem:[#allocation2 + $0x38] sm:$0xff] %v2280_v62  ;;  %v2312_v13 = vmax.f32 %v2304_v2, 0.0 }
 0x89f   : > { %v2311_v7 = vadd.f32 %v2606_v49, %v2280_v62  ;;  %v2316_v14 = vmax.f32 %v2308_v3, 0.0 }
 0x8a0   : > { %2282 = vst [vmem:[#allocation2] sm:$0xff] %v2274_v4  ;;  %v2305_v53 = vadd.f32 %v2606_v49, %v2274_v4  ;;  %2286 = vst [vmem:[#allocation2 + $0x20] sm:$0xff] %v2278_v5  ;;  %v2309_v8 = vadd.f32 %v2606_v49, %v2278_v5  ;;  %v2315_v11 = vmax.f32 %v2307_v6, 0.0 }
 0x8a1   : > { %v2319_v12 = vmax.f32 %v2311_v7, 0.0 }
 0x8a2   : > { %v2313_v15 = vmax.f32 %v2305_v53, 0.0  ;;  %v2317_v16 = vmax.f32 %v2309_v8, 0.0  ;;  %v2635_v17 = vpack.c.bf16 %v2315_v11, %v2314_v9 }
 0x8a3   : > { %v2645_v0 = vpack.c.bf16 %v2319_v12, %v2318_v10 }
 0x8a4   : > { %v2630_v18 = vpack.c.bf16 %v2313_v15, %v2312_v13  ;;  %v2640_v19 = vpack.c.bf16 %v2317_v16, %v2316_v14  ;;  %2647 = vst [vmem:[%s3379_s6 + $0x8] sm:$0xff] %v2635_v17  }
 0x8a5   : > { %2649 = vst [vmem:[%s3379_s6 + $0x18] sm:$0xff] %v2645_v0  }
 0x8a6   : > { %2631 = vst [vmem:[%s3379_s6] sm:$0xff] %v2630_v18   ;;  %2648 = vst [vmem:[%s3379_s6 + $0x10] sm:$0xff] %v2640_v19  }
 0x8a7 PF: > { %s20_s23 = sadd.s32 1, %s3310_s23   ;;  %s3643_s20 = smov %s3302_s22 }
 0x8a8   : > { %p17_p8 = scmp.ge.s32.totalorder %s20_s23, 20   ;;  %s3644_s21 = smov %s3306_s0 }
 0x8a9   : > { %s3645_s22 = smov %s3648_s24  ;;  %s3646_s0 = smov %s3652_s25 }
 0x8aa   :  { %19 = sbr.rel (!%p17_p8) target bundleno = 18 (0x12), region = 104 }

// kernel: bottleneck_forward.5
= control target key start
LH: loop header
LB: loop body
LE: loop exit
PB: predicated region body
PF: predicated region fallthrough
CT: control target
= control target key end

     0   :  { %s1005_s3 = inlined_call_operand.vmem [shape: bf16[128,128], index: 3, kind: input, shape index: {}]   ;;  %s1006_s2 = inlined_call_operand.vmem [shape: bf16[128,128], index: 2, kind: input, shape index: {}]   ;;  %s1007_s1 = inlined_call_operand.vmem [shape: bf16[128,128], index: 1, kind: input, shape index: {}]   ;;  %s1008_s0 = inlined_call_operand.vmem [shape: bf16[128,128], index: 0, kind: input, shape index: {}]   ;;  %s1009_s4 = inlined_call_operand.vmem [shape: f32[1,128], index: 4, kind: input, shape index: {}]   ;;  %s1010_s5 = inlined_call_operand.vmem [shape: bf16[128,128], index: 5, kind: output, shape index: {}]  }
   0x1   :  { %v802_v0 = vld [vmem:[%s1005_s3 + $0x38] sm:$0xff]   ;;  %v804_v2 = vld [vmem:[%s1005_s3 + $0x30] sm:$0xff]   ;;  %v806_v4 = vld [vmem:[%s1005_s3 + $0x28] sm:$0xff]  }
   0x2   :  { %v803_v1 = vld [vmem:[%s1006_s2 + $0x38] sm:$0xff]   ;;  %738 = vmatprep.subr.bf16.mxu0 %v802_v0  ;;  %v805_v3 = vld [vmem:[%s1006_s2 + $0x30] sm:$0xff]   ;;  %v807_v5 = vld [vmem:[%s1006_s2 + $0x28] sm:$0xff]  }
   0x3   :  { %770 = vmatprep.subr.bf16.mxu1 %v803_v1  ;;  %739 = vmatpush3.bf16.msra.mxu0 %v802_v0  ;;  %v808_v6 = vld [vmem:[%s1005_s3 + $0x20] sm:$0xff]   ;;  %v810_v8 = vld [vmem:[%s1005_s3 + $0x18] sm:$0xff]   ;;  %v812_v10 = vld [vmem:[%s1005_s3 + $0x10] sm:$0xff]  }
   0x4   :  { %771 = vmatpush3.bf16.msra.mxu1 %v803_v1  ;;  %740 = vmatprep.subr.bf16.mxu0 %v804_v2  ;;  %v809_v7 = vld [vmem:[%s1006_s2 + $0x20] sm:$0xff]   ;;  %v811_v9 = vld [vmem:[%s1006_s2 + $0x18] sm:$0xff]   ;;  %v813_v11 = vld [vmem:[%s1006_s2 + $0x10] sm:$0xff]  }
   0x5   :  { %772 = vmatprep.subr.bf16.mxu1 %v805_v3  ;;  %v818_v12 = vld [vmem:[%s1007_s1] sm:$0xff]   ;;  %v814_v14 = vld [vmem:[%s1005_s3 + $0x8] sm:$0xff]   ;;  %v822_v20 = vld [vmem:[%s1007_s1 + $0x10] sm:$0xff]  }
   0x6   :  { %v819_v13 = vld [vmem:[%s1008_s0] sm:$0xff]   ;;  %754 = vmatprep.mubr.bf16.mxu0 %v818_v12  ;;  %v815_v15 = vld [vmem:[%s1006_s2 + $0x8] sm:$0xff]   ;;  %v823_v21 = vld [vmem:[%s1008_s0 + $0x10] sm:$0xff]  }
   0x7   :  { %741 = vmatpush3.bf16.msra.mxu0 %v804_v2  ;;  %786 = vmatprep.mubr.bf16.mxu1 %v819_v13  ;;  %v816_v16 = vld [vmem:[%s1005_s3] sm:$0xff]   ;;  %v820_v18 = vld [vmem:[%s1007_s1 + $0x8] sm:$0xff]   ;;  %v824_v22 = vld [vmem:[%s1007_s1 + $0x18] sm:$0xff]  }
   0x8   :  { %773 = vmatpush3.bf16.msra.mxu1 %v805_v3  ;;  %742 = vmatprep.subr.bf16.mxu0 %v806_v4  ;;  %v817_v17 = vld [vmem:[%s1006_s2] sm:$0xff]   ;;  %v821_v19 = vld [vmem:[%s1008_s0 + $0x8] sm:$0xff]   ;;  %v825_v23 = vld [vmem:[%s1008_s0 + $0x18] sm:$0xff]  }
   0x9   :  { %774 = vmatprep.subr.bf16.mxu1 %v807_v5  ;;  %v826_v24 = vld [vmem:[%s1007_s1 + $0x20] sm:$0xff]   ;;  %v828_v26 = vld [vmem:[%s1007_s1 + $0x28] sm:$0xff]   ;;  %v830_v28 = vld [vmem:[%s1007_s1 + $0x30] sm:$0xff]  }
   0xa   :  { %v827_v25 = vld [vmem:[%s1008_s0 + $0x20] sm:$0xff]   ;;  %v829_v27 = vld [vmem:[%s1008_s0 + $0x28] sm:$0xff]   ;;  %v831_v29 = vld [vmem:[%s1008_s0 + $0x30] sm:$0xff]  }
   0xb   :  { %743 = vmatpush3.bf16.msra.mxu0 %v806_v4  ;;  %v832_v30 = vld [vmem:[%s1007_s1 + $0x38] sm:$0xff]   ;;  %v963_v36 = vld [vmem:[%s1009_s4] ss:$0 sm:$0xff] }
   0xc   :  { %775 = vmatpush3.bf16.msra.mxu1 %v807_v5  ;;  %744 = vmatprep.subr.bf16.mxu0 %v808_v6  ;;  %v833_v31 = vld [vmem:[%s1008_s0 + $0x38] sm:$0xff]  }
   0xd   :  { %776 = vmatprep.subr.bf16.mxu1 %v809_v7 }
   0xf   :  { %745 = vmatpush3.bf16.msra.mxu0 %v808_v6 }
  0x10   :  { %777 = vmatpush3.bf16.msra.mxu1 %v809_v7  ;;  %746 = vmatprep.subr.bf16.mxu0 %v810_v8 }
  0x11   :  { %778 = vmatprep.subr.bf16.mxu1 %v811_v9 }
  0x13   :  { %747 = vmatpush3.bf16.msra.mxu0 %v810_v8 }
  0x14   :  { %779 = vmatpush3.bf16.msra.mxu1 %v811_v9  ;;  %748 = vmatprep.subr.bf16.mxu0 %v812_v10 }
  0x15   :  { %780 = vmatprep.subr.bf16.mxu1 %v813_v11 }
  0x17   :  { %749 = vmatpush3.bf16.msra.mxu0 %v812_v10 }
  0x18   :  { %781 = vmatpush3.bf16.msra.mxu1 %v813_v11  ;;  %750 = vmatprep.subr.bf16.mxu0 %v814_v14 }
  0x19   :  { %782 = vmatprep.subr.bf16.mxu1 %v815_v15 }
  0x1b   :  { %751 = vmatpush3.bf16.msra.mxu0 %v814_v14 }
  0x1c   :  { %783 = vmatpush3.bf16.msra.mxu1 %v815_v15  ;;  %752 = vmatprep.subr.bf16.mxu0 %v816_v16 }
  0x1d   :  { %784 = vmatprep.subr.bf16.mxu1 %v817_v17 }
  0x1f   :  { %753 = vmatpush3.bf16.msra.mxu0 %v816_v16 }
  0x20   :  { %785 = vmatpush3.bf16.msra.mxu1 %v817_v17 }
  0x22   :  { %755 = vmatmul.mubr.bf16.vlgmr.msra.gmra.mxu0 %v820_v18 }
  0x23   :  { %787 = vmatmul.mubr.bf16.vlgmr.msra.gmra.mxu1 %v821_v19  ;;  %758 = vmatprep.mubr.bf16.mxu0 %v822_v20 }
  0x24   :  { %790 = vmatprep.mubr.bf16.mxu1 %v823_v21 }
  0x2a   :  { %759 = vmatmul.mubr.bf16.gmra.mxu0 %v824_v22 }
  0x2b   :  { %791 = vmatmul.mubr.bf16.gmra.mxu1 %v825_v23  ;;  %762 = vmatprep.mubr.bf16.mxu0 %v826_v24 }
  0x2c   :  { %794 = vmatprep.mubr.bf16.mxu1 %v827_v25 }
  0x32   :  { %763 = vmatmul.mubr.bf16.gmra.mxu0 %v828_v26 }
  0x33   :  { %795 = vmatmul.mubr.bf16.gmra.mxu1 %v829_v27  ;;  %766 = vmatprep.mubr.bf16.mxu0 %v830_v28 }
  0x34   :  { %798 = vmatprep.mubr.bf16.mxu1 %v831_v29 }
  0x3a   :  { %767 = vmatmul.mubr.bf16.gmra.mxu0 %v832_v30 }
  0x3b   :  { %799 = vmatmul.mubr.bf16.gmra.mxu1 %v833_v31 }
  0xe2   :  { %v756_v32 = vpop.f32.mrf.mxu0 }
  0xe3   :  { %v788_v33 = vpop.f32.mrf.mxu1 }
  0xe4   :  { %v417_v34 = vadd.f32 %v788_v33, %v756_v32  ;;  %v215_v35 = vpop.f32.mrf.mxu0 }
  0xe5   :  { %v408_v37 = vpop.f32.mrf.mxu1 }
  0xe6   :  { %v409_v38 = vadd.f32 %v408_v37, %v215_v35  ;;  %v757_v39 = vpop.f32.mrf.mxu0  ;;  %v480_v41 = vadd.f32 %v963_v36, %v417_v34 }
  0xe7   :  { %v789_v40 = vpop.f32.mrf.mxu1 }
  0xe8   :  { %v420_v42 = vadd.f32 %v789_v40, %v757_v39  ;;  %v218_v43 = vpop.f32.mrf.mxu0  ;;  %v478_v45 = vadd.f32 %v963_v36, %v409_v38  ;;  %v496_v50 = vmax.f32 %v480_v41, 0.0 }
  0xe9   :  { %v411_v44 = vpop.f32.mrf.mxu1 }
  0xea   :  { %v481_v46 = vadd.f32 %v963_v36, %v420_v42  ;;  %v412_v47 = vadd.f32 %v411_v44, %v218_v43  ;;  %v760_v48 = vpop.f32.mrf.mxu0  ;;  %v494_v56 = vmax.f32 %v478_v45, 0.0 }
  0xeb   :  { %v792_v49 = vpop.f32.mrf.mxu1 }
  0xec   :  { %v497_v51 = vmax.f32 %v481_v46, 0.0  ;;  %v479_v52 = vadd.f32 %v963_v36, %v412_v47  ;;  %v433_v53 = vadd.f32 %v792_v49, %v760_v48  ;;  %v231_v54 = vpop.f32.mrf.mxu0 }
  0xed   :  { %v424_v55 = vpop.f32.mrf.mxu1 }
  0xee   :  { %v667_v57 = vpack.c.bf16 %v497_v51, %v496_v50  ;;  %v495_v58 = vmax.f32 %v479_v52, 0.0  ;;  %v425_v59 = vadd.f32 %v424_v55, %v231_v54  ;;  %v761_v60 = vpop.f32.mrf.mxu0  ;;  %v484_v63 = vadd.f32 %v963_v36, %v433_v53 }
  0xef   :  { %v793_v61 = vpop.f32.mrf.mxu1 }
  0xf0   :  { %699 = vst [vmem:[%s1010_s5 + $0x8] sm:$0xff] %v667_v57   ;;  %v662_v62 = vpack.c.bf16 %v495_v58, %v494_v56  ;;  %v436_v0 = vadd.f32 %v793_v61, %v761_v60  ;;  %v234_v1 = vpop.f32.mrf.mxu0  ;;  %v482_v3 = vadd.f32 %v963_v36, %v425_v59  ;;  %v500_v8 = vmax.f32 %v484_v63, 0.0 }
  0xf1   :  { %v427_v2 = vpop.f32.mrf.mxu1 }
  0xf2   :  { %663 = vst [vmem:[%s1010_s5] sm:$0xff] %v662_v62   ;;  %v485_v4 = vadd.f32 %v963_v36, %v436_v0  ;;  %v428_v5 = vadd.f32 %v427_v2, %v234_v1  ;;  %v764_v6 = vpop.f32.mrf.mxu0  ;;  %v498_v14 = vmax.f32 %v482_v3, 0.0 }
  0xf3   :  { %v796_v7 = vpop.f32.mrf.mxu1 }
  0xf4   :  { %v501_v9 = vmax.f32 %v485_v4, 0.0  ;;  %v483_v10 = vadd.f32 %v963_v36, %v428_v5  ;;  %v449_v11 = vadd.f32 %v796_v7, %v764_v6  ;;  %v247_v12 = vpop.f32.mrf.mxu0 }
  0xf5   :  { %v440_v13 = vpop.f32.mrf.mxu1 }
  0xf6   :  { %v677_v15 = vpack.c.bf16 %v501_v9, %v500_v8  ;;  %v499_v16 = vmax.f32 %v483_v10, 0.0  ;;  %v441_v17 = vadd.f32 %v440_v13, %v247_v12  ;;  %v765_v18 = vpop.f32.mrf.mxu0  ;;  %v488_v21 = vadd.f32 %v963_v36, %v449_v11 }
  0xf7   :  { %v797_v19 = vpop.f32.mrf.mxu1 }
  0xf8   :  { %701 = vst [vmem:[%s1010_s5 + $0x18] sm:$0xff] %v677_v15   ;;  %v672_v20 = vpack.c.bf16 %v499_v16, %v498_v14  ;;  %v452_v22 = vadd.f32 %v797_v19, %v765_v18  ;;  %v250_v23 = vpop.f32.mrf.mxu0  ;;  %v486_v25 = vadd.f32 %v963_v36, %v441_v17  ;;  %v504_v30 = vmax.f32 %v488_v21, 0.0 }
  0xf9   :  { %v443_v24 = vpop.f32.mrf.mxu1 }
  0xfa   :  { %700 = vst [vmem:[%s1010_s5 + $0x10] sm:$0xff] %v672_v20   ;;  %v489_v26 = vadd.f32 %v963_v36, %v452_v22  ;;  %v444_v27 = vadd.f32 %v443_v24, %v250_v23  ;;  %v768_v28 = vpop.f32.mrf.mxu0  ;;  %v502_v37 = vmax.f32 %v486_v25, 0.0 }
  0xfb   :  { %v800_v29 = vpop.f32.mrf.mxu1 }
  0xfc   :  { %v505_v31 = vmax.f32 %v489_v26, 0.0  ;;  %v487_v32 = vadd.f32 %v963_v36, %v444_v27  ;;  %v465_v33 = vadd.f32 %v800_v29, %v768_v28  ;;  %v263_v34 = vpop.f32.mrf.mxu0 }
  0xfd   :  { %v456_v35 = vpop.f32.mrf.mxu1 }
  0xfe   :  { %v687_v38 = vpack.c.bf16 %v505_v31, %v504_v30  ;;  %v503_v39 = vmax.f32 %v487_v32, 0.0  ;;  %v457_v40 = vadd.f32 %v456_v35, %v263_v34  ;;  %v769_v41 = vpop.f32.mrf.mxu0  ;;  %v492_v44 = vadd.f32 %v963_v36, %v465_v33 }
  0xff   :  { %v801_v42 = vpop.f32.mrf.mxu1 }
 0x100   :  { %703 = vst [vmem:[%s1010_s5 + $0x28] sm:$0xff] %v687_v38   ;;  %v682_v43 = vpack.c.bf16 %v503_v39, %v502_v37  ;;  %v468_v45 = vadd.f32 %v801_v42, %v769_v41  ;;  %v266_v46 = vpop.f32.mrf.mxu0  ;;  %v490_v48 = vadd.f32 %v963_v36, %v457_v40  ;;  %v508_v51 = vmax.f32 %v492_v44, 0.0 }
 0x101   :  { %v459_v47 = vpop.f32.mrf.mxu1 }
 0x102   :  { %702 = vst [vmem:[%s1010_s5 + $0x20] sm:$0xff] %v682_v43   ;;  %v493_v49 = vadd.f32 %v963_v36, %v468_v45  ;;  %v460_v50 = vadd.f32 %v459_v47, %v266_v46  ;;  %v506_v54 = vmax.f32 %v490_v48, 0.0 }
 0x104   :  { %v509_v52 = vmax.f32 %v493_v49, 0.0  ;;  %v491_v53 = vadd.f32 %v963_v36, %v460_v50 }
 0x106   :  { %v697_v55 = vpack.c.bf16 %v509_v52, %v508_v51  ;;  %v507_v56 = vmax.f32 %v491_v53, 0.0 }
 0x108   :  { %705 = vst [vmem:[%s1010_s5 + $0x38] sm:$0xff] %v697_v55   ;;  %v692_v57 = vpack.c.bf16 %v507_v56, %v506_v54 }
 0x10a   :  { %704 = vst [vmem:[%s1010_s5 + $0x30] sm:$0xff] %v692_v57  }

</bundles_post_ra>
